<compile_context>
chip_gen: v7x
topology: tpu7x:2x2x1
jax: 0.10.0
libtpu: 0.0.40
codegen_flags: <defaults>
</compile_context>

<pallas_src>
import functools

import jax
import jax.numpy as jnp
import numpy as np
from jax.experimental import pallas as pl
from jax.experimental.pallas import tpu as pltpu


def _round_up(x, m):
    return ((x + m - 1) // m) * m


def _make_fused_kernel(H, W, Cp):
    """Fused basic-block kernel for one batch element (stride=1, identity residual)."""
    Hp, Wp = H + 2, W + 2
    K3 = 3 * Cp

    def conv3x3(src_ref, w_ref):
        # src_ref: (Hp, Wp, Cp) bf16 zero-halo activation.
        # w_ref:   (3, 3*Cp, Cp) bf16, laid out [kw, kh*Cin, Cout].
        # Deep-K formulation: per kw, lane-concat the three H-shifted slabs
        # (H shifts are leading-dim slices -> free) into an (H, W, 3*Cp) patch
        # and run one K=3*Cp matmul.  3 matmuls / 3 sublane-offset slab reads
        # per conv instead of 9.
        acc = jnp.zeros((H * W, Cp), jnp.float32)
        for kw in range(3):
            slab = src_ref[:, kw:kw + W, :]                            # (Hp, W, Cp) bf16
            patch = jnp.concatenate(
                [slab[0:H], slab[1:H + 1], slab[2:H + 2]], axis=-1)    # (H, W, 3*Cp)
            acc += jnp.dot(patch.reshape(H * W, K3), w_ref[kw],
                           preferred_element_type=jnp.float32)
        return acc                                                     # (H*W, Cp) f32

    def kernel(x_ref, w1_ref, w2_ref, s1_ref, b1_ref, s2_ref, b2_ref,
               out_ref, xpad_ref):
        # Fill the single reused bf16 halo scratch from the pre-padded input
        # block: the zero halo came in with the DMA, so no zeroing is needed.
        xpad_ref[...] = x_ref[0].astype(jnp.bfloat16)

        # --- conv1 -> bn1 -> relu ---
        y1 = conv3x3(xpad_ref, w1_ref)
        y1 = jnp.maximum(y1 * s1_ref[...] + b1_ref[...], 0.0)

        # Reuse the same scratch for conv2: overwrite only the interior; the
        # 1-px halo (rows 0/Hp-1, cols 0/Wp-1) still holds zeros.
        xpad_ref[1:H + 1, 1:W + 1, :] = y1.reshape(H, W, Cp).astype(jnp.bfloat16)

        # --- conv2 -> bn2 -> (+ identity residual) -> relu ---
        y2 = conv3x3(xpad_ref, w2_ref)
        y2 = y2 * s2_ref[...] + b2_ref[...]
        # Residual is re-read here (input block is VMEM-resident all step) so a
        # full f32 activation is not held live across both convs.
        res = x_ref[0, 1:H + 1, 1:W + 1, :].reshape(H * W, Cp)
        out = jnp.maximum(y2 + res, 0.0).astype(out_ref.dtype)
        out_ref[...] = out.reshape(1, H, W, Cp)

    return kernel


def _fused_block(x, w1, w2, s1, b1, s2, b2):
    """x: (N,Hp,Wp,Cp) f32 pre-padded (1-px halo); w*: (3,3*Cp,Cp) bf16; s*/b*: (1,Cp) f32."""
    N, Hp, Wp, Cp = x.shape
    H, W = Hp - 2, Wp - 2
    kernel = _make_fused_kernel(H, W, Cp)

    xblk = (1, Hp, Wp, Cp)
    wblk = (3, 3 * Cp, Cp)
    sblk = (1, Cp)
    oblk = (1, H, W, Cp)

    # VMEM budget, including in-kernel temporaries (per perf review).
    est = (2 * Hp * Wp * Cp * 4          # input block (f32), double-buffered
           + 2 * H * W * Cp * 4          # output block (f32), double-buffered
           + 2 * 2 * 9 * Cp * Cp * 2     # two bf16 weight tensors, double-buffered
           + Hp * Wp * Cp * 2            # single reused bf16 halo scratch
           + 4 * H * W * Cp * 4          # f32 acc / bn / residual temporaries
           + 2 * H * W * 3 * Cp * 2      # bf16 deep-K patch temporaries
           + 8 * 2 * Cp * 4)             # BN scale/bias params
    try:
        cap = int(pltpu.get_tpu_info().vmem_capacity_bytes)
    except Exception:  # pragma: no cover - conservative fallback (v7x per-TC VMEM)
        cap = 64 << 20
    vmem_limit = int(min(max(est + (8 << 20), 32 << 20),
                         max(cap - (16 << 20), 32 << 20)))

    grid_spec = pltpu.PrefetchScalarGridSpec(
        num_scalar_prefetch=0,
        grid=(N,),
        in_specs=[
            pl.BlockSpec(xblk, lambda n: (n, 0, 0, 0)),
            # Constant-index specs: weights / BN params DMA'd once, VMEM-resident.
            # TODO(synk): pipeline_mode=pl.Buffered(1) would single-buffer these
            #             constants for a little extra headroom on v7x.
            pl.BlockSpec(wblk, lambda n: (0, 0, 0)),
            pl.BlockSpec(wblk, lambda n: (0, 0, 0)),
            pl.BlockSpec(sblk, lambda n: (0, 0)),
            pl.BlockSpec(sblk, lambda n: (0, 0)),
            pl.BlockSpec(sblk, lambda n: (0, 0)),
            pl.BlockSpec(sblk, lambda n: (0, 0)),
        ],
        out_specs=pl.BlockSpec(oblk, lambda n: (n, 0, 0, 0)),
        scratch_shapes=[
            pltpu.VMEM((Hp, Wp, Cp), jnp.bfloat16),   # single reused halo scratch
        ],
    )

    return pl.pallas_call(
        kernel,
        out_shape=jax.ShapeDtypeStruct((N, H, W, Cp), jnp.float32),
        grid_spec=grid_spec,
        compiler_params=pltpu.CompilerParams(
            dimension_semantics=("parallel",),
            vmem_limit_bytes=vmem_limit,
        ),
    )(x, w1, w2, s1, b1, s2, b2)


@functools.partial(jax.jit, static_argnames=("stride",))
def basic_block_mtl(x_nchw, params, stride=1):
    """Forward pass of BasicBlockMtl (downsample=None). Input/output: NCHW f32."""
    if stride != 1:
        # TODO(synk): stride>1 needs the downsample branch for the residual.
        raise NotImplementedError("stride != 1 requires a downsample branch")

    N, C, H, W = x_nchw.shape
    Cp = _round_up(C, 128)  # lane-pad channels -> full-lane matmuls and stores

    x = jnp.transpose(x_nchw, (0, 2, 3, 1))                       # NHWC
    # One fused pad pass: 1-px zero spatial halo + channel lane pad.
    x = jnp.pad(x, ((0, 0), (1, 1), (1, 1), (0, Cp - C)))

    def fold_w(w, mtl):
        # Conv2dMtl: effective weight = w * mtl, broadcast over the 3x3 taps.
        w = jnp.transpose(w * mtl, (2, 3, 1, 0))                  # OIHW -> HWIO
        w = jnp.pad(w, ((0, 0), (0, 0), (0, Cp - C), (0, Cp - C)))
        # Rearrange to (kw, kh*Cin, Cout) for the deep-K (K = 3*Cp) tap matmuls.
        w = jnp.transpose(w, (1, 0, 2, 3)).reshape(3, 3 * Cp, Cp)
        return w.astype(jnp.bfloat16)                             # MXU inputs in bf16

    def fold_bn(g, b, m, v, eps=1e-5):
        s = g / jnp.sqrt(v + eps)
        bb = b - m * s
        s = jnp.pad(s, (0, Cp - C)).reshape(1, Cp)
        bb = jnp.pad(bb, (0, Cp - C)).reshape(1, Cp)
        return s.astype(jnp.float32), bb.astype(jnp.float32)

    w1 = fold_w(params["w1"], params["mtl_w1"])
    w2 = fold_w(params["w2"], params["mtl_w2"])
    s1, b1 = fold_bn(params["bn1_gamma"], params["bn1_beta"],
                     params["bn1_mean"], params["bn1_var"])
    s2, b2 = fold_bn(params["bn2_gamma"], params["bn2_beta"],
                     params["bn2_mean"], params["bn2_var"])

    out = _fused_block(x, w1, w2, s1, b1, s2, b2)                 # (N,H,W,Cp) f32
    out = out[..., :C]
    return jnp.transpose(out, (0, 3, 1, 2))                       # -> NCHW


def _reference(x_nchw, params):
    """Pure-JAX f32 reference (lax conv) for validation."""
    x = jnp.transpose(x_nchw, (0, 2, 3, 1))
    w1 = jnp.transpose(params["w1"] * params["mtl_w1"], (2, 3, 1, 0))
    w2 = jnp.transpose(params["w2"] * params["mtl_w2"], (2, 3, 1, 0))
    dn = ("NHWC", "HWIO", "NHWC")

    def bn(y, g, b, m, v):
        return (y - m) / jnp.sqrt(v + 1e-5) * g + b

    out = jax.lax.conv_general_dilated(x, w1, (1, 1), "SAME", dimension_numbers=dn)
    out = jnp.maximum(bn(out, params["bn1_gamma"], params["bn1_beta"],
                         params["bn1_mean"], params["bn1_var"]), 0.0)
    out = jax.lax.conv_general_dilated(out, w2, (1, 1), "SAME", dimension_numbers=dn)
    out = bn(out, params["bn2_gamma"], params["bn2_beta"],
             params["bn2_mean"], params["bn2_var"])
    out = jnp.maximum(out + x, 0.0)
    return jnp.transpose(out, (0, 3, 1, 2))


if __name__ == "__main__":
    N, C, H, W = 2, 8, 16, 16          # inplanes = planes = 8, downsample=None
    planes = C

    key = jax.random.PRNGKey(0)
    ks = jax.random.split(key, 10)
    params = {
        "w1": 0.1 * jax.random.normal(ks[0], (planes, C, 3, 3), jnp.float32),
        "mtl_w1": 1.0 + 0.05 * jax.random.normal(ks[1], (planes, C, 1, 1), jnp.float32),
        "w2": 0.1 * jax.random.normal(ks[2], (planes, planes, 3, 3), jnp.float32),
        "mtl_w2": 1.0 + 0.05 * jax.random.normal(ks[3], (planes, planes, 1, 1), jnp.float32),
        "bn1_gamma": 1.0 + 0.1 * jax.random.normal(ks[4], (planes,), jnp.float32),
        "bn1_beta": 0.1 * jax.random.normal(ks[5], (planes,), jnp.float32),
        "bn1_mean": 0.05 * jax.random.normal(ks[6], (planes,), jnp.float32),
        "bn1_var": jnp.abs(1.0 + 0.1 * jax.random.normal(ks[7], (planes,), jnp.float32)),
        "bn2_gamma": 1.0 + 0.1 * jax.random.normal(ks[8], (planes,), jnp.float32),
        "bn2_beta": 0.1 * jax.random.normal(ks[9], (planes,), jnp.float32),
        "bn2_mean": jnp.zeros((planes,), jnp.float32),
        "bn2_var": jnp.ones((planes,), jnp.float32),
    }

    x = jax.random.normal(jax.random.PRNGKey(42), (N, C, H, W), jnp.float32)

    out = jax.block_until_ready(basic_block_mtl(x, params))
    ref = jax.block_until_ready(_reference(x, params))

    # bf16 MXU inputs with f32 accumulation -> loosen tolerance vs f32 reference.
    np.testing.assert_allclose(np.asarray(out), np.asarray(ref), rtol=2e-2, atol=2e-2)

    print("KERNEL_OK")
</pallas_src>

<mosaic_0001>
module attributes {stable_mosaic.version = 11 : i64} {
  func.func @kernel(%arg0: i32, %arg1: memref<1x18x18x128xf32, #tpu.memory_space<vmem>>, %arg2: memref<3x384x128xbf16, #tpu.memory_space<vmem>>, %arg3: memref<3x384x128xbf16, #tpu.memory_space<vmem>>, %arg4: memref<1x128xf32, #tpu.memory_space<vmem>>, %arg5: memref<1x128xf32, #tpu.memory_space<vmem>>, %arg6: memref<1x128xf32, #tpu.memory_space<vmem>>, %arg7: memref<1x128xf32, #tpu.memory_space<vmem>>, %arg8: memref<1x16x16x128xf32, #tpu.memory_space<vmem>>, %arg9: memref<18x18x128xbf16, #tpu.memory_space<vmem>>) attributes {dimension_semantics = [#tpu.dimension_semantics<parallel>], iteration_bounds = array<i64: 2>, scalar_prefetch = 0 : i64, scratch_operands = 1 : i64, tpu.core_type = #tpu.core_type<tc>, window_params = [{transform_indices = @transform_0, window_bounds = array<i64: 1, 18, 18, 128>}, {pipeline_mode = #tpu.pipeline_mode<synchronous>, transform_indices = @transform_1, window_bounds = array<i64: 3, 384, 128>}, {pipeline_mode = #tpu.pipeline_mode<synchronous>, transform_indices = @transform_2, window_bounds = array<i64: 3, 384, 128>}, {pipeline_mode = #tpu.pipeline_mode<synchronous>, transform_indices = @transform_3, window_bounds = array<i64: 1, 128>}, {pipeline_mode = #tpu.pipeline_mode<synchronous>, transform_indices = @transform_4, window_bounds = array<i64: 1, 128>}, {pipeline_mode = #tpu.pipeline_mode<synchronous>, transform_indices = @transform_5, window_bounds = array<i64: 1, 128>}, {pipeline_mode = #tpu.pipeline_mode<synchronous>, transform_indices = @transform_6, window_bounds = array<i64: 1, 128>}, {transform_indices = @transform_7, window_bounds = array<i64: 1, 16, 16, 128>}]} {
    %c0 = arith.constant 0 : index
    %c0_0 = arith.constant 0 : index
    %c0_1 = arith.constant 0 : index
    %c0_2 = arith.constant 0 : index
    %0 = vector.load %arg1[%c0, %c0_0, %c0_1, %c0_2] : memref<1x18x18x128xf32, #tpu.memory_space<vmem>>, vector<1x18x18x128xf32>
    %1 = vector.shape_cast %0 : vector<1x18x18x128xf32> to vector<18x18x128xf32>
    %2 = arith.truncf %1 : vector<18x18x128xf32> to vector<18x18x128xbf16>
    %c0_3 = arith.constant 0 : index
    %c0_4 = arith.constant 0 : index
    %c0_5 = arith.constant 0 : index
    %3 = vector.load %arg9[%c0_3, %c0_4, %c0_5] : memref<18x18x128xbf16, #tpu.memory_space<vmem>>, vector<18x18x128xbf16>
    tpu.vector_store %arg9[%c0_3, %c0_4, %c0_5], %2 {strides = array<i32>} : memref<18x18x128xbf16, #tpu.memory_space<vmem>>, vector<18x18x128xbf16>,
    %cst = arith.constant 0.000000e+00 : f32
    %4 = vector.broadcast %cst : f32 to vector<256x128xf32>
    %c0_6 = arith.constant 0 : index
    %c0_7 = arith.constant 0 : index
    %c0_8 = arith.constant 0 : index
    %5 = vector.load %arg9[%c0_6, %c0_7, %c0_8] : memref<18x18x128xbf16, #tpu.memory_space<vmem>>, vector<18x16x128xbf16>
    %6 = vector.extract_strided_slice %5 {offsets = [0, 0, 0], sizes = [16, 16, 128], strides = [1, 1, 1]} : vector<18x16x128xbf16> to vector<16x16x128xbf16>
    %7 = vector.extract_strided_slice %5 {offsets = [1, 0, 0], sizes = [16, 16, 128], strides = [1, 1, 1]} : vector<18x16x128xbf16> to vector<16x16x128xbf16>
    %8 = vector.extract_strided_slice %5 {offsets = [2, 0, 0], sizes = [16, 16, 128], strides = [1, 1, 1]} : vector<18x16x128xbf16> to vector<16x16x128xbf16>
    %9 = tpu.concatenate %6, %7, %8 in 2 : vector<16x16x128xbf16>, vector<16x16x128xbf16>, vector<16x16x128xbf16> -> vector<16x16x384xbf16>
    %10 = vector.shape_cast %9 : vector<16x16x384xbf16> to vector<256x384xbf16>
    %c0_9 = arith.constant 0 : index
    %c0_10 = arith.constant 0 : index
    %c0_11 = arith.constant 0 : index
    %11 = vector.load %arg2[%c0_9, %c0_10, %c0_11] : memref<3x384x128xbf16, #tpu.memory_space<vmem>>, vector<1x384x128xbf16>
    %12 = vector.shape_cast %11 : vector<1x384x128xbf16> to vector<384x128xbf16>
    %cst_12 = arith.constant dense<0.000000e+00> : vector<256x128xf32>
    %13 = tpu.matmul %10, %12, %cst_12 {dimension_numbers = #tpu.dot_dimension_numbers<[1], [0], [0], [1], [0, 0, 1, 1], [], []>} : vector<256x384xbf16>, vector<384x128xbf16>, vector<256x128xf32> -> vector<256x128xf32>
    %14 = arith.addf %4, %13 : vector<256x128xf32>
    %c0_13 = arith.constant 0 : index
    %c1 = arith.constant 1 : index
    %c0_14 = arith.constant 0 : index
    %15 = vector.load %arg9[%c0_13, %c1, %c0_14] : memref<18x18x128xbf16, #tpu.memory_space<vmem>>, vector<18x16x128xbf16>
    %16 = vector.extract_strided_slice %15 {offsets = [0, 0, 0], sizes = [16, 16, 128], strides = [1, 1, 1]} : vector<18x16x128xbf16> to vector<16x16x128xbf16>
    %17 = vector.extract_strided_slice %15 {offsets = [1, 0, 0], sizes = [16, 16, 128], strides = [1, 1, 1]} : vector<18x16x128xbf16> to vector<16x16x128xbf16>
    %18 = vector.extract_strided_slice %15 {offsets = [2, 0, 0], sizes = [16, 16, 128], strides = [1, 1, 1]} : vector<18x16x128xbf16> to vector<16x16x128xbf16>
    %19 = tpu.concatenate %16, %17, %18 in 2 : vector<16x16x128xbf16>, vector<16x16x128xbf16>, vector<16x16x128xbf16> -> vector<16x16x384xbf16>
    %20 = vector.shape_cast %19 : vector<16x16x384xbf16> to vector<256x384xbf16>
    %c1_15 = arith.constant 1 : index
    %c0_16 = arith.constant 0 : index
    %c0_17 = arith.constant 0 : index
    %21 = vector.load %arg2[%c1_15, %c0_16, %c0_17] : memref<3x384x128xbf16, #tpu.memory_space<vmem>>, vector<1x384x128xbf16>
    %22 = vector.shape_cast %21 : vector<1x384x128xbf16> to vector<384x128xbf16>
    %cst_18 = arith.constant dense<0.000000e+00> : vector<256x128xf32>
    %23 = tpu.matmul %20, %22, %cst_18 {dimension_numbers = #tpu.dot_dimension_numbers<[1], [0], [0], [1], [0, 0, 1, 1], [], []>} : vector<256x384xbf16>, vector<384x128xbf16>, vector<256x128xf32> -> vector<256x128xf32>
    %24 = arith.addf %14, %23 : vector<256x128xf32>
    %c0_19 = arith.constant 0 : index
    %c2 = arith.constant 2 : index
    %c0_20 = arith.constant 0 : index
    %25 = vector.load %arg9[%c0_19, %c2, %c0_20] : memref<18x18x128xbf16, #tpu.memory_space<vmem>>, vector<18x16x128xbf16>
    %26 = vector.extract_strided_slice %25 {offsets = [0, 0, 0], sizes = [16, 16, 128], strides = [1, 1, 1]} : vector<18x16x128xbf16> to vector<16x16x128xbf16>
    %27 = vector.extract_strided_slice %25 {offsets = [1, 0, 0], sizes = [16, 16, 128], strides = [1, 1, 1]} : vector<18x16x128xbf16> to vector<16x16x128xbf16>
    %28 = vector.extract_strided_slice %25 {offsets = [2, 0, 0], sizes = [16, 16, 128], strides = [1, 1, 1]} : vector<18x16x128xbf16> to vector<16x16x128xbf16>
    %29 = tpu.concatenate %26, %27, %28 in 2 : vector<16x16x128xbf16>, vector<16x16x128xbf16>, vector<16x16x128xbf16> -> vector<16x16x384xbf16>
    %30 = vector.shape_cast %29 : vector<16x16x384xbf16> to vector<256x384xbf16>
    %c2_21 = arith.constant 2 : index
    %c0_22 = arith.constant 0 : index
    %c0_23 = arith.constant 0 : index
    %31 = vector.load %arg2[%c2_21, %c0_22, %c0_23] : memref<3x384x128xbf16, #tpu.memory_space<vmem>>, vector<1x384x128xbf16>
    %32 = vector.shape_cast %31 : vector<1x384x128xbf16> to vector<384x128xbf16>
    %cst_24 = arith.constant dense<0.000000e+00> : vector<256x128xf32>
    %33 = tpu.matmul %30, %32, %cst_24 {dimension_numbers = #tpu.dot_dimension_numbers<[1], [0], [0], [1], [0, 0, 1, 1], [], []>} : vector<256x384xbf16>, vector<384x128xbf16>, vector<256x128xf32> -> vector<256x128xf32>
    %34 = arith.addf %24, %33 : vector<256x128xf32>
    %c0_25 = arith.constant 0 : index
    %c0_26 = arith.constant 0 : index
    %35 = vector.load %arg4[%c0_25, %c0_26] : memref<1x128xf32, #tpu.memory_space<vmem>>, vector<1x128xf32>
    %36 = vector.broadcast %35 : vector<1x128xf32> to vector<256x128xf32>
    %37 = arith.mulf %34, %36 : vector<256x128xf32>
    %c0_27 = arith.constant 0 : index
    %c0_28 = arith.constant 0 : index
    %38 = vector.load %arg5[%c0_27, %c0_28] : memref<1x128xf32, #tpu.memory_space<vmem>>, vector<1x128xf32>
    %39 = vector.broadcast %38 : vector<1x128xf32> to vector<256x128xf32>
    %40 = arith.addf %37, %39 : vector<256x128xf32>
    %cst_29 = arith.constant 0.000000e+00 : f32
    %41 = vector.broadcast %cst_29 : f32 to vector<256x128xf32>
    %42 = arith.maximumf %40, %41 : vector<256x128xf32>
    %43 = vector.shape_cast %42 : vector<256x128xf32> to vector<16x16x128xf32>
    %44 = arith.truncf %43 : vector<16x16x128xf32> to vector<16x16x128xbf16>
    %c1_30 = arith.constant 1 : index
    %c1_31 = arith.constant 1 : index
    %c0_32 = arith.constant 0 : index
    %45 = vector.load %arg9[%c1_30, %c1_31, %c0_32] : memref<18x18x128xbf16, #tpu.memory_space<vmem>>, vector<16x16x128xbf16>
    tpu.vector_store %arg9[%c1_30, %c1_31, %c0_32], %44 {strides = array<i32>} : memref<18x18x128xbf16, #tpu.memory_space<vmem>>, vector<16x16x128xbf16>,
    %cst_33 = arith.constant 0.000000e+00 : f32
    %46 = vector.broadcast %cst_33 : f32 to vector<256x128xf32>
    %c0_34 = arith.constant 0 : index
    %c0_35 = arith.constant 0 : index
    %c0_36 = arith.constant 0 : index
    %47 = vector.load %arg9[%c0_34, %c0_35, %c0_36] : memref<18x18x128xbf16, #tpu.memory_space<vmem>>, vector<18x16x128xbf16>
    %48 = vector.extract_strided_slice %47 {offsets = [0, 0, 0], sizes = [16, 16, 128], strides = [1, 1, 1]} : vector<18x16x128xbf16> to vector<16x16x128xbf16>
    %49 = vector.extract_strided_slice %47 {offsets = [1, 0, 0], sizes = [16, 16, 128], strides = [1, 1, 1]} : vector<18x16x128xbf16> to vector<16x16x128xbf16>
    %50 = vector.extract_strided_slice %47 {offsets = [2, 0, 0], sizes = [16, 16, 128], strides = [1, 1, 1]} : vector<18x16x128xbf16> to vector<16x16x128xbf16>
    %51 = tpu.concatenate %48, %49, %50 in 2 : vector<16x16x128xbf16>, vector<16x16x128xbf16>, vector<16x16x128xbf16> -> vector<16x16x384xbf16>
    %52 = vector.shape_cast %51 : vector<16x16x384xbf16> to vector<256x384xbf16>
    %c0_37 = arith.constant 0 : index
    %c0_38 = arith.constant 0 : index
    %c0_39 = arith.constant 0 : index
    %53 = vector.load %arg3[%c0_37, %c0_38, %c0_39] : memref<3x384x128xbf16, #tpu.memory_space<vmem>>, vector<1x384x128xbf16>
    %54 = vector.shape_cast %53 : vector<1x384x128xbf16> to vector<384x128xbf16>
    %cst_40 = arith.constant dense<0.000000e+00> : vector<256x128xf32>
    %55 = tpu.matmul %52, %54, %cst_40 {dimension_numbers = #tpu.dot_dimension_numbers<[1], [0], [0], [1], [0, 0, 1, 1], [], []>} : vector<256x384xbf16>, vector<384x128xbf16>, vector<256x128xf32> -> vector<256x128xf32>
    %56 = arith.addf %46, %55 : vector<256x128xf32>
    %c0_41 = arith.constant 0 : index
    %c1_42 = arith.constant 1 : index
    %c0_43 = arith.constant 0 : index
    %57 = vector.load %arg9[%c0_41, %c1_42, %c0_43] : memref<18x18x128xbf16, #tpu.memory_space<vmem>>, vector<18x16x128xbf16>
    %58 = vector.extract_strided_slice %57 {offsets = [0, 0, 0], sizes = [16, 16, 128], strides = [1, 1, 1]} : vector<18x16x128xbf16> to vector<16x16x128xbf16>
    %59 = vector.extract_strided_slice %57 {offsets = [1, 0, 0], sizes = [16, 16, 128], strides = [1, 1, 1]} : vector<18x16x128xbf16> to vector<16x16x128xbf16>
    %60 = vector.extract_strided_slice %57 {offsets = [2, 0, 0], sizes = [16, 16, 128], strides = [1, 1, 1]} : vector<18x16x128xbf16> to vector<16x16x128xbf16>
    %61 = tpu.concatenate %58, %59, %60 in 2 : vector<16x16x128xbf16>, vector<16x16x128xbf16>, vector<16x16x128xbf16> -> vector<16x16x384xbf16>
    %62 = vector.shape_cast %61 : vector<16x16x384xbf16> to vector<256x384xbf16>
    %c1_44 = arith.constant 1 : index
    %c0_45 = arith.constant 0 : index
    %c0_46 = arith.constant 0 : index
    %63 = vector.load %arg3[%c1_44, %c0_45, %c0_46] : memref<3x384x128xbf16, #tpu.memory_space<vmem>>, vector<1x384x128xbf16>
    %64 = vector.shape_cast %63 : vector<1x384x128xbf16> to vector<384x128xbf16>
    %cst_47 = arith.constant dense<0.000000e+00> : vector<256x128xf32>
    %65 = tpu.matmul %62, %64, %cst_47 {dimension_numbers = #tpu.dot_dimension_numbers<[1], [0], [0], [1], [0, 0, 1, 1], [], []>} : vector<256x384xbf16>, vector<384x128xbf16>, vector<256x128xf32> -> vector<256x128xf32>
    %66 = arith.addf %56, %65 : vector<256x128xf32>
    %c0_48 = arith.constant 0 : index
    %c2_49 = arith.constant 2 : index
    %c0_50 = arith.constant 0 : index
    %67 = vector.load %arg9[%c0_48, %c2_49, %c0_50] : memref<18x18x128xbf16, #tpu.memory_space<vmem>>, vector<18x16x128xbf16>
    %68 = vector.extract_strided_slice %67 {offsets = [0, 0, 0], sizes = [16, 16, 128], strides = [1, 1, 1]} : vector<18x16x128xbf16> to vector<16x16x128xbf16>
    %69 = vector.extract_strided_slice %67 {offsets = [1, 0, 0], sizes = [16, 16, 128], strides = [1, 1, 1]} : vector<18x16x128xbf16> to vector<16x16x128xbf16>
    %70 = vector.extract_strided_slice %67 {offsets = [2, 0, 0], sizes = [16, 16, 128], strides = [1, 1, 1]} : vector<18x16x128xbf16> to vector<16x16x128xbf16>
    %71 = tpu.concatenate %68, %69, %70 in 2 : vector<16x16x128xbf16>, vector<16x16x128xbf16>, vector<16x16x128xbf16> -> vector<16x16x384xbf16>
    %72 = vector.shape_cast %71 : vector<16x16x384xbf16> to vector<256x384xbf16>
    %c2_51 = arith.constant 2 : index
    %c0_52 = arith.constant 0 : index
    %c0_53 = arith.constant 0 : index
    %73 = vector.load %arg3[%c2_51, %c0_52, %c0_53] : memref<3x384x128xbf16, #tpu.memory_space<vmem>>, vector<1x384x128xbf16>
    %74 = vector.shape_cast %73 : vector<1x384x128xbf16> to vector<384x128xbf16>
    %cst_54 = arith.constant dense<0.000000e+00> : vector<256x128xf32>
    %75 = tpu.matmul %72, %74, %cst_54 {dimension_numbers = #tpu.dot_dimension_numbers<[1], [0], [0], [1], [0, 0, 1, 1], [], []>} : vector<256x384xbf16>, vector<384x128xbf16>, vector<256x128xf32> -> vector<256x128xf32>
    %76 = arith.addf %66, %75 : vector<256x128xf32>
    %c0_55 = arith.constant 0 : index
    %c0_56 = arith.constant 0 : index
    %77 = vector.load %arg6[%c0_55, %c0_56] : memref<1x128xf32, #tpu.memory_space<vmem>>, vector<1x128xf32>
    %78 = vector.broadcast %77 : vector<1x128xf32> to vector<256x128xf32>
    %79 = arith.mulf %76, %78 : vector<256x128xf32>
    %c0_57 = arith.constant 0 : index
    %c0_58 = arith.constant 0 : index
    %80 = vector.load %arg7[%c0_57, %c0_58] : memref<1x128xf32, #tpu.memory_space<vmem>>, vector<1x128xf32>
    %81 = vector.broadcast %80 : vector<1x128xf32> to vector<256x128xf32>
    %82 = arith.addf %79, %81 : vector<256x128xf32>
    %c0_59 = arith.constant 0 : index
    %c1_60 = arith.constant 1 : index
    %c1_61 = arith.constant 1 : index
    %c0_62 = arith.constant 0 : index
    %83 = vector.load %arg1[%c0_59, %c1_60, %c1_61, %c0_62] : memref<1x18x18x128xf32, #tpu.memory_space<vmem>>, vector<1x16x16x128xf32>
    %84 = vector.shape_cast %83 : vector<1x16x16x128xf32> to vector<16x16x128xf32>
    %85 = vector.shape_cast %84 : vector<16x16x128xf32> to vector<256x128xf32>
    %86 = arith.addf %82, %85 : vector<256x128xf32>
    %cst_63 = arith.constant 0.000000e+00 : f32
    %87 = vector.broadcast %cst_63 : f32 to vector<256x128xf32>
    %88 = arith.maximumf %86, %87 : vector<256x128xf32>
    %89 = vector.shape_cast %88 : vector<256x128xf32> to vector<1x16x16x128xf32>
    %c0_64 = arith.constant 0 : index
    %c0_65 = arith.constant 0 : index
    %c0_66 = arith.constant 0 : index
    %c0_67 = arith.constant 0 : index
    %90 = vector.load %arg8[%c0_64, %c0_65, %c0_66, %c0_67] : memref<1x16x16x128xf32, #tpu.memory_space<vmem>>, vector<1x16x16x128xf32>
    tpu.vector_store %arg8[%c0_64, %c0_65, %c0_66, %c0_67], %89 {strides = array<i32>} : memref<1x16x16x128xf32, #tpu.memory_space<vmem>>, vector<1x16x16x128xf32>,
    return
  }
  func.func @transform_0(%arg0: i32) -> (i32, i32, i32, i32) {
    %c0_i32 = arith.constant 0 : i32
    %c0_i32_0 = arith.constant 0 : i32
    %c0_i32_1 = arith.constant 0 : i32
    %c0_i32_2 = arith.constant 0 : i32
    return %arg0, %c0_i32, %c0_i32_0, %c0_i32_1 : i32, i32, i32, i32
  }
  func.func @transform_1(%arg0: i32) -> (i32, i32, i32) {
    %c0_i32 = arith.constant 0 : i32
    %c0_i32_0 = arith.constant 0 : i32
    %c0_i32_1 = arith.constant 0 : i32
    %c0_i32_2 = arith.constant 0 : i32
    return %c0_i32, %c0_i32_0, %c0_i32_1 : i32, i32, i32
  }
  func.func @transform_2(%arg0: i32) -> (i32, i32, i32) {
    %c0_i32 = arith.constant 0 : i32
    %c0_i32_0 = arith.constant 0 : i32
    %c0_i32_1 = arith.constant 0 : i32
    %c0_i32_2 = arith.constant 0 : i32
    return %c0_i32, %c0_i32_0, %c0_i32_1 : i32, i32, i32
  }
  func.func @transform_3(%arg0: i32) -> (i32, i32) {
    %c0_i32 = arith.constant 0 : i32
    %c0_i32_0 = arith.constant 0 : i32
    %c0_i32_1 = arith.constant 0 : i32
    return %c0_i32, %c0_i32_0 : i32, i32
  }
  func.func @transform_4(%arg0: i32) -> (i32, i32) {
    %c0_i32 = arith.constant 0 : i32
    %c0_i32_0 = arith.constant 0 : i32
    %c0_i32_1 = arith.constant 0 : i32
    return %c0_i32, %c0_i32_0 : i32, i32
  }
  func.func @transform_5(%arg0: i32) -> (i32, i32) {
    %c0_i32 = arith.constant 0 : i32
    %c0_i32_0 = arith.constant 0 : i32
    %c0_i32_1 = arith.constant 0 : i32
    return %c0_i32, %c0_i32_0 : i32, i32
  }
  func.func @transform_6(%arg0: i32) -> (i32, i32) {
    %c0_i32 = arith.constant 0 : i32
    %c0_i32_0 = arith.constant 0 : i32
    %c0_i32_1 = arith.constant 0 : i32
    return %c0_i32, %c0_i32_0 : i32, i32
  }
  func.func @transform_7(%arg0: i32) -> (i32, i32, i32, i32) {
    %c0_i32 = arith.constant 0 : i32
    %c0_i32_0 = arith.constant 0 : i32
    %c0_i32_1 = arith.constant 0 : i32
    %c0_i32_2 = arith.constant 0 : i32
    return %arg0, %c0_i32, %c0_i32_0, %c0_i32_1 : i32, i32, i32, i32
  }
}

</mosaic_0001>

<bundles_post_ra>
// kernel: basic_block_mtl.1
= control target key start
LH: loop header
LB: loop body
LE: loop exit
PB: predicated region body
PF: predicated region fallthrough
CT: control target
= control target key end

     0   :  { %s8358_s24 = smov 0   ;;  %s10631_s0 = inlined_call_operand.vmem [shape: f32[2,18,18,128], index: 0, kind: input, shape index: {}]   ;;  %s10632_s1 = inlined_call_operand.vmem [shape: bf16[3,384,128], index: 1, kind: input, shape index: {}]   ;;  %s10633_s2 = inlined_call_operand.vmem [shape: bf16[3,384,128], index: 2, kind: input, shape index: {}]   ;;  %s10634_s3 = inlined_call_operand.vmem [shape: f32[1,128], index: 3, kind: input, shape index: {}]   ;;  %s10635_s4 = inlined_call_operand.vmem [shape: f32[1,128], index: 4, kind: input, shape index: {}]   ;;  %s10636_s5 = inlined_call_operand.vmem [shape: f32[1,128], index: 5, kind: input, shape index: {}]   ;;  %s10637_s6 = inlined_call_operand.vmem [shape: f32[1,128], index: 6, kind: input, shape index: {}]   ;;  %s10638_s7 = inlined_call_operand.vmem [shape: f32[2,16,16,128], index: 7, kind: output, shape index: {}]  }
   0x1 LB: > { %s5873_s25 = sadd.s32 4294967295, %s8316_s24   ;;  %p5877_p0 = scmp.ge.s32.totalorder %s8316_s24, 1  ;;  %s8316_s24 = sphi %s8358_s24, %s17_s24  }
   0x2   : > { %p237_p1 = scmp.lt.s32.totalorder %s8316_s24, 3 }
   0x4   : > { %p238_p2 = pnand %p5877_p0, %p237_p1 }
   0x6   : > { %241 = sbr.rel (%p238_p2) target bundleno = 1112 (0x458), region = 48 }
   0xd   : > { %v8022_v0 = vld [vmem:[%s10632_s1 + $0x100] sm:$0xff]   ;;  %v8026_v4 = vld [vmem:[%s10632_s1 + $0x108] sm:$0xff]   ;;  %v8030_v8 = vld [vmem:[%s10632_s1 + $0x110] sm:$0xff]   ;;  %p269_p3 = scmp.lt.s32.totalorder %s5873_s25, 1  ;;  %vm886_vm0 = vsmask.f32 7424 }
   0xe   : > { %v8023_v1 = vld [vmem:[%s10632_s1 + $0x40] sm:$0xff]   ;;  %6589 = vmatprep.subr.bf16.mxu0 %v8022_v0  ;;  %v8027_v5 = vld [vmem:[%s10632_s1 + $0x48] sm:$0xff]   ;;  %v8031_v9 = vld [vmem:[%s10632_s1 + $0x50] sm:$0xff]   ;;  %vm2174_vm1 = vcmask 1046528   ;;  %vm3324_vm2 = vcmask 1043456   ;;  %vm3331_vm6 = vcmask 1040384  }
   0xf   : > { %v8024_v2 = vld [vmem:[%s10632_s1 + $0xc0] sm:$0xff]   ;;  %6725 = vmatprep.subr.bf16.mxu1 %v8023_v1  ;;  %v8028_v6 = vld [vmem:[%s10632_s1 + $0xc8] sm:$0xff]   ;;  %v8032_v10 = vld [vmem:[%s10632_s1 + $0xd0] sm:$0xff]   ;;  %s10705_s25 = smov (!%p269_p3, %s5873_s25), 1  ;;  %vm3325_vm3 = vsmask.f32 7938 }
  0x10   : > { %v8025_v3 = vld [vmem:[%s10632_s1] sm:$0xff]   ;;  %6590 = vmatpush3.bf16.msra.mxu0 %v8024_v2  ;;  %v8029_v7 = vld [vmem:[%s10632_s1 + $0x8] sm:$0xff]   ;;  %v8033_v11 = vld [vmem:[%s10632_s1 + $0x10] sm:$0xff]   ;;  %s8013_s13 = smul.u32 432, %s10705_s25  ;;  %vm3000_vm4 = vsmask.f32 256 }
  0x11   : > { %6726 = vmatpush3.bf16.msra.mxu1 %v8025_v3  ;;  %6591 = vmatprep.subr.bf16.mxu0 %v8026_v4  ;;  %v8034_v12 = vld [vmem:[%s10632_s1 + $0x118] sm:$0xff]   ;;  %v8038_v16 = vld [vmem:[%s10632_s1 + $0x120] sm:$0xff]   ;;  %v8042_v20 = vld [vmem:[%s10632_s1 + $0x128] sm:$0xff]   ;;  %vm3001_vm5 = vsmask.f32 4368  ;;  %s6449_s27 = sshll.u32 %s10705_s25, 8 }
  0x12   : > { %6727 = vmatprep.subr.bf16.mxu1 %v8027_v5  ;;  %v8035_v13 = vld [vmem:[%s10632_s1 + $0x58] sm:$0xff]   ;;  %v8039_v17 = vld [vmem:[%s10632_s1 + $0x60] sm:$0xff]   ;;  %v8043_v21 = vld [vmem:[%s10632_s1 + $0x68] sm:$0xff]   ;;  %s8466_s26 = scalar_lea.vmem %s10631_s0, %s8013_s13  ;;  %s10481_s30 = scalar_lea.vmem %s10638_s7, %s6449_s27 }
  0x13   : > { %v8036_v14 = vld [vmem:[%s10632_s1 + $0xd8] sm:$0xff]   ;;  %v8040_v18 = vld [vmem:[%s10632_s1 + $0xe0] sm:$0xff]   ;;  %v8044_v22 = vld [vmem:[%s10632_s1 + $0xe8] sm:$0xff]  }
  0x14   : > { %6592 = vmatpush3.bf16.msra.mxu0 %v8028_v6  ;;  %v8037_v15 = vld [vmem:[%s10632_s1 + $0x18] sm:$0xff]   ;;  %v8041_v19 = vld [vmem:[%s10632_s1 + $0x20] sm:$0xff]   ;;  %v8045_v23 = vld [vmem:[%s10632_s1 + $0x28] sm:$0xff]  }
  0x15   : > { %6728 = vmatpush3.bf16.msra.mxu1 %v8029_v7  ;;  %6593 = vmatprep.subr.bf16.mxu0 %v8030_v8  ;;  %v8046_v24 = vld [vmem:[%s10632_s1 + $0x130] sm:$0xff]   ;;  %v8050_v28 = vld [vmem:[%s10632_s1 + $0x138] sm:$0xff]   ;;  %v284_v33 = vld [vmem:[%s8466_s26 + $0x20] sm:$0xff] }
  0x16   : > { %6729 = vmatprep.subr.bf16.mxu1 %v8031_v9  ;;  %v8047_v25 = vld [vmem:[%s10632_s1 + $0x70] sm:$0xff]   ;;  %v8051_v29 = vld [vmem:[%s10632_s1 + $0x78] sm:$0xff]   ;;  %v285_v34 = vld [vmem:[%s8466_s26 + $0x28] sm:$0x3]  ;;  %v6454_v36 = vpack.c.bf16 %v284_v33, %v284_v33 }
  0x17   : > { %v8048_v26 = vld [vmem:[%s10632_s1 + $0xf0] sm:$0xff]   ;;  %v8052_v30 = vld [vmem:[%s10632_s1 + $0xf8] sm:$0xff]   ;;  %v6455_v37 = vpack.c.bf16 %v285_v34, %v285_v34  ;;  %v280_v38 = vld [vmem:[%s8466_s26] sm:$0xff] }
  0x18   : > { %6594 = vmatpush3.bf16.msra.mxu0 %v8032_v10  ;;  %v8049_v27 = vld [vmem:[%s10632_s1 + $0x30] sm:$0xff]   ;;  %v8053_v31 = vld [vmem:[%s10632_s1 + $0x38] sm:$0xff]   ;;  %v281_v39 = vld [vmem:[%s8466_s26 + $0x8] sm:$0xff]  ;;  %572 = vst [vmem:[#allocation2 + $0x10] sm:$0xf] %v6454_v36 }
  0x19   : > { %6730 = vmatpush3.bf16.msra.mxu1 %v8033_v11  ;;  %6595 = vmatprep.subr.bf16.mxu0 %v8034_v12  ;;  %v283_v32 = vld [vmem:[%s8466_s26 + $0x18] sm:$0xff]  ;;  %v282_v40 = vld [vmem:[%s8466_s26 + $0x10] sm:$0x3]  ;;  %v6539_v42 = vpack.c.bf16 %v281_v39, %v280_v38  ;;  %v8483_v43 = vld [vmem:[%s10632_s1 + $0x140] sm:$0xff]   ;;  %573 = vst [vmem:[#allocation2 + $0x14] sm:$0x1] %v6455_v37 }
  0x1a   : > { %6731 = vmatprep.subr.bf16.mxu1 %v8035_v13  ;;  %v6453_v35 = vpack.c.bf16 %v283_v32, %v283_v32  ;;  %v6452_v41 = vpack.c.bf16 %v282_v40, %v282_v40  ;;  %v286_v44 = vld [vmem:[%s8466_s26 + $0x30] sm:$0xff]  ;;  %v287_v45 = vld [vmem:[%s8466_s26 + $0x38] sm:$0xff]  ;;  %v288_v46 = vld [vmem:[%s8466_s26 + $0x40] sm:$0x3] }
  0x1b   : > { %6540 = vst [vmem:[#allocation2] sm:$0xff] %v6539_v42   ;;  %v6458_v47 = vpack.c.bf16 %v288_v46, %v288_v46  ;;  %v6544_v48 = vpack.c.bf16 %v287_v45, %v286_v44  ;;  %v289_v49 = vld [vmem:[%s8466_s26 + $0x48] sm:$0xff]  ;;  %v290_v50 = vld [vmem:[%s8466_s26 + $0x50] sm:$0xff]  ;;  %v291_v51 = vld [vmem:[%s8466_s26 + $0x58] sm:$0x3] }
  0x1c   : > { %6596 = vmatpush3.bf16.msra.mxu0 %v8036_v14  ;;  %571 = vst [vmem:[#allocation2 + $0xc] sm:$0xf] %v6453_v35  ;;  %570 = vst [vmem:[#allocation2 + $0x8] sm:$0x1] %v6452_v41  ;;  %v6459_v52 = vpack.c.bf16 %v289_v49, %v289_v49  ;;  %v6460_v53 = vpack.c.bf16 %v290_v50, %v290_v50  ;;  %v6461_v54 = vpack.c.bf16 %v291_v51, %v291_v51  ;;  %v292_v55 = vld [vmem:[%s8466_s26 + $0x60] sm:$0xff]  ;;  %v293_v56 = vld [vmem:[%s8466_s26 + $0x68] sm:$0xff] }
  0x1d   : > { %6732 = vmatpush3.bf16.msra.mxu1 %v8037_v15  ;;  %6597 = vmatprep.subr.bf16.mxu0 %v8038_v16  ;;  %6581 = vst [vmem:[#allocation2 + $0x18] sm:$0xff] %v6544_v48   ;;  %576 = vst [vmem:[#allocation2 + $0x20] sm:$0x1] %v6458_v47  ;;  %v294_v57 = vld [vmem:[%s8466_s26 + $0x70] sm:$0x3]  ;;  %v6549_v59 = vpack.c.bf16 %v293_v56, %v292_v55  ;;  %v295_v60 = vld [vmem:[%s8466_s26 + $0x78] sm:$0xff] }
  0x1e   : > { %6733 = vmatprep.subr.bf16.mxu1 %v8039_v17  ;;  %577 = vst [vmem:[#allocation2 + $0x24] sm:$0xf] %v6459_v52  ;;  %578 = vst [vmem:[#allocation2 + $0x28] sm:$0xf] %v6460_v53  ;;  %v6464_v58 = vpack.c.bf16 %v294_v57, %v294_v57  ;;  %v296_v61 = vld [vmem:[%s8466_s26 + $0x80] sm:$0xff]  ;;  %v6465_v63 = vpack.c.bf16 %v295_v60, %v295_v60  ;;  %v298_v2 = vld [vmem:[%s8466_s26 + $0x90] sm:$0xff] }
  0x1f   : > { %579 = vst [vmem:[#allocation2 + $0x2c] sm:$0x1] %v6461_v54  ;;  %v297_v62 = vld [vmem:[%s8466_s26 + $0x88] sm:$0x3]  ;;  %v6466_v0 = vpack.c.bf16 %v296_v61, %v296_v61  ;;  %6582 = vst [vmem:[#allocation2 + $0x30] sm:$0xff] %v6549_v59   ;;  %v299_v3 = vld [vmem:[%s8466_s26 + $0x98] sm:$0xff] }
  0x20   : > { %6598 = vmatpush3.bf16.msra.mxu0 %v8040_v18  ;;  %v6467_v1 = vpack.c.bf16 %v297_v62, %v297_v62  ;;  %582 = vst [vmem:[#allocation2 + $0x38] sm:$0x1] %v6464_v58  ;;  %v300_v4 = vld [vmem:[%s8466_s26 + $0xa0] sm:$0x3]  ;;  %v625_v6 = vld [vmem:[#allocation2 + $0x10] sm:$0xf]  ;;  %v6554_v8 = vpack.c.bf16 %v299_v3, %v298_v2  ;;  %vm9388_vm7 = vmand %vm3324_vm2, %vm3325_vm3 }
  0x21   : > { %6734 = vmatpush3.bf16.msra.mxu1 %v8041_v19  ;;  %6599 = vmatprep.subr.bf16.mxu0 %v8042_v20  ;;  %583 = vst [vmem:[#allocation2 + $0x3c] sm:$0xf] %v6465_v63  ;;  %584 = vst [vmem:[#allocation2 + $0x40] sm:$0xf] %v6466_v0  ;;  %v6470_v7 = vpack.c.bf16 %v300_v4, %v300_v4  ;;  %v301_v12 = vld [vmem:[%s8466_s26 + $0xa8] sm:$0xff]  ;;  %v302_v14 = vld [vmem:[%s8466_s26 + $0xb0] sm:$0xff] }
  0x22   : > { %6735 = vmatprep.subr.bf16.mxu1 %v8043_v21  ;;  %585 = vst [vmem:[#allocation2 + $0x44] sm:$0x1] %v6467_v1  ;;  %v8055_v10 = vld [vmem:[#allocation2 + $0x14] ss:$0 sps:$4 sm:$0x11]   ;;  %6583 = vst [vmem:[#allocation2 + $0x48] sm:$0xff] %v6554_v8   ;;  %v6471_v15 = vpack.c.bf16 %v301_v12, %v301_v12 }
  0x23   : > { %v624_v5 = vld [vmem:[#allocation2 + $0xc] sm:$0xf]  ;;  %v622_v11 = vld [vmem:[#allocation2] sm:$0xf]  ;;  %v623_v13 = vld [vmem:[#allocation2 + $0x4] sm:$0xf] }
  0x24   : > { %6600 = vmatpush3.bf16.msra.mxu0 %v8044_v22  ;;  %v5936_v9 = vcombine.low %v624_v5, %v625_v6  ;;  %588 = vst [vmem:[#allocation2 + $0x50] sm:$0x1] %v6470_v7  ;;  %v907_v18 = vshll.u32 %v8055_v10, 16  ;;  %v5935_v19 = vcombine.low %v622_v11, %v623_v13  ;;  %v8057_v20 = vld [vmem:[#allocation2 + $0x8] ss:$0 sps:$4 sm:$0x11]   ;;  %vm9399_vm8 = vmor %vm3000_vm4, %vm3001_vm5 }
  0x25   : > { %6736 = vmatpush3.bf16.msra.mxu1 %v8045_v23  ;;  %6601 = vmatprep.subr.bf16.mxu0 %v8046_v24  ;;  %v626_v21 = vld [vmem:[#allocation2 + $0x18] sm:$0xf]  ;;  %v627_v22 = vld [vmem:[#allocation2 + $0x1c] sm:$0xf]  ;;  %v6472_v23 = vpack.c.bf16 %v302_v14, %v302_v14  ;;  %589 = vst [vmem:[#allocation2 + $0x54] sm:$0xf] %v6471_v15  ;;  %vm9407_vm9 = vmand %vm3331_vm6, %vm3000_vm4 }
  0x26   : > { %6737 = vmatprep.subr.bf16.mxu1 %v8047_v25  ;;  %v900_v16 = vshrl.u32 %v5936_v9, 16  ;;  %v902_v17 = vshll.u32 %v5936_v9, 16  ;;  %1812 = vmatprep.mubr.bf16.mxu1 %v5936_v9  ;;  %v909_v25 = vrot.slane %v907_v18, 1  ;;  %v629_v32 = vld [vmem:[#allocation2 + $0x28] sm:$0xf]  ;;  %v304_v57 = vld [vmem:[%s8466_s26 + $0xc0] sm:$0xff] }
  0x27   : > { %590 = vst [vmem:[#allocation2 + $0x58] sm:$0xf] %v6472_v23  ;;  %v8062_v36 = vld [vmem:[#allocation2 + $0x2c] ss:$0 sps:$4 sm:$0x11]   ;;  %v8068_v62 = vld [vmem:[%s10632_s1 + $0x150] sm:$0xff]  }
  0x28   : > { %6602 = vmatpush3.bf16.msra.mxu0 %v8048_v26  ;;  %v904_v24 = vrot.slane %v902_v17, 1  ;;  %v888_v26 = vshrl.u32 %v5935_v19, 16  ;;  %v630_v41 = vld [vmem:[#allocation2 + $0x30] sm:$0xf]  ;;  %v631_v47 = vld [vmem:[#allocation2 + $0x34] sm:$0xf] }
  0x29   : > { %6738 = vmatpush3.bf16.msra.mxu1 %v8049_v27  ;;  %6603 = vmatprep.subr.bf16.mxu0 %v8050_v28  ;;  %v890_v27 = vshll.u32 %v5935_v19, 16  ;;  %v628_v28 = vld [vmem:[#allocation2 + $0x24] sm:$0xf]  ;;  %v931_v50 = vshll.u32 %v8062_v36, 16  ;;  %v8063_v51 = vld [vmem:[%s10632_s1 + $0x148] sm:$0xff]   ;;  %v8516_v52 = vcombine.low %v630_v41, %v631_v47  ;;  %v8073_v10 = vld [vmem:[%s10632_s1 + $0x158] sm:$0xff]  }
  0x2a   : > { %6739 = vmatprep.subr.bf16.mxu1 %v8051_v29  ;;  %v895_v29 = vshll.u32 %v8057_v20, 16  ;;  %v905_v33 = vor.u32 %v904_v24, %v900_v16  ;;  %v8505_v35 = vcombine.low %v628_v28, %v629_v32  ;;  %v8065_v56 = vld [vmem:[#allocation2 + $0x38] ss:$0 sps:$4 sm:$0x11]   ;;  %v305_v63 = vld [vmem:[%s8466_s26 + $0xc8] sm:$0xff]  ;;  %v8076_v3 = vld [vmem:[%s10632_s1 + $0x80] sm:$0xff]  }
  0x2b   : > { %v892_v34 = vrot.slane %v890_v27, 1  ;;  %v933_v60 = vrot.slane %v931_v50, 1  ;;  %v938_v61 = vshll.u32 %v8516_v52, 16  ;;  %v633_v0 = vld [vmem:[#allocation2 + $0x40] sm:$0xf]  ;;  %v6559_v2 = vpack.c.bf16 %v305_v63, %v304_v57  ;;  %v307_v11 = vld [vmem:[%s8466_s26 + $0xd8] sm:$0xff] }
  0x2c   : > { %6604 = vmatpush3.bf16.msra.mxu0 %v8052_v30  ;;  %v8503_v30 = vcombine.low %v626_v21, %v627_v22  ;;  %v897_v37 = vrot.slane %v895_v29, 1  ;;  %v910_v42 = vsel %vm886_vm0, %v905_v33, %v909_v25  ;;  %v924_v45 = vshrl.u32 %v8505_v35, 16  ;;  %v303_v1 = vld [vmem:[%s8466_s26 + $0xb8] sm:$0x3]  ;;  %v306_v12 = vld [vmem:[%s8466_s26 + $0xd0] sm:$0x3] }
  0x2d   : > { %6740 = vmatpush3.bf16.msra.mxu1 %v8053_v31  ;;  %7405 = vmatprep.subr.bf16.mxu0 %v8483_v43  ;;  %v8060_v31 = vld [vmem:[#allocation2 + $0x20] ss:$0 sps:$4 sm:$0x11]   ;;  %v893_v44 = vor.u32 %v892_v34, %v888_v26  ;;  %v926_v46 = vshll.u32 %v8505_v35, 16  ;;  %v936_v4 = vshrl.u32 %v8516_v52, 16  ;;  %v6473_v5 = vpack.c.bf16 %v303_v1, %v303_v1  ;;  %6584 = vst [vmem:[#allocation2 + $0x60] sm:$0xff] %v6559_v2  }
  0x2e   : > { %v912_v38 = vshrl.u32 %v8503_v30, 16  ;;  %v914_v39 = vshll.u32 %v8503_v30, 16  ;;  %v919_v40 = vshll.u32 %v8060_v31, 16  ;;  %1346 = vmatprep.mubr.bf16.mxu0 %v910_v42  ;;  %v940_v7 = vrot.slane %v938_v61, 1  ;;  %7453 = vmatprep.subr.bf16.mxu1 %v8076_v3  ;;  %v308_v13 = vld [vmem:[%s8466_s26 + $0xe0] sm:$0xff]  ;;  %v310_v26 = vld [vmem:[%s8466_s26 + $0xf0] sm:$0xff] }
  0x2f   : > { %v898_v53 = vsel %vm886_vm0, %v893_v44, %v897_v37  ;;  %v928_v54 = vrot.slane %v926_v46, 1  ;;  %v943_v8 = vshll.u32 %v8065_v56, 16  ;;  %591 = vst [vmem:[#allocation2 + $0x5c] sm:$0x1] %v6473_v5  ;;  %v6477_v14 = vpack.c.bf16 %v307_v11, %v307_v11  ;;  %v309_v17 = vld [vmem:[%s8466_s26 + $0xe8] sm:$0x3] }
  0x30   : > { %1813 = vmatmul.mubr.bf16.vlgmr.msra.gmra.mrb[0].mxu1 %v5935_v19  ;;  %v916_v48 = vrot.slane %v914_v39, 1  ;;  %v921_v49 = vrot.slane %v919_v40, 1  ;;  %1347 = vmatmul.mubr.bf16.vlgmr.msra.gmra.mrb[0].mxu0 %v898_v53  ;;  %v8067_v15 = vld [vmem:[#allocation2 + $0x44] ss:$0 sps:$4 sm:$0x11]   ;;  %v6476_v16 = vpack.c.bf16 %v306_v12, %v306_v12  ;;  %v6478_v18 = vpack.c.bf16 %v308_v13, %v308_v13  ;;  %v311_v27 = vld [vmem:[%s8466_s26 + $0xf8] sm:$0xff] }
  0x31   : > { %1820 = vmatprep.mubr.bf16.mxu1 %v8503_v30  ;;  %7406 = vmatpush3.bf16.msra.mxu0 %v8483_v43  ;;  %v929_v59 = vor.u32 %v928_v54, %v924_v45  ;;  %v632_v43 = vld [vmem:[#allocation2 + $0x3c] sm:$0xf]  ;;  %v634_v19 = vld [vmem:[#allocation2 + $0x48] sm:$0xf]  ;;  %v635_v20 = vld [vmem:[#allocation2 + $0x4c] sm:$0xf]  ;;  %v6479_v21 = vpack.c.bf16 %v309_v17, %v309_v17  ;;  %v941_v23 = vor.u32 %v940_v7, %v936_v4 }
  0x32   : > { %v917_v55 = vor.u32 %v916_v48, %v912_v38  ;;  %7407 = vmatprep.subr.bf16.mxu0 %v8063_v51  ;;  %7454 = vmatpush3.bf16.msra.mxu1 %v8076_v3  ;;  %595 = vst [vmem:[#allocation2 + $0x6c] sm:$0xf] %v6477_v14  ;;  %v8079_v22 = vld [vmem:[%s10632_s1 + $0x160] sm:$0xff]   ;;  %v945_v24 = vrot.slane %v943_v8, 1  ;;  %594 = vst [vmem:[#allocation2 + $0x68] sm:$0x1] %v6476_v16  ;;  %v6564_v31 = vpack.c.bf16 %v311_v27, %v310_v26 }
  0x33   : > { %v8537_v6 = vsel %vm886_vm0, %v929_v59, %v933_v60  ;;  %596 = vst [vmem:[#allocation2 + $0x70] sm:$0xf] %v6478_v18  ;;  %v312_v28 = vld [vmem:[%s8466_s26 + $0x100] sm:$0x3]  ;;  %597 = vst [vmem:[#allocation2 + $0x74] sm:$0x1] %v6479_v21  ;;  %v8568_v45 = vcombine.low %v634_v19, %v635_v20 }
  0x34   : > { %v8522_v58 = vsel %vm886_vm0, %v917_v55, %v921_v49  ;;  %v6482_v29 = vpack.c.bf16 %v312_v28, %v312_v28  ;;  %v8082_v32 = vld [vmem:[%s10632_s1 + $0x88] sm:$0xff]   ;;  %v314_v34 = vld [vmem:[%s8466_s26 + $0x110] sm:$0xff]  ;;  %v315_v36 = vld [vmem:[%s8466_s26 + $0x118] sm:$0x3]  ;;  %6585 = vst [vmem:[#allocation2 + $0x78] sm:$0xff] %v6564_v31   ;;  %v8566_v41 = vsel %vm886_vm0, %v941_v23, %v945_v24  ;;  %v955_v44 = vshll.u32 %v8067_v15, 16 }
  0x35   : > { %1354 = vmatprep.mubr.bf16.mxu0 %v8522_v58  ;;  %7408 = vmatpush3.bf16.msra.mxu0 %v8063_v51  ;;  %v313_v33 = vld [vmem:[%s8466_s26 + $0x108] sm:$0xff]  ;;  %v6484_v39 = vpack.c.bf16 %v314_v34, %v314_v34  ;;  %v6485_v40 = vpack.c.bf16 %v315_v36, %v315_v36  ;;  %v316_v47 = vld [vmem:[%s8466_s26 + $0x120] sm:$0xff]  ;;  %v8070_v49 = vld [vmem:[#allocation2 + $0x50] ss:$0 sps:$4 sm:$0x11]   ;;  %v962_v56 = vshll.u32 %v8568_v45, 16 }
  0x36   : > { %7409 = vmatprep.subr.bf16.mxu0 %v8068_v62  ;;  %600 = vst [vmem:[#allocation2 + $0x80] sm:$0x1] %v6482_v29  ;;  %7455 = vmatprep.subr.bf16.mxu1 %v8082_v32  ;;  %v6483_v38 = vpack.c.bf16 %v313_v33, %v313_v33  ;;  %v8085_v46 = vld [vmem:[%s10632_s1 + $0x168] sm:$0xff]   ;;  %v8088_v51 = vld [vmem:[%s10632_s1 + $0x90] sm:$0xff]   ;;  %v319_v53 = vld [vmem:[%s8466_s26 + $0x138] sm:$0xff]  ;;  %v957_v55 = vrot.slane %v955_v44, 1 }
  0x37   : > { %7456 = vmatpush3.bf16.msra.mxu1 %v8082_v32  ;;  %602 = vst [vmem:[#allocation2 + $0x88] sm:$0xf] %v6484_v39  ;;  %603 = vst [vmem:[#allocation2 + $0x8c] sm:$0x1] %v6485_v40  ;;  %v317_v48 = vld [vmem:[%s8466_s26 + $0x128] sm:$0xff]  ;;  %v6489_v57 = vpack.c.bf16 %v319_v53, %v319_v53  ;;  %v964_v1 = vrot.slane %v962_v56, 1 }
  0x38   : > { %1821 = vmatmul.mubr.bf16.gmra.mrb[4].mxu1 %v5936_v9  ;;  %v8539_v9 = vcombine.low %v632_v43, %v633_v0  ;;  %1355 = vmatmul.mubr.bf16.gmra.mrb[4].mxu0 %v910_v42  ;;  %601 = vst [vmem:[#allocation2 + $0x84] sm:$0xf] %v6483_v38  ;;  %v6569_v50 = vpack.c.bf16 %v317_v48, %v316_v47  ;;  %v636_v59 = vld [vmem:[#allocation2 + $0x54] sm:$0xf]  ;;  %v637_v60 = vld [vmem:[#allocation2 + $0x58] sm:$0xf] }
  0x39   : > { %1828 = vmatprep.mubr.bf16.mxu1 %v8505_v35  ;;  %1362 = vmatprep.mubr.bf16.mxu0 %v8537_v6  ;;  %v318_v61 = vld [vmem:[%s8466_s26 + $0x130] sm:$0x3]  ;;  %607 = vst [vmem:[#allocation2 + $0x9c] sm:$0xf] %v6489_v57  ;;  %v960_v0 = vshrl.u32 %v8568_v45, 16  ;;  %v8589_v2 = vcombine.low %v636_v59, %v637_v60  ;;  %v320_v3 = vld [vmem:[%s8466_s26 + $0x140] sm:$0xff] }
  0x3a   : > { %v950_v25 = vshll.u32 %v8539_v9, 16  ;;  %7410 = vmatpush3.bf16.msra.mxu0 %v8068_v62  ;;  %v948_v37 = vshrl.u32 %v8539_v9, 16  ;;  %6586 = vst [vmem:[#allocation2 + $0x90] sm:$0xff] %v6569_v50   ;;  %7457 = vmatprep.subr.bf16.mxu1 %v8088_v51  ;;  %v967_v62 = vshll.u32 %v8070_v49, 16  ;;  %v6488_v63 = vpack.c.bf16 %v318_v61, %v318_v61  ;;  %v638_v7 = vld [vmem:[#allocation2 + $0x60] sm:$0xf] }
  0x3b   : > { %7411 = vmatprep.subr.bf16.mxu0 %v8073_v10  ;;  %7458 = vmatpush3.bf16.msra.mxu1 %v8088_v51  ;;  %v6490_v4 = vpack.c.bf16 %v320_v3, %v320_v3  ;;  %v639_v8 = vld [vmem:[#allocation2 + $0x64] sm:$0xf]  ;;  %v8072_v11 = vld [vmem:[#allocation2 + $0x5c] ss:$0 sps:$4 sm:$0x11]   ;;  %v974_v12 = vshll.u32 %v8589_v2, 16 }
  0x3c   : > { %v952_v42 = vrot.slane %v950_v25, 1  ;;  %606 = vst [vmem:[#allocation2 + $0x98] sm:$0x1] %v6488_v63  ;;  %v969_v5 = vrot.slane %v967_v62, 1  ;;  %v321_v13 = vld [vmem:[%s8466_s26 + $0x148] sm:$0x3]  ;;  %v8604_v19 = vcombine.low %v638_v7, %v639_v8 }
  0x3d   : > { %608 = vst [vmem:[#allocation2 + $0xa0] sm:$0xf] %v6490_v4  ;;  %v6491_v14 = vpack.c.bf16 %v321_v13, %v321_v13  ;;  %v8091_v15 = vld [vmem:[%s10632_s1 + $0x170] sm:$0xff]   ;;  %v323_v17 = vld [vmem:[%s8466_s26 + $0x158] sm:$0xff]  ;;  %v972_v18 = vshrl.u32 %v8589_v2, 16  ;;  %v979_v23 = vshll.u32 %v8072_v11, 16 }
  0x3e   : > { %7412 = vmatpush3.bf16.msra.mxu0 %v8073_v10  ;;  %v953_v54 = vor.u32 %v952_v42, %v948_v37  ;;  %v965_v10 = vor.u32 %v964_v1, %v960_v0  ;;  %v322_v16 = vld [vmem:[%s8466_s26 + $0x150] sm:$0xff]  ;;  %v324_v24 = vld [vmem:[%s8466_s26 + $0x160] sm:$0x3]  ;;  %v8094_v26 = vld [vmem:[%s10632_s1 + $0x98] sm:$0xff]   ;;  %v986_v33 = vshll.u32 %v8604_v19, 16 }
  0x3f   : > { %7413 = vmatprep.subr.bf16.mxu0 %v8079_v22  ;;  %609 = vst [vmem:[#allocation2 + $0xa4] sm:$0x1] %v6491_v14  ;;  %v6574_v20 = vpack.c.bf16 %v323_v17, %v322_v16  ;;  %v6494_v25 = vpack.c.bf16 %v324_v24, %v324_v24  ;;  %v325_v27 = vld [vmem:[%s8466_s26 + $0x168] sm:$0xff]  ;;  %v326_v29 = vld [vmem:[%s8466_s26 + $0x170] sm:$0xff]  ;;  %v327_v31 = vld [vmem:[%s8466_s26 + $0x178] sm:$0x3]  ;;  %7459 = vmatprep.subr.bf16.mxu1 %v8094_v26 }
  0x40   : > { %1829 = vmatmul.mubr.bf16.gmra.mrb[8].mxu1 %v8503_v30  ;;  %1363 = vmatmul.mubr.bf16.gmra.mrb[8].mxu0 %v8522_v58  ;;  %v8586_v43 = vsel %vm886_vm0, %v953_v54, %v957_v55  ;;  %v8607_v21 = vsel %vm886_vm0, %v965_v10, %v969_v5  ;;  %v8075_v28 = vld [vmem:[#allocation2 + $0x68] ss:$0 sps:$4 sm:$0x11]   ;;  %v6495_v32 = vpack.c.bf16 %v325_v27, %v325_v27  ;;  %v640_v34 = vld [vmem:[#allocation2 + $0x6c] sm:$0xf]  ;;  %v8097_v38 = vld [vmem:[%s10632_s1 + $0x178] sm:$0xff]  }
  0x41   : > { %1836 = vmatprep.mubr.bf16.mxu1 %v8516_v52  ;;  %1370 = vmatprep.mubr.bf16.mxu0 %v8566_v41  ;;  %6587 = vst [vmem:[#allocation2 + $0xa8] sm:$0xff] %v6574_v20   ;;  %612 = vst [vmem:[#allocation2 + $0xb0] sm:$0x1] %v6494_v25  ;;  %v6496_v36 = vpack.c.bf16 %v326_v29, %v326_v29  ;;  %v6497_v37 = vpack.c.bf16 %v327_v31, %v327_v31  ;;  %v981_v40 = vrot.slane %v979_v23, 1  ;;  %v8098_v42 = vld [vmem:[%s10632_s1 + $0xa0] sm:$0xff]   ;;  %v8099_v47 = vld [vmem:[%s10632_s1 + $0xa8] sm:$0xff]  }
  0x42   : > { %7414 = vmatpush3.bf16.msra.mxu0 %v8079_v22  ;;  %v976_v22 = vrot.slane %v974_v12, 1  ;;  %613 = vst [vmem:[#allocation2 + $0xb4] sm:$0xf] %v6495_v32  ;;  %v641_v44 = vld [vmem:[#allocation2 + $0x70] sm:$0xf]  ;;  %7460 = vmatpush3.bf16.msra.mxu1 %v8094_v26  ;;  %v988_v48 = vrot.slane %v986_v33, 1 }
  0x43   : > { %7415 = vmatprep.subr.bf16.mxu0 %v8085_v46  ;;  %614 = vst [vmem:[#allocation2 + $0xb8] sm:$0xf] %v6496_v36  ;;  %615 = vst [vmem:[#allocation2 + $0xbc] sm:$0x1] %v6497_v37  ;;  %7461 = vmatprep.subr.bf16.mxu1 %v8098_v42  ;;  %v991_v49 = vshll.u32 %v8075_v28, 16  ;;  %v328_v50 = vld [vmem:[%s8466_s26 + $0x180] sm:$0xff]  ;;  %v8637_v55 = vcombine.low %v640_v34, %v641_v44 }
  0x44   : > { %v977_v39 = vor.u32 %v976_v22, %v972_v18  ;;  %v329_v51 = vld [vmem:[%s8466_s26 + $0x188] sm:$0xff]  ;;  %v330_v53 = vld [vmem:[%s8466_s26 + $0x190] sm:$0x3]  ;;  %v8645_v60 = vld [vmem:[#allocation2 + $0x74] ss:$0 sps:$4 sm:$0x11]  }
  0x45   : > { %v6500_v56 = vpack.c.bf16 %v330_v53, %v330_v53  ;;  %v6579_v57 = vpack.c.bf16 %v329_v51, %v328_v50  ;;  %v8102_v59 = vld [vmem:[%s10632_s1 + $0xb0] sm:$0xff]   ;;  %v993_v62 = vrot.slane %v991_v49, 1  ;;  %v998_v63 = vshll.u32 %v8637_v55, 16  ;;  %v642_v0 = vld [vmem:[#allocation2 + $0x78] sm:$0xf]  ;;  %v8104_v4 = vld [vmem:[%s10632_s1 + $0x1c0] sm:$0xff]  }
  0x46   : > { %7416 = vmatpush3.bf16.msra.mxu0 %v8085_v46  ;;  %v984_v46 = vshrl.u32 %v8604_v19, 16  ;;  %v8635_v54 = vsel %vm886_vm0, %v977_v39, %v981_v40  ;;  %7462 = vmatpush3.bf16.msra.mxu1 %v8098_v42  ;;  %v8649_v1 = vld [vmem:[#allocation2 + $0x7c] sm:$0xf]  ;;  %v996_v5 = vshrl.u32 %v8637_v55, 16  ;;  %v1003_v10 = vshll.u32 %v8645_v60, 16  ;;  %v8688_v26 = vld [vmem:[%s10632_s1 + $0x200] sm:$0xff]  }
  0x47   : > { %7417 = vmatprep.subr.bf16.mxu0 %v8091_v15  ;;  %7463 = vmatprep.subr.bf16.mxu1 %v8099_v47  ;;  %6588 = vst [vmem:[#allocation2 + $0xc0] sm:$0xff] %v6579_v57   ;;  %618 = vst [vmem:[#allocation2 + $0xc8] sm:$0x1] %v6500_v56  ;;  %v8103_v3 = vld [vmem:[%s10632_s1 + $0xb8] sm:$0xff]   ;;  %v1000_v8 = vrot.slane %v998_v63, 1  ;;  %v8663_v11 = vcombine.low %v642_v0, %v8649_v1  ;;  %v332_v49 = vld [vmem:[%s8466_s26 + $0x1a0] sm:$0xff] }
  0x48   : > { %1837 = vmatmul.mubr.bf16.gmra.mrb[12].mxu1 %v8505_v35  ;;  %1371 = vmatmul.mubr.bf16.gmra.mrb[12].mxu0 %v8537_v6  ;;  %v989_v61 = vor.u32 %v988_v48, %v984_v46  ;;  %v8666_v12 = vld [vmem:[#allocation2 + $0x80] ss:$0 sps:$4 sm:$0x11]   ;;  %v1005_v14 = vrot.slane %v1003_v10, 1  ;;  %v644_v16 = vld [vmem:[#allocation2 + $0x84] sm:$0xf]  ;;  %v6502_v53 = vpack.c.bf16 %v332_v49, %v332_v49 }
  0x49   : > { %1844 = vmatprep.mubr.bf16.mxu1 %v8539_v9  ;;  %1378 = vmatprep.mubr.bf16.mxu0 %v8586_v43  ;;  %v1001_v13 = vor.u32 %v1000_v8, %v996_v5  ;;  %v8672_v17 = vld [vmem:[#allocation2 + $0x88] sm:$0xf]  ;;  %v1008_v18 = vshrl.u32 %v8663_v11, 16  ;;  %v1015_v23 = vshll.u32 %v8666_v12, 16  ;;  %v646_v27 = vld [vmem:[#allocation2 + $0x90] sm:$0xf] }
  0x4a   : > { %7418 = vmatpush3.bf16.msra.mxu0 %v8091_v15  ;;  %7464 = vmatpush3.bf16.msra.mxu1 %v8099_v47  ;;  %v8659_v7 = vsel %vm886_vm0, %v989_v61, %v993_v62  ;;  %v1010_v15 = vshll.u32 %v8663_v11, 16  ;;  %v8680_v24 = vcombine.low %v644_v16, %v8672_v17  ;;  %v8683_v25 = vld [vmem:[#allocation2 + $0x8c] ss:$0 sps:$4 sm:$0x11]   ;;  %v8695_v32 = vld [vmem:[#allocation2 + $0x94] sm:$0xf] }
  0x4b   : > { %7419 = vmatprep.subr.bf16.mxu0 %v8097_v38  ;;  %7465 = vmatprep.subr.bf16.mxu1 %v8102_v59  ;;  %v8676_v20 = vsel %vm886_vm0, %v1001_v13, %v1005_v14  ;;  %v1017_v29 = vrot.slane %v1015_v23, 1  ;;  %v1027_v37 = vshll.u32 %v8683_v25, 16  ;;  %v8706_v39 = vld [vmem:[#allocation2 + $0x98] ss:$0 sps:$4 sm:$0x11]  }
  0x4c   : > { %v1012_v22 = vrot.slane %v1010_v15, 1  ;;  %v1022_v31 = vshll.u32 %v8680_v24, 16  ;;  %v1020_v33 = vshrl.u32 %v8680_v24, 16  ;;  %v648_v40 = vld [vmem:[#allocation2 + $0x9c] sm:$0xf]  ;;  %v1039_v63 = vshll.u32 %v8706_v39, 16 }
  0x4d   : > { %v1029_v44 = vrot.slane %v1027_v37, 1  ;;  %v8712_v47 = vld [vmem:[#allocation2 + $0xa0] sm:$0xf]  ;;  %v331_v48 = vld [vmem:[%s8466_s26 + $0x198] sm:$0xff]  ;;  %v333_v50 = vld [vmem:[%s8466_s26 + $0x1a8] sm:$0x3] }
  0x4e   : > { %7420 = vmatpush3.bf16.msra.mxu0 %v8097_v38  ;;  %7466 = vmatpush3.bf16.msra.mxu1 %v8102_v59  ;;  %v1013_v28 = vor.u32 %v1012_v22, %v1008_v18  ;;  %v1024_v36 = vrot.slane %v1022_v31, 1  ;;  %v8703_v38 = vcombine.low %v646_v27, %v8695_v32  ;;  %v6501_v51 = vpack.c.bf16 %v331_v48, %v331_v48  ;;  %v650_v0 = vld [vmem:[#allocation2 + $0xa8] sm:$0xf]  ;;  %v8738_v15 = vld [vmem:[#allocation2 + $0xb0] ss:$0 sps:$4 sm:$0x11]  }
  0x4f   : > { %6861 = vmatprep.subr.bf16.mxu0 %v8104_v4  ;;  %7467 = vmatprep.subr.bf16.mxu1 %v8103_v3  ;;  %v6503_v56 = vpack.c.bf16 %v333_v50, %v333_v50  ;;  %v8719_v59 = vcombine.low %v648_v40, %v8712_v47  ;;  %620 = vst [vmem:[#allocation2 + $0xd0] sm:$0xf] %v6502_v53  ;;  %v8730_v4 = vld [vmem:[#allocation2 + $0xa4] ss:$0 sps:$4 sm:$0x11]   ;;  %v1041_v10 = vrot.slane %v1039_v63, 1 }
  0x50   : > { %1845 = vmatmul.mubr.bf16.gmra.mrb[16].mxu1 %v8516_v52  ;;  %1379 = vmatmul.mubr.bf16.gmra.mrb[16].mxu0 %v8566_v41  ;;  %v8699_v34 = vsel %vm886_vm0, %v1013_v28, %v1017_v29  ;;  %v1025_v42 = vor.u32 %v1024_v36, %v1020_v33  ;;  %v1034_v46 = vshll.u32 %v8703_v38, 16  ;;  %v1032_v57 = vshrl.u32 %v8703_v38, 16  ;;  %619 = vst [vmem:[#allocation2 + $0xcc] sm:$0xf] %v6501_v51  ;;  %v652_v22 = vld [vmem:[#allocation2 + $0xb4] sm:$0xf] }
  0x51   : > { %1852 = vmatprep.mubr.bf16.mxu1 %v8568_v45  ;;  %1386 = vmatprep.mubr.bf16.mxu0 %v8607_v21  ;;  %621 = vst [vmem:[#allocation2 + $0xd4] sm:$0x1] %v6503_v56  ;;  %v1046_v5 = vshll.u32 %v8719_v59, 16  ;;  %v1044_v14 = vshrl.u32 %v8719_v59, 16  ;;  %v1051_v18 = vshll.u32 %v8730_v4, 16  ;;  %v1063_v29 = vshll.u32 %v8738_v15, 16 }
  0x52   : > { %7468 = vmatpush3.bf16.msra.mxu1 %v8103_v3  ;;  %v8722_v61 = vsel %vm886_vm0, %v1025_v42, %v1029_v44  ;;  %v1036_v62 = vrot.slane %v1034_v46, 1  ;;  %v8726_v3 = vld [vmem:[#allocation2 + $0xac] sm:$0xf]  ;;  %v8744_v27 = vld [vmem:[#allocation2 + $0xb8] sm:$0xf] }
  0x53   : > { %7501 = vmatprep.subr.bf16.mxu1 %v8688_v26  ;;  %v8735_v13 = vcombine.low %v650_v0, %v8726_v3  ;;  %v1048_v16 = vrot.slane %v1046_v5, 1  ;;  %v8752_v31 = vcombine.low %v652_v22, %v8744_v27  ;;  %v1053_v36 = vrot.slane %v1051_v18, 1  ;;  %v8760_v48 = vld [vmem:[#allocation2 + $0xbc] ss:$0 sps:$4 sm:$0x11]  }
  0x54   : > { %v1037_v8 = vor.u32 %v1036_v62, %v1032_v57  ;;  %v1065_v42 = vrot.slane %v1063_v29, 1  ;;  %v654_v49 = vld [vmem:[#allocation2 + $0xc0] sm:$0xf]  ;;  %v8766_v51 = vld [vmem:[#allocation2 + $0xc4] sm:$0xf]  ;;  %v1075_v57 = vshll.u32 %v8760_v48, 16 }
  0x55   : > { %v1058_v28 = vshll.u32 %v8735_v13, 16  ;;  %v1049_v33 = vor.u32 %v1048_v16, %v1044_v14  ;;  %v1056_v37 = vshrl.u32 %v8735_v13, 16  ;;  %v1070_v44 = vshll.u32 %v8752_v31, 16  ;;  %v8776_v0 = vld [vmem:[#allocation2 + $0xc8] ss:$0 sps:$4 sm:$0x11]  }
  0x56   : > { %v8742_v23 = vsel %vm886_vm0, %v1037_v8, %v1041_v10  ;;  %v1068_v53 = vshrl.u32 %v8752_v31, 16  ;;  %v8771_v62 = vcombine.low %v654_v49, %v8766_v51  ;;  %v1077_v10 = vrot.slane %v1075_v57, 1  ;;  %v8120_v49 = vld [vmem:[%s10632_s1 + $0x1f0] sm:$0xff]   ;;  %v2105_v57 = vld [vmem:[#allocation2 + $0x24] sm:$0xe] }
  0x57   : > { %v1060_v40 = vrot.slane %v1058_v28, 1  ;;  %v8758_v46 = vsel %vm886_vm0, %v1049_v33, %v1053_v36  ;;  %v1072_v56 = vrot.slane %v1070_v44, 1  ;;  %v1087_v18 = vshll.u32 %v8776_v0, 16  ;;  %v8115_v36 = vld [vmem:[%s10632_s1 + $0x208] sm:$0xff]  }
  0x58   : > { %1853 = vmatmul.mubr.bf16.gmra.mrb[20].mxu1 %v8539_v9  ;;  %1387 = vmatmul.mubr.bf16.gmra.mrb[20].mxu0 %v8586_v43  ;;  %v1082_v5 = vshll.u32 %v8771_v62, 16  ;;  %v1080_v14 = vshrl.u32 %v8771_v62, 16  ;;  %v8118_v44 = vld [vmem:[%s10632_s1 + $0x1a8] sm:$0xff]  }
  0x59   : > { %1860 = vmatprep.mubr.bf16.mxu1 %v8589_v2  ;;  %1394 = vmatprep.mubr.bf16.mxu0 %v8635_v54  ;;  %v1061_v50 = vor.u32 %v1060_v40, %v1056_v37  ;;  %v1073_v8 = vor.u32 %v1072_v56, %v1068_v53  ;;  %v1089_v29 = vrot.slane %v1087_v18, 1  ;;  %v8117_v37 = vld [vmem:[%s10632_s1 + $0x210] sm:$0xff]   ;;  %v8106_v40 = vld [vmem:[%s10632_s1 + $0x1c8] sm:$0xff]   ;;  %v8274_v56 = vld [vmem:[#allocation2 + $0x20] ss:$0 sps:$4 sm:$0x11]  }
  0x5a   : > { %v1084_v16 = vrot.slane %v1082_v5, 1 }
  0x5b   : > { %v8774_v63 = vsel %vm886_vm0, %v1061_v50, %v1065_v42  ;;  %v8786_v22 = vsel %vm886_vm0, %v1073_v8, %v1077_v10  ;;  %v8112_v42 = vld [vmem:[%s10632_s1 + $0x1e0] sm:$0xff]   ;;  %v2104_v50 = vld [vmem:[#allocation2 + $0x18] sm:$0xe]  ;;  %v2106_v10 = vld [vmem:[#allocation2 + $0x30] sm:$0xe] }
  0x5c   : > { %v1085_v28 = vor.u32 %v1084_v16, %v1080_v14  ;;  %v8275_v14 = vld [vmem:[#allocation2 + $0x10] sm:$0xf]  ;;  %v8276_v16 = vld [vmem:[#allocation2 + $0x28] sm:$0xf] }
  0x5d   : > { %v6070_v18 = vcombine.low %v2105_v57, %v8276_v16  ;;  %v2110_v57 = vld [vmem:[#allocation2 + $0x60] sm:$0xe] }
  0x5e   : > { %v8793_v33 = vsel %vm886_vm0, %v1085_v28, %v1089_v29 }
  0x60   : > { %1861 = vmatmul.mubr.bf16.gmra.mrb[24].mxu1 %v8568_v45  ;;  %1395 = vmatmul.mubr.bf16.gmra.mrb[24].mxu0 %v8607_v21 }
  0x61   : > { %1868 = vmatprep.mubr.bf16.mxu1 %v8604_v19  ;;  %1402 = vmatprep.mubr.bf16.mxu0 %v8659_v7 }
  0x68   : > { %1869 = vmatmul.mubr.bf16.gmra.mrb[28].mxu1 %v8589_v2  ;;  %1403 = vmatmul.mubr.bf16.gmra.mrb[28].mxu0 %v8635_v54 }
  0x69   : > { %1876 = vmatprep.mubr.bf16.mxu1 %v8637_v55  ;;  %1410 = vmatprep.mubr.bf16.mxu0 %v8676_v20 }
  0x70   : > { %1877 = vmatmul.mubr.bf16.gmra.mrb[32].mxu1 %v8604_v19  ;;  %1411 = vmatmul.mubr.bf16.gmra.mrb[32].mxu0 %v8659_v7 }
  0x71   : > { %1884 = vmatprep.mubr.bf16.mxu1 %v8663_v11  ;;  %1418 = vmatprep.mubr.bf16.mxu0 %v8699_v34 }
  0x78   : > { %1885 = vmatmul.mubr.bf16.gmra.mrb[36].mxu1 %v8637_v55  ;;  %1419 = vmatmul.mubr.bf16.gmra.mrb[36].mxu0 %v8676_v20 }
  0x79   : > { %1892 = vmatprep.mubr.bf16.mxu1 %v8680_v24  ;;  %1426 = vmatprep.mubr.bf16.mxu0 %v8722_v61 }
  0x80   : > { %1893 = vmatmul.mubr.bf16.gmra.mrb[40].mxu1 %v8663_v11  ;;  %1427 = vmatmul.mubr.bf16.gmra.mrb[40].mxu0 %v8699_v34 }
  0x81   : > { %1900 = vmatprep.mubr.bf16.mxu1 %v8703_v38  ;;  %1434 = vmatprep.mubr.bf16.mxu0 %v8742_v23 }
  0x88   : > { %1901 = vmatmul.mubr.bf16.gmra.mrb[44].mxu1 %v8680_v24  ;;  %1435 = vmatmul.mubr.bf16.gmra.mrb[44].mxu0 %v8722_v61 }
  0x89   : > { %1908 = vmatprep.mubr.bf16.mxu1 %v8719_v59  ;;  %1442 = vmatprep.mubr.bf16.mxu0 %v8758_v46 }
  0x90   : > { %1909 = vmatmul.mubr.bf16.gmra.mrb[48].mxu1 %v8703_v38  ;;  %1443 = vmatmul.mubr.bf16.gmra.mrb[48].mxu0 %v8742_v23 }
  0x91   : > { %1916 = vmatprep.mubr.bf16.mxu1 %v8735_v13  ;;  %1450 = vmatprep.mubr.bf16.mxu0 %v8774_v63 }
  0x98   : > { %1917 = vmatmul.mubr.bf16.gmra.mrb[52].mxu1 %v8719_v59  ;;  %1451 = vmatmul.mubr.bf16.gmra.mrb[52].mxu0 %v8758_v46 }
  0x99   : > { %1924 = vmatprep.mubr.bf16.mxu1 %v8752_v31  ;;  %1458 = vmatprep.mubr.bf16.mxu0 %v8786_v22 }
  0xa0   : > { %1925 = vmatmul.mubr.bf16.gmra.mrb[56].mxu1 %v8735_v13  ;;  %1459 = vmatmul.mubr.bf16.gmra.mrb[56].mxu0 %v8774_v63 }
  0xa1   : > { %1932 = vmatprep.mubr.bf16.mxu1 %v8771_v62  ;;  %1466 = vmatprep.mubr.bf16.mxu0 %v8793_v33 }
  0xa8   : > { %1933 = vmatmul.mubr.bf16.gmra.mrb[60].mxu1 %v8752_v31  ;;  %1467 = vmatmul.mubr.bf16.gmra.mrb[60].mxu0 %v8786_v22 }
  0xa9   : > { %7469 = vmatprep.mubr.bf16.mxu1 %v8503_v30  ;;  %7421 = vmatprep.mubr.bf16.mxu0 %v8522_v58  ;;  %v8105_v30 = vld [vmem:[%s10632_s1 + $0x180] sm:$0xff]   ;;  %v8108_v58 = vld [vmem:[%s10632_s1 + $0x1d0] sm:$0xff]  }
  0xb0   : > { %7470 = vmatmul.mubr.bf16.vlgmr.msra.gmra.mrb[64].mxu1 %v8505_v35  ;;  %v8119_v35 = vld [vmem:[%s10632_s1 + $0x218] sm:$0xff]   ;;  %7422 = vmatmul.mubr.bf16.vlgmr.msra.gmra.mrb[64].mxu0 %v8537_v6  ;;  %v8109_v6 = vld [vmem:[%s10632_s1 + $0x190] sm:$0xff]  }
  0xb1   : > { %7473 = vmatprep.mubr.bf16.mxu1 %v8516_v52  ;;  %7502 = vmatpush3.bf16.msra.mxu1 %v8688_v26  ;;  %v8107_v52 = vld [vmem:[%s10632_s1 + $0x188] sm:$0xff]   ;;  %v8121_v26 = vld [vmem:[%s10632_s1 + $0x220] sm:$0xff]  }
  0xb2   : > { %7503 = vmatprep.subr.bf16.mxu1 %v8115_v36  ;;  %6862 = vmatpush3.bf16.msra.mxu0 %v8105_v30  ;;  %v8278_v30 = vld [vmem:[#allocation2 + $0x14] ss:$0 sps:$4 sm:$0x11]  }
  0xb3   : > { %7425 = vmatprep.mubr.bf16.mxu0 %v8566_v41  ;;  %6863 = vmatprep.subr.bf16.mxu0 %v8106_v40  ;;  %v8110_v41 = vld [vmem:[%s10632_s1 + $0x1d8] sm:$0xff]   ;;  %v2179_v40 = vrot.slane %v8278_v30, 1 }
  0xb4   : > { %v2112_v30 = vld [vmem:[#allocation2 + $0x78] sm:$0xe] }
  0xb5   : > { %7504 = vmatpush3.bf16.msra.mxu1 %v8115_v36 }
  0xb6   : > { %7505 = vmatprep.subr.bf16.mxu1 %v8117_v37  ;;  %6864 = vmatpush3.bf16.msra.mxu0 %v8107_v52  ;;  %v2184_v52 = vrot.slane %v6070_v18, 1  ;;  %v8289_v18 = vld [vmem:[#allocation2 + $0x5c] ss:$0 sps:$4 sm:$0x11]  }
  0xb7   : > { %6865 = vmatprep.subr.bf16.mxu0 %v8108_v58  ;;  %v8279_v58 = vld [vmem:[#allocation2 + $0x2c] ss:$0 sps:$4 sm:$0x11]  }
  0xb8   : > { %7474 = vmatmul.mubr.bf16.gmra.mrb[68].mxu1 %v8539_v9  ;;  %7426 = vmatmul.mubr.bf16.gmra.mrb[68].mxu0 %v8586_v43  ;;  %v8123_v9 = vld [vmem:[%s10632_s1 + $0x228] sm:$0xff]   ;;  %v8127_v43 = vld [vmem:[%s10632_s1 + $0x230] sm:$0xff]  }
  0xb9   : > { %7477 = vmatprep.mubr.bf16.mxu1 %v8568_v45  ;;  %7506 = vmatpush3.bf16.msra.mxu1 %v8117_v37  ;;  %v8111_v45 = vld [vmem:[%s10632_s1 + $0x198] sm:$0xff]  }
  0xba   : > { %7507 = vmatprep.subr.bf16.mxu1 %v8119_v35  ;;  %7429 = vmatprep.mubr.bf16.mxu0 %v8607_v21  ;;  %v8114_v21 = vld [vmem:[%s10632_s1 + $0x1a0] sm:$0xff]  }
  0xbb   : > { %6866 = vmatpush3.bf16.msra.mxu0 %v8109_v6  ;;  %v8280_v6 = vld [vmem:[#allocation2 + $0x38] ss:$0 sps:$4 sm:$0x11]  }
  0xbc   : > { %6867 = vmatprep.subr.bf16.mxu0 %v8110_v41  ;;  %v2188_v41 = vrot.slane %v8280_v6, 1  ;;  %v2203_v6 = vrot.slane %v8645_v60, 1 }
  0xbd   : > { %7508 = vmatpush3.bf16.msra.mxu1 %v8119_v35  ;;  %v2102_v35 = vld [vmem:[#allocation2] sm:$0xe] }
  0xbe   : > { %7509 = vmatprep.subr.bf16.mxu1 %v8121_v26 }
  0xbf   : > { %6868 = vmatpush3.bf16.msra.mxu0 %v8111_v45 }
  0xc0   : > { %7478 = vmatmul.mubr.bf16.gmra.mrb[72].mxu1 %v8589_v2  ;;  %6869 = vmatprep.subr.bf16.mxu0 %v8112_v42  ;;  %v8116_v2 = vld [vmem:[%s10632_s1 + $0x1e8] sm:$0xff]   ;;  %v8281_v42 = vld [vmem:[#allocation2 + $0x4] sm:$0xf] }
  0xc1   : > { %7481 = vmatprep.mubr.bf16.mxu1 %v8604_v19  ;;  %7510 = vmatpush3.bf16.msra.mxu1 %v8121_v26  ;;  %v8129_v19 = vld [vmem:[%s10632_s1 + $0x238] sm:$0xff]   ;;  %v2185_v26 = vrot.slane %v8279_v58, 1 }
  0xc2   : > { %7511 = vmatprep.subr.bf16.mxu1 %v8123_v9  ;;  %7430 = vmatmul.mubr.bf16.gmra.mrb[72].mxu0 %v8635_v54  ;;  %v8122_v54 = vld [vmem:[%s10632_s1 + $0x1b0] sm:$0xff]  }
  0xc3   : > { %7433 = vmatprep.mubr.bf16.mxu0 %v8659_v7  ;;  %6870 = vmatpush3.bf16.msra.mxu0 %v8114_v21  ;;  %v8126_v7 = vld [vmem:[%s10632_s1 + $0x1f8] sm:$0xff]  }
  0xc4   : > { %6871 = vmatprep.subr.bf16.mxu0 %v8116_v2  ;;  %v8909_v2 = vsel %vm2174_vm1, %v2184_v52, %v2185_v26  ;;  %v6077_v26 = vcombine.low %v2112_v30, %v8649_v1 }
  0xc5   : > { %7512 = vmatpush3.bf16.msra.mxu1 %v8123_v9  ;;  %v2107_v9 = vld [vmem:[#allocation2 + $0x3c] sm:$0xe] }
  0xc6   : > { %7513 = vmatprep.subr.bf16.mxu1 %v8127_v43 }
  0xc7   : > { %6872 = vmatpush3.bf16.msra.mxu0 %v8118_v44 }
  0xc8   : > { %7482 = vmatmul.mubr.bf16.gmra.mrb[76].mxu1 %v8637_v55  ;;  %6873 = vmatprep.subr.bf16.mxu0 %v8120_v49  ;;  %v8128_v55 = vld [vmem:[%s10632_s1 + $0x1b8] sm:$0xff]  }
  0xc9   : > { %7485 = vmatprep.mubr.bf16.mxu1 %v8663_v11  ;;  %7514 = vmatpush3.bf16.msra.mxu1 %v8127_v43  ;;  %v656_v11 = vld [vmem:[#allocation2 + $0xcc] sm:$0xf]  ;;  %v2108_v43 = vld [vmem:[#allocation2 + $0x48] sm:$0xe] }
  0xca   : > { %7515 = vmatprep.subr.bf16.mxu1 %v8129_v19  ;;  %7434 = vmatmul.mubr.bf16.gmra.mrb[76].mxu0 %v8676_v20  ;;  %v8889_v20 = vld [vmem:[#allocation2 + $0xd0] sm:$0xf] }
  0xcb   : > { %7437 = vmatprep.mubr.bf16.mxu0 %v8699_v34  ;;  %6874 = vmatpush3.bf16.msra.mxu0 %v8122_v54  ;;  %v5952_v34 = vcombine.low %v656_v11, %v8889_v20  ;;  %v8283_v54 = vld [vmem:[#allocation2 + $0x4c] sm:$0xf]  ;;  %v8284_v11 = vld [vmem:[#allocation2 + $0x8] ss:$0 sps:$4 sm:$0x11]  }
  0xcc   : > { %6875 = vmatprep.subr.bf16.mxu0 %v8126_v7  ;;  %v6073_v7 = vcombine.low %v2108_v43, %v8283_v54 }
  0xcd   : > { %7516 = vmatpush3.bf16.msra.mxu1 %v8129_v19  ;;  %v1092_v5 = vshrl.u32 %v5952_v34, 16  ;;  %v8282_v19 = vld [vmem:[#allocation2 + $0x40] sm:$0xf] }
  0xce   : > { %v6072_v44 = vcombine.low %v2107_v9, %v8282_v19  ;;  %v2206_v9 = vrot.slane %v8666_v12, 1 }
  0xcf   : > { %6876 = vmatpush3.bf16.msra.mxu0 %v8128_v55 }
  0xd0   : > { %7486 = vmatmul.mubr.bf16.gmra.mrb[80].mxu1 %v8680_v24  ;;  %v8273_v24 = vld [vmem:[#allocation2 + $0x1c] sm:$0xf] }
  0xd1   : > { %7489 = vmatprep.mubr.bf16.mxu1 %v8703_v38  ;;  %v6069_v53 = vcombine.low %v2104_v50, %v8273_v24  ;;  %v8895_v38 = vld [vmem:[#allocation2 + $0xd4] ss:$0 sps:$4 sm:$0x11]   ;;  %v2190_v50 = vrot.slane %v6072_v44, 1 }
  0xd2   : > { %7438 = vmatmul.mubr.bf16.gmra.mrb[80].mxu0 %v8722_v61  ;;  %v1094_v61 = vshll.u32 %v5952_v34, 16  ;;  %v8285_v24 = vld [vmem:[#allocation2 + $0x44] ss:$0 sps:$4 sm:$0x11]  }
  0xd3   : > { %7441 = vmatprep.mubr.bf16.mxu0 %v8742_v23  ;;  %v2181_v23 = vrot.slane %v6069_v53, 1  ;;  %v2191_v53 = vrot.slane %v8285_v24, 1  ;;  %v2115_v24 = vld [vmem:[#allocation2 + $0x9c] sm:$0xe] }
  0xd4   : > { %v1096_v8 = vrot.slane %v1094_v61, 1  ;;  %v2193_v61 = vrot.slane %v6073_v7, 1 }
  0xd6   : > { %v1097_v29 = vor.u32 %v1096_v8, %v1092_v5  ;;  %v8918_v5 = vsel %vm2174_vm1, %v2190_v50, %v2191_v53  ;;  %v8287_v8 = vld [vmem:[#allocation2 + $0x58] sm:$0xf] }
  0xd8   : > { %7490 = vmatmul.mubr.bf16.gmra.mrb[84].mxu1 %v8719_v59  ;;  %v2103_v59 = vld [vmem:[#allocation2 + $0xc] sm:$0xe] }
  0xd9   : > { %7493 = vmatprep.mubr.bf16.mxu1 %v8735_v13  ;;  %v2182_v13 = vrot.slane %v8274_v56, 1  ;;  %v2109_v56 = vld [vmem:[#allocation2 + $0x54] sm:$0xe] }
  0xda   : > { %7442 = vmatmul.mubr.bf16.gmra.mrb[84].mxu0 %v8758_v46  ;;  %v1099_v46 = vshll.u32 %v8895_v38, 16 }
  0xdb   : > { %7445 = vmatprep.mubr.bf16.mxu0 %v8774_v63  ;;  %v6068_v63 = vcombine.low %v2103_v59, %v8275_v14  ;;  %v8286_v59 = vld [vmem:[#allocation2 + $0x50] ss:$0 sps:$4 sm:$0x11]   ;;  %v8288_v14 = vld [vmem:[#allocation2 + $0x64] sm:$0xf] }
  0xdc   : > { %v1101_v36 = vrot.slane %v1099_v46, 1  ;;  %v6074_v46 = vcombine.low %v2109_v56, %v8287_v8 }
  0xdd   : > { %v2178_v37 = vrot.slane %v6068_v63, 1  ;;  %v6075_v63 = vcombine.low %v2110_v57, %v8288_v14 }
  0xde   : > { %v1102_v45 = vsel %vm886_vm0, %v1097_v29, %v1101_v36  ;;  %v2196_v16 = vrot.slane %v6074_v46, 1  ;;  %v8290_v29 = vld [vmem:[#allocation2 + $0x68] ss:$0 sps:$4 sm:$0x11]  }
  0xdf   : > { %v2180_v21 = vsel %vm2174_vm1, %v2178_v37, %v2179_v40  ;;  %v2200_v36 = vrot.slane %v8290_v29, 1  ;;  %v2111_v37 = vld [vmem:[#allocation2 + $0x6c] sm:$0xe] }
  0xe0   : > { %7494 = vmatmul.mubr.bf16.gmra.mrb[88].mxu1 %v8752_v31  ;;  %v8902_v31 = vsel %vm2174_vm1, %v2181_v23, %v2182_v13  ;;  %v2194_v23 = vrot.slane %v8286_v59, 1 }
  0xe1   : > { %7497 = vmatprep.mubr.bf16.mxu1 %v8771_v62  ;;  %v8277_v62 = vld [vmem:[#allocation2 + $0x34] sm:$0xf] }
  0xe2   : > { %7446 = vmatmul.mubr.bf16.gmra.mrb[88].mxu0 %v8786_v22  ;;  %v6071_v28 = vcombine.low %v2106_v10, %v8277_v62  ;;  %v8921_v10 = vsel %vm2174_vm1, %v2193_v61, %v2194_v23  ;;  %v2197_v62 = vrot.slane %v8289_v18, 1 }
  0xe3   : > { %7449 = vmatprep.mubr.bf16.mxu0 %v8793_v33  ;;  %v6067_v33 = vcombine.low %v2102_v35, %v8281_v42  ;;  %v8291_v35 = vld [vmem:[#allocation2 + $0x70] sm:$0xf] }
  0xe4   : > { %v2187_v22 = vrot.slane %v6071_v28, 1  ;;  %v2199_v28 = vrot.slane %v6075_v63, 1  ;;  %v8927_v40 = vsel %vm2174_vm1, %v2196_v16, %v2197_v62  ;;  %v6076_v52 = vcombine.low %v2111_v37, %v8291_v35 }
  0xe5   : > { %v2175_v55 = vrot.slane %v6067_v33, 1  ;;  %v2114_v33 = vld [vmem:[#allocation2 + $0x90] sm:$0xe]  ;;  %v2215_v62 = vrot.slane %v8730_v4, 1 }
  0xe6   : > { %v8912_v49 = vsel %vm2174_vm1, %v2187_v22, %v2188_v41  ;;  %v8930_v58 = vsel %vm2174_vm1, %v2199_v28, %v2200_v36  ;;  %v2202_v22 = vrot.slane %v6076_v52, 1  ;;  %v2205_v41 = vrot.slane %v6077_v26, 1  ;;  %v2117_v36 = vld [vmem:[#allocation2 + $0xb4] sm:$0xe] }
  0xe7   : > { %v6079_v12 = vcombine.low %v2114_v33, %v8695_v32  ;;  %v2116_v32 = vld [vmem:[#allocation2 + $0xa8] sm:$0xe]  ;;  %v6082_v4 = vcombine.low %v2117_v36, %v8744_v27 }
  0xe8   : > { %7498 = vmatmul.mubr.bf16.gmra.mrb[92].mxu1 %v5952_v34  ;;  %v2176_v34 = vrot.slane %v8284_v11, 1  ;;  %v8941_v1 = vsel %vm2174_vm1, %v2202_v22, %v2203_v6  ;;  %v8946_v60 = vsel %vm2174_vm1, %v2205_v41, %v2206_v9  ;;  %v6081_v63 = vcombine.low %v2116_v32, %v8726_v3  ;;  %v2118_v3 = vld [vmem:[#allocation2 + $0xc0] sm:$0xe] }
  0xe9   : > { %7517 = vmatprep.mubr.bf16.mxu1 %v8902_v31  ;;  %v2211_v50 = vrot.slane %v6079_v12, 1  ;;  %v2220_v27 = vrot.slane %v6082_v4, 1  ;;  %v2119_v12 = vld [vmem:[#allocation2 + $0xcc] sm:$0xe] }
  0xea   : > { %7450 = vmatmul.mubr.bf16.gmra.mrb[92].mxu0 %v1102_v45  ;;  %v2177_v13 = vsel %vm2174_vm1, %v2175_v55, %v2176_v34  ;;  %v2113_v45 = vld [vmem:[#allocation2 + $0x84] sm:$0xe]  ;;  %v2217_v29 = vrot.slane %v6081_v63, 1 }
  0xeb   : > { %2472 = vmatprep.mubr.bf16.mxu0 %v2180_v21  ;;  %v6078_v44 = vcombine.low %v2113_v45, %v8672_v17  ;;  %v2209_v17 = vrot.slane %v8683_v25, 1  ;;  %v6080_v25 = vcombine.low %v2115_v24, %v8712_v47 }
  0xed   : > { %v2208_v11 = vrot.slane %v6078_v44, 1  ;;  %v2214_v47 = vrot.slane %v6080_v25, 1 }
  0xef   : > { %v8961_v8 = vsel %vm2174_vm1, %v2208_v11, %v2209_v17  ;;  %v8983_v41 = vsel %vm2174_vm1, %v2214_v47, %v2215_v62 }
  0xf0   : > { %7518 = vmatmul.mubr.bf16.vlgmr.msra.gmra.mrb[64].mxu1 %v8909_v2 }
  0xf1   : > { %7521 = vmatprep.mubr.bf16.mxu1 %v8912_v49 }
  0xf2   : > { %2473 = vmatmul.mubr.bf16.vlgmr.msra.gmra.mrb[96].mxu0 %v2177_v13 }
  0xf3   : > { %2480 = vmatprep.mubr.bf16.mxu0 %v8902_v31 }
  0xf8   : > { %7522 = vmatmul.mubr.bf16.gmra.mrb[68].mxu1 %v8918_v5 }
  0xf9   : > { %7525 = vmatprep.mubr.bf16.mxu1 %v8921_v10 }
  0xfa   : > { %2481 = vmatmul.mubr.bf16.gmra.mrb[100].mxu0 %v2180_v21 }
  0xfb   : > { %2488 = vmatprep.mubr.bf16.mxu0 %v8909_v2 }
 0x100   : > { %7526 = vmatmul.mubr.bf16.gmra.mrb[72].mxu1 %v8927_v40 }
 0x101   : > { %7529 = vmatprep.mubr.bf16.mxu1 %v8930_v58 }
 0x102   : > { %2489 = vmatmul.mubr.bf16.gmra.mrb[104].mxu0 %v8902_v31  ;;  %v2212_v31 = vrot.slane %v8706_v39, 1 }
 0x103   : > { %v6741_v42 = vpop.f32.mrb[0].mxu1  ;;  %2496 = vmatprep.mubr.bf16.mxu0 %v8912_v49  ;;  %v6605_v55 = vpop.f32.mrb[0].mxu0 }
 0x104   : > { %v6742_v43 = vpop.f32.mrb[1].mxu1  ;;  %v6606_v34 = vpop.f32.mrb[1].mxu0  ;;  %v8968_v39 = vsel %vm2174_vm1, %v2211_v50, %v2212_v31 }
 0x105   : > { %v8938_v21 = vadd.f32 %v6742_v43, %v6741_v42  ;;  %v6744_v19 = vpop.f32.mrb[2].mxu1  ;;  %v6608_v61 = vpop.f32.mrb[2].mxu0  ;;  %v8956_v23 = vadd.f32 %v6606_v34, %v6605_v55  ;;  %v6083_v42 = vcombine.low %v2118_v3, %v8766_v51 }
 0x106   : > { %v6745_v54 = vpop.f32.mrb[3].mxu1  ;;  %v6609_v56 = vpop.f32.mrb[3].mxu0 }
 0x107   : > { %v8949_v7 = vadd.f32 %v6745_v54, %v6744_v19  ;;  %v8964_v14 = vadd.f32 %v6609_v56, %v6608_v61  ;;  %v2221_v19 = vrot.slane %v8760_v48, 1  ;;  %v2223_v54 = vrot.slane %v6083_v42, 1 }
 0x108   : > { %7530 = vmatmul.mubr.bf16.gmra.mrb[76].mxu1 %v8941_v1 }
 0x109   : > { %7533 = vmatprep.mubr.bf16.mxu1 %v8946_v60  ;;  %v9005_v24 = vsel %vm2174_vm1, %v2220_v27, %v2221_v19 }
 0x10a   : > { %2497 = vmatmul.mubr.bf16.gmra.mrb[108].mxu0 %v8909_v2  ;;  %v2218_v2 = vrot.slane %v8738_v15, 1 }
 0x10b   : > { %v6747_v53 = vpop.f32.mrb[4].mxu1  ;;  %2504 = vmatprep.mubr.bf16.mxu0 %v8918_v5  ;;  %v6611_v18 = vpop.f32.mrb[4].mxu0 }
 0x10c   : > { %v6748_v59 = vpop.f32.mrb[5].mxu1  ;;  %v6612_v28 = vpop.f32.mrb[5].mxu0  ;;  %v8990_v15 = vsel %vm2174_vm1, %v2217_v29, %v2218_v2 }
 0x10d   : > { %v8958_v13 = vadd.f32 %v6748_v59, %v6747_v53  ;;  %v6750_v57 = vpop.f32.mrb[6].mxu1  ;;  %v6614_v30 = vpop.f32.mrb[6].mxu0  ;;  %v8978_v52 = vadd.f32 %v6612_v28, %v6611_v18  ;;  %v6084_v53 = vcombine.low %v2119_v12, %v8889_v20  ;;  %v2227_v20 = vrot.slane %v8895_v38, 1 }
 0x10e   : > { %v6751_v46 = vpop.f32.mrb[7].mxu1  ;;  %v6615_v26 = vpop.f32.mrb[7].mxu0 }
 0x10f   : > { %v8971_v16 = vadd.f32 %v6751_v46, %v6750_v57  ;;  %v8986_v45 = vadd.f32 %v6615_v26, %v6614_v30  ;;  %v2226_v56 = vrot.slane %v6084_v53, 1 }
 0x110   : > { %7534 = vmatmul.mubr.bf16.gmra.mrb[80].mxu1 %v8961_v8 }
 0x111   : > { %7537 = vmatprep.mubr.bf16.mxu1 %v8968_v39  ;;  %v2228_v28 = vsel %vm2174_vm1, %v2226_v56, %v2227_v20 }
 0x112   : > { %2505 = vmatmul.mubr.bf16.gmra.mrb[112].mxu0 %v8912_v49  ;;  %v2224_v49 = vrot.slane %v8776_v0, 1 }
 0x113   : > { %v6753_v37 = vpop.f32.mrb[8].mxu1  ;;  %2512 = vmatprep.mubr.bf16.mxu0 %v8921_v10  ;;  %v6617_v43 = vpop.f32.mrb[8].mxu0 }
 0x114   : > { %v6754_v35 = vpop.f32.mrb[9].mxu1  ;;  %v6618_v44 = vpop.f32.mrb[9].mxu0  ;;  %v9012_v0 = vsel %vm2174_vm1, %v2223_v54, %v2224_v49 }
 0x115   : > { %v8980_v22 = vadd.f32 %v6754_v35, %v6753_v37  ;;  %v6756_v6 = vpop.f32.mrb[10].mxu1  ;;  %v6620_v11 = vpop.f32.mrb[10].mxu0  ;;  %v9000_v17 = vadd.f32 %v6618_v44, %v6617_v43 }
 0x116   : > { %v6757_v9 = vpop.f32.mrb[11].mxu1  ;;  %v6621_v34 = vpop.f32.mrb[11].mxu0 }
 0x117   : > { %v8993_v33 = vadd.f32 %v6757_v9, %v6756_v6  ;;  %v9008_v61 = vadd.f32 %v6621_v34, %v6620_v11 }
 0x118   : > { %7538 = vmatmul.mubr.bf16.gmra.mrb[84].mxu1 %v8983_v41 }
 0x119   : > { %7541 = vmatprep.mubr.bf16.mxu1 %v8990_v15 }
 0x11a   : > { %2513 = vmatmul.mubr.bf16.gmra.mrb[116].mxu0 %v8918_v5 }
 0x11b   : > { %v6759_v55 = vpop.f32.mrb[12].mxu1  ;;  %2520 = vmatprep.mubr.bf16.mxu0 %v8927_v40  ;;  %v6623_v59 = vpop.f32.mrb[12].mxu0 }
 0x11c   : > { %v6760_v51 = vpop.f32.mrb[13].mxu1  ;;  %v6624_v57 = vpop.f32.mrb[13].mxu0 }
 0x11d   : > { %v9002_v50 = vadd.f32 %v6760_v51, %v6759_v55  ;;  %v6762_v31 = vpop.f32.mrb[14].mxu1  ;;  %v6626_v46 = vpop.f32.mrb[14].mxu0  ;;  %v9020_v5 = vadd.f32 %v6624_v57, %v6623_v59 }
 0x11e   : > { %v6763_v48 = vpop.f32.mrb[15].mxu1  ;;  %v6627_v18 = vpop.f32.mrb[15].mxu0 }
 0x11f   : > { %v9014_v32 = vadd.f32 %v6763_v48, %v6762_v31  ;;  %v9025_v2 = vadd.f32 %v6627_v18, %v6626_v46 }
 0x120   : > { %7542 = vmatmul.mubr.bf16.gmra.mrb[88].mxu1 %v9005_v24 }
 0x121   : > { %7545 = vmatprep.mubr.bf16.mxu1 %v9012_v0 }
 0x122   : > { %2521 = vmatmul.mubr.bf16.gmra.mrb[120].mxu0 %v8921_v10 }
 0x123   : > { %v6765_v25 = vpop.f32.mrb[16].mxu1  ;;  %2528 = vmatprep.mubr.bf16.mxu0 %v8930_v58  ;;  %v6629_v38 = vpop.f32.mrb[16].mxu0 }
 0x124   : > { %v6766_v63 = vpop.f32.mrb[17].mxu1  ;;  %v6630_v37 = vpop.f32.mrb[17].mxu0 }
 0x125   : > { %v9022_v47 = vadd.f32 %v6766_v63, %v6765_v25  ;;  %v6768_v62 = vpop.f32.mrb[18].mxu1  ;;  %v6632_v3 = vpop.f32.mrb[18].mxu0  ;;  %v9031_v26 = vadd.f32 %v6630_v37, %v6629_v38 }
 0x126   : > { %v6769_v29 = vpop.f32.mrb[19].mxu1  ;;  %v6633_v6 = vpop.f32.mrb[19].mxu0 }
 0x127   : > { %v9028_v36 = vadd.f32 %v6769_v29, %v6768_v62  ;;  %v9035_v43 = vadd.f32 %v6633_v6, %v6632_v3 }
 0x128   : > { %7546 = vmatmul.mubr.bf16.gmra.mrb[92].mxu1 %v2228_v28 }
 0x12a   : > { %2529 = vmatmul.mubr.bf16.gmra.mrb[124].mxu0 %v8927_v40 }
 0x12b   : > { %v6771_v30 = vpop.f32.mrb[20].mxu1  ;;  %2536 = vmatprep.mubr.bf16.mxu0 %v8941_v1  ;;  %v6635_v27 = vpop.f32.mrb[20].mxu0 }
 0x12c   : > { %v6772_v35 = vpop.f32.mrb[21].mxu1  ;;  %v6636_v19 = vpop.f32.mrb[21].mxu0 }
 0x12d   : > { %v9033_v4 = vadd.f32 %v6772_v35, %v6771_v30  ;;  %v6774_v9 = vpop.f32.mrb[22].mxu1  ;;  %v6638_v54 = vpop.f32.mrb[22].mxu0  ;;  %v9041_v12 = vadd.f32 %v6636_v19, %v6635_v27 }
 0x12e   : > { %v6775_v42 = vpop.f32.mrb[23].mxu1  ;;  %v6639_v55 = vpop.f32.mrb[23].mxu0 }
 0x12f   : > { %v9038_v10 = vadd.f32 %v6775_v42, %v6774_v9  ;;  %v9045_v31 = vadd.f32 %v6639_v55, %v6638_v54 }
 0x132   : > { %2537 = vmatmul.mubr.bf16.gmra.mrb[128].mxu0 %v8930_v58 }
 0x133   : > { %v6777_v44 = vpop.f32.mrb[24].mxu1  ;;  %2544 = vmatprep.mubr.bf16.mxu0 %v8946_v60  ;;  %v6641_v53 = vpop.f32.mrb[24].mxu0 }
 0x134   : > { %v6778_v49 = vpop.f32.mrb[25].mxu1  ;;  %v6642_v48 = vpop.f32.mrb[25].mxu0 }
 0x135   : > { %v9043_v11 = vadd.f32 %v6778_v49, %v6777_v44  ;;  %v6780_v51 = vpop.f32.mrb[26].mxu1  ;;  %v6644_v56 = vpop.f32.mrb[26].mxu0  ;;  %v9051_v57 = vadd.f32 %v6642_v48, %v6641_v53 }
 0x136   : > { %v6781_v34 = vpop.f32.mrb[27].mxu1  ;;  %v6645_v25 = vpop.f32.mrb[27].mxu0 }
 0x137   : > { %v9048_v40 = vadd.f32 %v6781_v34, %v6780_v51  ;;  %v9055_v62 = vadd.f32 %v6645_v25, %v6644_v56 }
 0x13a   : > { %2545 = vmatmul.mubr.bf16.gmra.mrb[132].mxu0 %v8941_v1 }
 0x13b   : > { %v6783_v59 = vpop.f32.mrb[28].mxu1  ;;  %2552 = vmatprep.mubr.bf16.mxu0 %v8961_v8  ;;  %v6647_v28 = vpop.f32.mrb[28].mxu0 }
 0x13c   : > { %v6784_v20 = vpop.f32.mrb[29].mxu1  ;;  %v6648_v29 = vpop.f32.mrb[29].mxu0 }
 0x13d   : > { %v9053_v46 = vadd.f32 %v6784_v20, %v6783_v59  ;;  %v6786_v63 = vpop.f32.mrb[30].mxu1  ;;  %v6650_v37 = vpop.f32.mrb[30].mxu0  ;;  %v9061_v3 = vadd.f32 %v6648_v29, %v6647_v28 }
 0x13e   : > { %v6787_v18 = vpop.f32.mrb[31].mxu1  ;;  %v6651_v35 = vpop.f32.mrb[31].mxu0 }
 0x13f   : > { %v9058_v58 = vadd.f32 %v6787_v18, %v6786_v63  ;;  %v9065_v27 = vadd.f32 %v6651_v35, %v6650_v37 }
 0x142   : > { %2553 = vmatmul.mubr.bf16.gmra.mrb[136].mxu0 %v8946_v60 }
 0x143   : > { %v6789_v38 = vpop.f32.mrb[32].mxu1  ;;  %2560 = vmatprep.mubr.bf16.mxu0 %v8968_v39  ;;  %v6653_v19 = vpop.f32.mrb[32].mxu0 }
 0x144   : > { %v6790_v30 = vpop.f32.mrb[33].mxu1  ;;  %v6654_v44 = vpop.f32.mrb[33].mxu0 }
 0x145   : > { %v9063_v6 = vadd.f32 %v6790_v30, %v6789_v38  ;;  %v6792_v9 = vpop.f32.mrb[34].mxu1  ;;  %v9071_v49 = vadd.f32 %v6654_v44, %v6653_v19  ;;  %v6656_v55 = vpop.f32.mrb[34].mxu0  ;;  %v8147_v38 = vld [vmem:[%s10633_s2 + $0x100] sm:$0xff]   ;;  %v8149_v44 = vld [vmem:[%s10633_s2 + $0x108] sm:$0xff]  }
 0x146   : > { %v6793_v42 = vpop.f32.mrb[35].mxu1  ;;  %v6657_v34 = vpop.f32.mrb[35].mxu0  ;;  %6997 = vmatprep.subr.bf16.mxu0 %v8147_v38 }
 0x147   : > { %v9068_v1 = vadd.f32 %v6793_v42, %v6792_v9  ;;  %v9075_v59 = vadd.f32 %v6657_v34, %v6656_v55 }
 0x14a   : > { %2561 = vmatmul.mubr.bf16.gmra.mrb[140].mxu0 %v8961_v8  ;;  %v8148_v8 = vld [vmem:[%s10633_s2 + $0xc0] sm:$0xff]  }
 0x14b   : > { %v6795_v54 = vpop.f32.mrb[36].mxu1  ;;  %2568 = vmatprep.mubr.bf16.mxu0 %v8983_v41  ;;  %v6659_v20 = vpop.f32.mrb[36].mxu0  ;;  %6998 = vmatpush3.bf16.msra.mxu0 %v8148_v8  ;;  %v8153_v8 = vld [vmem:[%s10633_s2 + $0x118] sm:$0xff]  }
 0x14c   : > { %v6796_v51 = vpop.f32.mrb[37].mxu1  ;;  %v6660_v25 = vpop.f32.mrb[37].mxu0  ;;  %6999 = vmatprep.subr.bf16.mxu0 %v8149_v44  ;;  %v8154_v44 = vld [vmem:[%s10633_s2 + $0xd8] sm:$0xff]  }
 0x14d   : > { %v9073_v53 = vadd.f32 %v6796_v51, %v6795_v54  ;;  %v6798_v48 = vpop.f32.mrb[38].mxu1  ;;  %v9081_v18 = vadd.f32 %v6660_v25, %v6659_v20  ;;  %v6662_v28 = vpop.f32.mrb[38].mxu0  ;;  %v8150_v54 = vld [vmem:[%s10633_s2 + $0xc8] sm:$0xff]  }
 0x14e   : > { %v6799_v56 = vpop.f32.mrb[39].mxu1  ;;  %v6663_v37 = vpop.f32.mrb[39].mxu0 }
 0x14f   : > { %v9078_v60 = vadd.f32 %v6799_v56, %v6798_v48  ;;  %v9091_v9 = vadd.f32 %v6663_v37, %v6662_v28  ;;  %7000 = vmatpush3.bf16.msra.mxu0 %v8150_v54  ;;  %v8151_v28 = vld [vmem:[%s10633_s2 + $0x110] sm:$0xff]  }
 0x150   : > { %7001 = vmatprep.subr.bf16.mxu0 %v8151_v28  ;;  %v8156_v28 = vld [vmem:[%s10633_s2 + $0x120] sm:$0xff]  }
 0x152   : > { %2569 = vmatmul.mubr.bf16.gmra.mrb[144].mxu0 %v8968_v39 }
 0x153   : > { %v6801_v63 = vpop.f32.mrb[40].mxu1  ;;  %2576 = vmatprep.mubr.bf16.mxu0 %v8990_v15  ;;  %v6665_v55 = vpop.f32.mrb[40].mxu0 }
 0x154   : > { %v6802_v29 = vpop.f32.mrb[41].mxu1  ;;  %v6666_v51 = vpop.f32.mrb[41].mxu0 }
 0x155   : > { %v9086_v30 = vadd.f32 %v6802_v29, %v6801_v63  ;;  %v6804_v35 = vpop.f32.mrb[42].mxu1  ;;  %v9103_v48 = vadd.f32 %v6666_v51, %v6665_v55  ;;  %v6668_v39 = vpop.f32.mrb[42].mxu0 }
 0x156   : > { %v6805_v42 = vpop.f32.mrb[43].mxu1  ;;  %v6669_v20 = vpop.f32.mrb[43].mxu0 }
 0x157   : > { %v9094_v19 = vadd.f32 %v6805_v42, %v6804_v35  ;;  %v9110_v29 = vadd.f32 %v6669_v20, %v6668_v39  ;;  %v8152_v35 = vld [vmem:[%s10633_s2 + $0xd0] sm:$0xff]   ;;  %v8155_v39 = vld [vmem:[%s10633_s2 + $0x140] sm:$0xff]  }
 0x158   : > { %7002 = vmatpush3.bf16.msra.mxu0 %v8152_v35  ;;  %7549 = vmatprep.subr.bf16.mxu1 %v8155_v39 }
 0x159   : > { %10644 = vst [vmem:[#allocation3_spill] sm:$0xff] %v9094_v19  ;;  %7003 = vmatprep.subr.bf16.mxu0 %v8153_v8  ;;  %v8157_v8 = vld [vmem:[%s10633_s2 + $0xe0] sm:$0xff]   ;;  %7550 = vmatpush3.bf16.msra.mxu1 %v8155_v39 }
 0x15a   : > { %2577 = vmatmul.mubr.bf16.gmra.mrb[148].mxu0 %v8983_v41 }
 0x15b   : > { %v6807_v34 = vpop.f32.mrb[44].mxu1  ;;  %2584 = vmatprep.mubr.bf16.mxu0 %v9005_v24  ;;  %v6671_v42 = vpop.f32.mrb[44].mxu0 }
 0x15c   : > { %v6808_v56 = vpop.f32.mrb[45].mxu1  ;;  %v6672_v41 = vpop.f32.mrb[45].mxu0  ;;  %7004 = vmatpush3.bf16.msra.mxu0 %v8154_v44  ;;  %v8158_v44 = vld [vmem:[%s10633_s2 + $0x148] sm:$0xff]  }
 0x15d   : > { %v9105_v25 = vadd.f32 %v6808_v56, %v6807_v34  ;;  %v6810_v63 = vpop.f32.mrb[46].mxu1  ;;  %v9125_v55 = vadd.f32 %v6672_v41, %v6671_v42  ;;  %v6674_v51 = vpop.f32.mrb[46].mxu0  ;;  %7005 = vmatprep.subr.bf16.mxu0 %v8156_v28  ;;  %v8159_v41 = vld [vmem:[%s10633_s2 + $0x128] sm:$0xff]   ;;  %7551 = vmatprep.subr.bf16.mxu1 %v8158_v44 }
 0x15e   : > { %v6811_v38 = vpop.f32.mrb[47].mxu1  ;;  %v6675_v56 = vpop.f32.mrb[47].mxu0  ;;  %7552 = vmatpush3.bf16.msra.mxu1 %v8158_v44  ;;  %v8163_v44 = vld [vmem:[%s10633_s2 + $0xf0] sm:$0xff]  }
 0x15f   : > { %v9113_v37 = vadd.f32 %v6811_v38, %v6810_v63  ;;  %v9135_v38 = vadd.f32 %v6675_v56, %v6674_v51 }
 0x160   : > { %7006 = vmatpush3.bf16.msra.mxu0 %v8157_v8 }
 0x161   : > { %10645 = vst [vmem:[#allocation4_spill] sm:$0xff] %v9113_v37  ;;  %7007 = vmatprep.subr.bf16.mxu0 %v8159_v41 }
 0x162   : > { %2585 = vmatmul.mubr.bf16.gmra.mrb[152].mxu0 %v8990_v15  ;;  %v8160_v15 = vld [vmem:[%s10633_s2 + $0xe8] sm:$0xff]  }
 0x163   : > { %v6813_v54 = vpop.f32.mrb[48].mxu1  ;;  %2592 = vmatprep.mubr.bf16.mxu0 %v9012_v0 }
 0x164   : > { %v6814_v34 = vpop.f32.mrb[49].mxu1  ;;  %7008 = vmatpush3.bf16.msra.mxu0 %v8160_v15  ;;  %v8164_v15 = vld [vmem:[%s10633_s2 + $0x158] sm:$0xff]  }
 0x165   : > { %v9130_v20 = vadd.f32 %v6814_v34, %v6813_v54  ;;  %v6816_v63 = vpop.f32.mrb[50].mxu1  ;;  %v6677_v54 = vpop.f32.mrb[48].mxu0 }
 0x166   : > { %v6817_v35 = vpop.f32.mrb[51].mxu1  ;;  %v6678_v51 = vpop.f32.mrb[49].mxu0 }
 0x167   : > { %10646 = vst [vmem:[#allocation5_spill] sm:$0xff] %v9130_v20  ;;  %v9141_v42 = vadd.f32 %v6817_v35, %v6816_v63  ;;  %v9153_v0 = vadd.f32 %v6678_v51, %v6677_v54  ;;  %v6680_v39 = vpop.f32.mrb[50].mxu0  ;;  %v8161_v63 = vld [vmem:[%s10633_s2 + $0x150] sm:$0xff]   ;;  %v8165_v51 = vld [vmem:[%s10633_s2 + $0x138] sm:$0xff]  }
 0x168   : > { %v6681_v28 = vpop.f32.mrb[51].mxu0  ;;  %7553 = vmatprep.subr.bf16.mxu1 %v8161_v63 }
 0x169   : > { %10647 = vst [vmem:[#allocation6_spill] sm:$0xff] %v9141_v42  ;;  %10648 = vst [vmem:[#allocation7_spill] sm:$0xff] %v9153_v0  ;;  %v8162_v42 = vld [vmem:[%s10633_s2 + $0x130] sm:$0xff]   ;;  %v9163_v20 = vadd.f32 %v6681_v28, %v6680_v39  ;;  %7554 = vmatpush3.bf16.msra.mxu1 %v8161_v63  ;;  %v8166_v39 = vld [vmem:[%s10633_s2 + $0xf8] sm:$0xff]  }
 0x16a   : > { %2593 = vmatmul.mubr.bf16.gmra.mrb[156].mxu0 %v9005_v24  ;;  %7009 = vmatprep.subr.bf16.mxu0 %v8162_v42 }
 0x16b   : > { %v6819_v34 = vpop.f32.mrb[52].mxu1  ;;  %10650 = vst [vmem:[#allocation9_spill] sm:$0xff] %v9163_v20  ;;  %7010 = vmatpush3.bf16.msra.mxu0 %v8163_v44  ;;  %7555 = vmatprep.subr.bf16.mxu1 %v8164_v15 }
 0x16c   : > { %v6820_v56 = vpop.f32.mrb[53].mxu1  ;;  %7011 = vmatprep.subr.bf16.mxu0 %v8165_v51  ;;  %v8169_v51 = vld [vmem:[%s10633_s2 + $0x160] sm:$0xff]  }
 0x16d   : > { %v9158_v35 = vadd.f32 %v6820_v56, %v6819_v34  ;;  %v6822_v8 = vpop.f32.mrb[54].mxu1  ;;  %v6683_v34 = vpop.f32.mrb[52].mxu0  ;;  %7556 = vmatpush3.bf16.msra.mxu1 %v8164_v15 }
 0x16e   : > { %v6823_v41 = vpop.f32.mrb[55].mxu1  ;;  %v6684_v24 = vpop.f32.mrb[53].mxu0  ;;  %7557 = vmatprep.subr.bf16.mxu1 %v8169_v51 }
 0x16f   : > { %10649 = vst [vmem:[#allocation8_spill] sm:$0xff] %v9158_v35  ;;  %v9169_v54 = vadd.f32 %v6823_v41, %v6822_v8  ;;  %v9180_v42 = vadd.f32 %v6684_v24, %v6683_v34  ;;  %v6686_v63 = vpop.f32.mrb[54].mxu0  ;;  %7012 = vmatpush3.bf16.msra.mxu0 %v8166_v39 }
 0x170   : > { %v6687_v8 = vpop.f32.mrb[55].mxu0 }
 0x171   : > { %10651 = vst [vmem:[#allocation10_spill] sm:$0xff] %v9169_v54  ;;  %v9184_v54 = vadd.f32 %v6687_v8, %v6686_v63  ;;  %7558 = vmatpush3.bf16.msra.mxu1 %v8169_v51  ;;  %v8176_v51 = vld [vmem:[%s10633_s2 + $0x178] sm:$0xff]  }
 0x173   : > { %v6825_v56 = vpop.f32.mrb[56].mxu1  ;;  %v6689_v0 = vpop.f32.mrb[56].mxu0 }
 0x174   : > { %v6826_v28 = vpop.f32.mrb[57].mxu1  ;;  %v6690_v19 = vpop.f32.mrb[57].mxu0 }
 0x175   : > { %v9182_v41 = vadd.f32 %v6826_v28, %v6825_v56  ;;  %v6828_v44 = vpop.f32.mrb[58].mxu1  ;;  %v9191_v34 = vadd.f32 %v6690_v19, %v6689_v0  ;;  %v6692_v15 = vpop.f32.mrb[58].mxu0 }
 0x176   : > { %v6829_v20 = vpop.f32.mrb[59].mxu1  ;;  %v6693_v56 = vpop.f32.mrb[59].mxu0 }
 0x177   : > { %10652 = vst [vmem:[#allocation11_spill] sm:$0xff] %v9182_v41  ;;  %v9186_v35 = vadd.f32 %v6829_v20, %v6828_v44  ;;  %v9195_v63 = vadd.f32 %v6693_v56, %v6692_v15  ;;  %v8172_v44 = vld [vmem:[%s10633_s2 + $0x168] sm:$0xff]   ;;  %v8175_v15 = vld [vmem:[%s10633_s2 + $0x170] sm:$0xff]  }
 0x178   : > { %7559 = vmatprep.subr.bf16.mxu1 %v8172_v44 }
 0x179   : > { %10653 = vst [vmem:[#allocation12_spill] sm:$0xff] %v9186_v35  ;;  %10654 = vst [vmem:[#allocation13_spill] sm:$0xff] %v9195_v63  ;;  %7560 = vmatpush3.bf16.msra.mxu1 %v8172_v44 }
 0x17a   : > { %7561 = vmatprep.subr.bf16.mxu1 %v8175_v15 }
 0x17b   : > { %v6831_v37 = vpop.f32.mrb[60].mxu1  ;;  %v6695_v19 = vpop.f32.mrb[60].mxu0 }
 0x17c   : > { %v6832_v24 = vpop.f32.mrb[61].mxu1  ;;  %v6696_v0 = vpop.f32.mrb[61].mxu0 }
 0x17d   : > { %v9193_v28 = vadd.f32 %v6832_v24, %v6831_v37  ;;  %v6834_v39 = vpop.f32.mrb[62].mxu1  ;;  %v9202_v35 = vadd.f32 %v6696_v0, %v6695_v19  ;;  %v6698_v37 = vpop.f32.mrb[62].mxu0  ;;  %7562 = vmatpush3.bf16.msra.mxu1 %v8175_v15 }
 0x17e   : > { %v6835_v20 = vpop.f32.mrb[63].mxu1  ;;  %v6699_v24 = vpop.f32.mrb[63].mxu0  ;;  %7563 = vmatprep.subr.bf16.mxu1 %v8176_v51 }
 0x17f   : > { %v9197_v8 = vadd.f32 %v6835_v20, %v6834_v39  ;;  %v9207_v56 = vadd.f32 %v6699_v24, %v6698_v37 }
 0x181   : > { %10655 = vst [vmem:[#allocation14_spill] sm:$0xff] %v9197_v8  ;;  %7564 = vmatpush3.bf16.msra.mxu1 %v8176_v51 }
 0x183   : > { %v7423_v39 = vpop.f32.mrb[64].mxu0 }
 0x184   : > { %v1518_v20 = vadd.f32 %v7423_v39, %v8978_v52  ;;  %v1509_v44 = vpop.f32.mrb[65].mxu0 }
 0x185   : > { %v1510_v19 = vadd.f32 %v8956_v23, %v1509_v44  ;;  %v7424_v0 = vpop.f32.mrb[66].mxu0 }
 0x186   : > { %v9215_v8 = vadd.f32 %v8958_v13, %v1518_v20  ;;  %v1521_v37 = vadd.f32 %v7424_v0, %v8986_v45  ;;  %v1512_v24 = vpop.f32.mrb[67].mxu0 }
 0x187   : > { %v9219_v15 = vadd.f32 %v8938_v21, %v1510_v19  ;;  %v1513_v63 = vadd.f32 %v8964_v14, %v1512_v24 }
 0x188   : > { %v9223_v41 = vadd.f32 %v8971_v16, %v1521_v37 }
 0x189   : > { %v9226_v52 = vadd.f32 %v8949_v7, %v1513_v63 }
 0x18b   : > { %v7427_v51 = vpop.f32.mrb[68].mxu0 }
 0x18c   : > { %v1534_v23 = vadd.f32 %v7427_v51, %v9020_v5  ;;  %v1525_v39 = vpop.f32.mrb[69].mxu0 }
 0x18d   : > { %v1526_v13 = vadd.f32 %v9000_v17, %v1525_v39  ;;  %v7428_v20 = vpop.f32.mrb[70].mxu0 }
 0x18e   : > { %v9231_v45 = vadd.f32 %v9002_v50, %v1534_v23  ;;  %v1537_v21 = vadd.f32 %v7428_v20, %v9025_v2  ;;  %v1528_v44 = vpop.f32.mrb[71].mxu0 }
 0x18f   : > { %v9235_v14 = vadd.f32 %v8980_v22, %v1526_v13  ;;  %v1529_v16 = vadd.f32 %v9008_v61, %v1528_v44 }
 0x190   : > { %v9239_v7 = vadd.f32 %v9014_v32, %v1537_v21 }
 0x191   : > { %v9242_v5 = vadd.f32 %v8993_v33, %v1529_v16 }
 0x195   : > { %v7431_v63 = vpop.f32.mrb[72].mxu0 }
 0x196   : > { %v1550_v17 = vadd.f32 %v7431_v63, %v9041_v12  ;;  %v1541_v19 = vpop.f32.mrb[73].mxu0 }
 0x197   : > { %v1542_v50 = vadd.f32 %v9031_v26, %v1541_v19  ;;  %v7432_v0 = vpop.f32.mrb[74].mxu0 }
 0x198   : > { %v9247_v2 = vadd.f32 %v9033_v4, %v1550_v17  ;;  %v1553_v22 = vadd.f32 %v7432_v0, %v9045_v31  ;;  %v1544_v37 = vpop.f32.mrb[75].mxu0  ;;  %v10657_v0 = vld [vmem:[#allocation3_spill] sm:$0xff] }
 0x199   : > { %v9251_v61 = vadd.f32 %v9022_v47, %v1542_v50  ;;  %v1545_v32 = vadd.f32 %v9035_v43, %v1544_v37 }
 0x19a   : > { %v9255_v33 = vadd.f32 %v9038_v10, %v1553_v22 }
 0x19b   : > { %v9258_v12 = vadd.f32 %v9028_v36, %v1545_v32 }
 0x19d   : > { %v7435_v24 = vpop.f32.mrb[76].mxu0 }
 0x19e   : > { %v1566_v26 = vadd.f32 %v7435_v24, %v9061_v3  ;;  %v1557_v51 = vpop.f32.mrb[77].mxu0 }
 0x19f   : > { %v1558_v4 = vadd.f32 %v9051_v57, %v1557_v51  ;;  %v7436_v23 = vpop.f32.mrb[78].mxu0 }
 0x1a0   : > { %v9263_v31 = vadd.f32 %v9053_v46, %v1566_v26  ;;  %v1569_v47 = vadd.f32 %v7436_v23, %v9065_v27  ;;  %v1560_v39 = vpop.f32.mrb[79].mxu0  ;;  %v10663_v23 = vld [vmem:[#allocation9_spill] sm:$0xff] }
 0x1a1   : > { %v9267_v43 = vadd.f32 %v9043_v11, %v1558_v4  ;;  %v1561_v10 = vadd.f32 %v9055_v62, %v1560_v39  ;;  %v10664_v39 = vld [vmem:[#allocation10_spill] sm:$0xff] }
 0x1a2   : > { %v9271_v36 = vadd.f32 %v9058_v58, %v1569_v47 }
 0x1a3   : > { %v9274_v3 = vadd.f32 %v9048_v40, %v1561_v10 }
 0x1a5   : > { %v7439_v13 = vpop.f32.mrb[80].mxu0 }
 0x1a6   : > { %v1582_v57 = vadd.f32 %v7439_v13, %v9081_v18  ;;  %v1573_v20 = vpop.f32.mrb[81].mxu0  ;;  %v10666_v13 = vld [vmem:[#allocation6_spill] sm:$0xff] }
 0x1a7   : > { %v1574_v46 = vadd.f32 %v9071_v49, %v1573_v20  ;;  %v7440_v21 = vpop.f32.mrb[82].mxu0 }
 0x1a8   : > { %v9279_v27 = vadd.f32 %v9073_v53, %v1582_v57  ;;  %v1585_v11 = vadd.f32 %v7440_v21, %v9091_v9  ;;  %v1576_v44 = vpop.f32.mrb[83].mxu0 }
 0x1a9   : > { %v9283_v62 = vadd.f32 %v9063_v6, %v1574_v46  ;;  %v1577_v58 = vadd.f32 %v9075_v59, %v1576_v44 }
 0x1aa   : > { %v9287_v40 = vadd.f32 %v9078_v60, %v1585_v11 }
 0x1ab   : > { %v9290_v18 = vadd.f32 %v9068_v1, %v1577_v58  ;;  %v10656_v1 = vld [vmem:[#allocation4_spill] sm:$0xff] }
 0x1ad   : > { %v7443_v16 = vpop.f32.mrb[84].mxu0 }
 0x1ae   : > { %v1598_v49 = vadd.f32 %v7443_v16, %v9125_v55  ;;  %v1589_v63 = vpop.f32.mrb[85].mxu0 }
 0x1af   : > { %v1590_v53 = vadd.f32 %v9103_v48, %v1589_v63  ;;  %v7444_v17 = vpop.f32.mrb[86].mxu0  ;;  %v10669_v63 = vld [vmem:[#allocation11_spill] sm:$0xff] }
 0x1b0   : > { %v9295_v9 = vadd.f32 %v9105_v25, %v1598_v49  ;;  %v1601_v6 = vadd.f32 %v7444_v17, %v9135_v38  ;;  %v1592_v19 = vpop.f32.mrb[87].mxu0  ;;  %v10658_v25 = vld [vmem:[#allocation7_spill] sm:$0xff]  ;;  %v10659_v38 = vld [vmem:[#allocation8_spill] sm:$0xff]  ;;  %v10671_v17 = vld [vmem:[#allocation13_spill] sm:$0xff] }
 0x1b1   : > { %v9299_v59 = vadd.f32 %v9086_v30, %v1590_v53  ;;  %v1593_v60 = vadd.f32 %v9110_v29, %v1592_v19  ;;  %v10661_v29 = vld [vmem:[#allocation5_spill] sm:$0xff] }
 0x1b2   : > { %v9303_v50 = vadd.f32 %v10656_v1, %v1601_v6 }
 0x1b3   : > { %v9306_v55 = vadd.f32 %v10657_v0, %v1593_v60  ;;  %v10672_v60 = vld [vmem:[#allocation14_spill] sm:$0xff] }
 0x1b5   : > { %v7447_v22 = vpop.f32.mrb[88].mxu0 }
 0x1b6   : > { %v1614_v48 = vadd.f32 %v7447_v22, %v9180_v42  ;;  %v1605_v37 = vpop.f32.mrb[89].mxu0 }
 0x1b7   : > { %v1606_v32 = vadd.f32 %v10658_v25, %v1605_v37  ;;  %v7448_v24 = vpop.f32.mrb[90].mxu0 }
 0x1b8   : > { %v9311_v26 = vadd.f32 %v10659_v38, %v1614_v48  ;;  %v1617_v30 = vadd.f32 %v7448_v24, %v9184_v54  ;;  %v1608_v51 = vpop.f32.mrb[91].mxu0 }
 0x1b9   : > { %v9315_v4 = vadd.f32 %v10661_v29, %v1606_v32  ;;  %v1609_v47 = vadd.f32 %v10663_v23, %v1608_v51  ;;  %v9350_v51 = vld [vmem:[%s10634_s3] ss:$0 sm:$0xff] }
 0x1ba   : > { %10660 = vst [vmem:[#allocation4_spill] sm:$0xff] %v9311_v26  ;;  %v9319_v10 = vadd.f32 %v10664_v39, %v1617_v30  ;;  %v9358_v39 = vld [vmem:[%s10635_s4] ss:$0 sm:$0xff] }
 0x1bb   : > { %10662 = vst [vmem:[#allocation3_spill] sm:$0xff] %v9315_v4  ;;  %v9322_v42 = vadd.f32 %v10666_v13, %v1609_v47 }
 0x1bc   : > { %10665 = vst [vmem:[#allocation7_spill] sm:$0xff] %v9319_v10 }
 0x1bd   : > { %10667 = vst [vmem:[#allocation8_spill] sm:$0xff] %v9322_v42  ;;  %v7451_v57 = vpop.f32.mrb[92].mxu0 }
 0x1be   : > { %v1630_v20 = vadd.f32 %v7451_v57, %v9202_v35  ;;  %v1621_v46 = vpop.f32.mrb[93].mxu0 }
 0x1bf   : > { %v1622_v21 = vadd.f32 %v9191_v34, %v1621_v46  ;;  %v7452_v11 = vpop.f32.mrb[94].mxu0  ;;  %v10674_v34 = vld [vmem:[#allocation12_spill] sm:$0xff] }
 0x1c0   : > { %v9327_v44 = vadd.f32 %v9193_v28, %v1630_v20  ;;  %v1633_v58 = vadd.f32 %v7452_v11, %v9207_v56  ;;  %v1624_v16 = vpop.f32.mrb[95].mxu0  ;;  %v9364_v20 = vld [vmem:[%s10633_s2 + $0x80] sm:$0xff]  }
 0x1c1   : > { %v9331_v53 = vadd.f32 %v10669_v63, %v1622_v21  ;;  %v1625_v6 = vadd.f32 %v10671_v17, %v1624_v16  ;;  %7597 = vmatprep.subr.bf16.mxu1 %v9364_v20 }
 0x1c2   : > { %10668 = vst [vmem:[#allocation5_spill] sm:$0xff] %v9327_v44  ;;  %v9335_v35 = vadd.f32 %v10672_v60, %v1633_v58 }
 0x1c3   : > { %v7519_v54 = vpop.f32.mrb[64].mxu1  ;;  %10670 = vst [vmem:[#allocation9_spill] sm:$0xff] %v9331_v53  ;;  %v9338_v0 = vadd.f32 %v10674_v34, %v1625_v6 }
 0x1c4   : > { %v2635_v49 = vpop.f32.mrb[65].mxu1  ;;  %10673 = vst [vmem:[#allocation10_spill] sm:$0xff] %v9335_v35 }
 0x1c5   : > { %v7520_v19 = vpop.f32.mrb[66].mxu1  ;;  %10675 = vst [vmem:[#allocation6_spill] sm:$0xff] %v9338_v0  ;;  %v6877_v22 = vpop.f32.mrb[96].mxu0 }
 0x1c6   : > { %v2638_v1 = vpop.f32.mrb[67].mxu1  ;;  %v6878_v28 = vpop.f32.mrb[97].mxu0 }
 0x1c7   : > { %v6879_v48 = vadd.f32 %v6878_v28, %v6877_v22  ;;  %v6880_v37 = vpop.f32.mrb[98].mxu0  ;;  %v3441_v22 = vld [vmem:[#allocation2] sm:$0xf]  ;;  %v3442_v28 = vld [vmem:[#allocation2 + $0x4] sm:$0xf] }
 0x1c8   : > { %v6881_v25 = vpop.f32.mrb[99].mxu0 }
 0x1c9   : > { %v7699_v24 = vadd.f32 %v6879_v48, %v9219_v15  ;;  %v6882_v38 = vadd.f32 %v6881_v25, %v6880_v37 }
 0x1cb   : > { %v9340_v56 = vpop.f32.mrb[68].mxu1  ;;  %v7700_v23 = vadd.f32 %v7699_v24, %v2635_v49  ;;  %v7707_v47 = vadd.f32 %v6882_v38, %v9226_v52 }
 0x1cc   : > { %v9342_v32 = vpop.f32.mrb[69].mxu1 }
 0x1cd   : > { %v9345_v30 = vpop.f32.mrb[70].mxu1  ;;  %v2801_v15 = vmul.f32 %v7700_v23, %v9350_v51  ;;  %v7708_v13 = vadd.f32 %v7707_v47, %v2638_v1  ;;  %v6883_v57 = vpop.f32.mrb[100].mxu0  ;;  %v9380_v23 = vcombine.low %v3441_v22, %v3442_v28 }
 0x1ce   : > { %v9352_v29 = vpop.f32.mrb[71].mxu1  ;;  %v6884_v46 = vpop.f32.mrb[101].mxu0 }
 0x1cf   : > { %v2840_v21 = vadd.f32 %v9358_v39, %v2801_v15  ;;  %v2802_v11 = vmul.f32 %v7708_v13, %v9350_v51  ;;  %v6885_v52 = vadd.f32 %v6884_v46, %v6883_v57  ;;  %v6886_v58 = vpop.f32.mrb[102].mxu0  ;;  %10676 = vst [vmem:[#allocation11_spill] sm:$0xff] %v9380_v23  ;;  %v3706_v28 = vshrl.u32 %v9380_v23, 16 }
 0x1d0   : > { %v6887_v49 = vpop.f32.mrb[103].mxu0 }
 0x1d1   : > { %v2872_v17 = vmax.f32 %v2840_v21, 0.0  ;;  %v2841_v6 = vadd.f32 %v9358_v39, %v2802_v11  ;;  %v7695_v60 = vadd.f32 %v6885_v52, %v9215_v8  ;;  %v6888_v1 = vadd.f32 %v6887_v49, %v6886_v58  ;;  %v8171_v49 = vld [vmem:[#allocation2 + $0x8] ss:$0 sps:$4 sm:$0x11]  }
 0x1d3   : > { %v9368_v16 = vpop.f32.mrb[72].mxu1  ;;  %v6504_v37 = vpack.c.bf16 %v2872_v17, %v2872_v17  ;;  %v2873_v25 = vmax.f32 %v2841_v6, 0.0  ;;  %v7696_v24 = vadd.f32 %v7695_v60, %v7519_v54  ;;  %v7703_v38 = vadd.f32 %v6888_v1, %v9223_v41  ;;  %v3327_v6 = vld [vmem:[#allocation2 + $0xc] sm:$0xf] }
 0x1d4   : > { %v9371_v63 = vpop.f32.mrb[73].mxu1 }
 0x1d5   : > { %v9375_v34 = vpop.f32.mrb[74].mxu1  ;;  %v3004_v47 = vshrl.u32 %v6504_v37, 16  ;;  %v6505_v15 = vpack.c.bf16 %v2873_v25, %v2873_v25  ;;  %v2803_v8 = vmul.f32 %v7696_v24, %v9350_v51  ;;  %v6889_v13 = vpop.f32.mrb[104].mxu0  ;;  %v7704_v57 = vadd.f32 %v7703_v38, %v7520_v19  ;;  %v9955_v24 = vld [vmem:[#allocation2 + $0xd4] ss:$0 sps:$4 sm:$0x11]  }
 0x1d6   : > { %v9377_v48 = vpop.f32.mrb[75].mxu1  ;;  %v6890_v46 = vpop.f32.mrb[105].mxu0  ;;  %v3007_v11 = vshll.u32 %v6504_v37, 16  ;;  %v3708_v37 = vshll.u32 %v9380_v23, 16 }
 0x1d7   : > { %v3006_v21 = vrot.slane %v3004_v47, 7  ;;  %v3012_v52 = vshrl.u32 %v6505_v15, 16  ;;  %v2842_v54 = vadd.f32 %v9358_v39, %v2803_v8  ;;  %v6892_v41 = vpop.f32.mrb[106].mxu0  ;;  %v2804_v60 = vmul.f32 %v7704_v57, %v9350_v51 }
 0x1d8   : > { %v6891_v19 = vadd.f32 %v6890_v46, %v6889_v13  ;;  %v6893_v1 = vpop.f32.mrb[107].mxu0  ;;  %v3015_v47 = vshll.u32 %v6505_v15, 16  ;;  %v3333_v46 = vld [vmem:[#allocation2 + $0x14] sm:$0x1]  ;;  %v3710_v42 = vrot.slane %v3708_v37, 1 }
 0x1d9   : > { %v3009_v25 = vor.u32 %v3007_v11, %v3006_v21  ;;  %v3014_v38 = vrot.slane %v3012_v52, 7  ;;  %v2874_v8 = vmax.f32 %v2842_v54, 0.0  ;;  %v3010_v13 = vrot.slane %v3006_v21, 4 }
 0x1da   : > { %v2843_v11 = vadd.f32 %v9358_v39, %v2804_v60  ;;  %v7715_v23 = vadd.f32 %v6891_v19, %v9235_v14  ;;  %v6894_v44 = vadd.f32 %v6893_v1, %v6892_v41  ;;  %v3713_v1 = vshll.u32 %v8171_v49, 16 }
 0x1db   : > { %v9384_v58 = vpop.f32.mrb[76].mxu1  ;;  %v3328_v15 = vsel %vm9388_vm7, %v3009_v25, %v3327_v6  ;;  %v3017_v52 = vor.u32 %v3015_v47, %v3014_v38  ;;  %v3019_v54 = vrot.slane %v3014_v38, 4  ;;  %v6506_v21 = vpack.c.bf16 %v2874_v8, %v2874_v8  ;;  %v3336_v8 = vld [vmem:[#allocation2 + $0x18] sm:$0xf] }
 0x1dc   : > { %v9393_v22 = vpop.f32.mrb[77].mxu1  ;;  %3329 = vst [vmem:[#allocation2 + $0xc] sm:$0xf] %v3328_v15  ;;  %v2875_v53 = vmax.f32 %v2843_v11, 0.0  ;;  %v7716_v10 = vadd.f32 %v7715_v23, %v9342_v32  ;;  %v7723_v26 = vadd.f32 %v6894_v44, %v9242_v5 }
 0x1dd   : > { %v9403_v35 = vpop.f32.mrb[78].mxu1  ;;  %v3018_v60 = vsel %vm9399_vm8, %v3010_v13, %v3017_v52  ;;  %v3334_v14 = vsel %vm9407_vm9, %v3019_v54, %v3333_v46  ;;  %v3021_v41 = vshrl.u32 %v6506_v21, 16  ;;  %v6895_v19 = vpop.f32.mrb[108].mxu0  ;;  %v3024_v5 = vshll.u32 %v6506_v21, 16  ;;  %v8203_v21 = vld [vmem:[%s10633_s2 + $0x40] sm:$0xff]  }
 0x1de   : > { %v9413_v0 = vpop.f32.mrb[79].mxu1  ;;  %3330 = vst [vmem:[#allocation2 + $0x10] sm:$0xf] %v3018_v60  ;;  %3335 = vst [vmem:[#allocation2 + $0x14] sm:$0x1] %v3334_v14  ;;  %v6507_v6 = vpack.c.bf16 %v2875_v53, %v2875_v53  ;;  %v2805_v25 = vmul.f32 %v7716_v10, %v9350_v51  ;;  %v7724_v38 = vadd.f32 %v7723_v26, %v9352_v29  ;;  %v6896_v32 = vpop.f32.mrb[109].mxu0  ;;  %7133 = vmatprep.subr.bf16.mxu0 %v8203_v21 }
 0x1df   : > { %v3023_v23 = vrot.slane %v3021_v41, 7  ;;  %v6897_v44 = vadd.f32 %v6896_v32, %v6895_v19  ;;  %v6898_v37 = vpop.f32.mrb[110].mxu0  ;;  %v3711_v53 = vor.u32 %v3710_v42, %v3706_v28  ;;  %v3715_v54 = vrot.slane %v3713_v1, 1 }
 0x1e0   : > { %v3029_v13 = vshrl.u32 %v6507_v6, 16  ;;  %v2844_v46 = vadd.f32 %v9358_v39, %v2805_v25  ;;  %v2806_v49 = vmul.f32 %v7724_v38, %v9350_v51  ;;  %v6899_v11 = vpop.f32.mrb[111].mxu0  ;;  %v3032_v14 = vshll.u32 %v6507_v6, 16 }
 0x1e1   : > { %v3026_v10 = vor.u32 %v3024_v5, %v3023_v23  ;;  %v7711_v26 = vadd.f32 %v6897_v44, %v9231_v45  ;;  %v6900_v29 = vadd.f32 %v6899_v11, %v6898_v37  ;;  %v3027_v38 = vrot.slane %v3023_v23, 4  ;;  %v3340_v45 = vld [vmem:[#allocation2 + $0x20] sm:$0x1] }
 0x1e2   : > { %v3031_v60 = vrot.slane %v3029_v13, 7  ;;  %v2876_v41 = vmax.f32 %v2844_v46, 0.0  ;;  %v2845_v19 = vadd.f32 %v9358_v39, %v2806_v49 }
 0x1e3   : > { %v9425_v47 = vpop.f32.mrb[80].mxu1  ;;  %v3337_v42 = vsel %vm9388_vm7, %v3026_v10, %v3336_v8  ;;  %v7712_v28 = vadd.f32 %v7711_v26, %v9340_v56  ;;  %v7719_v1 = vadd.f32 %v6900_v29, %v9239_v7  ;;  %v9453_v10 = vsel %vm886_vm0, %v3711_v53, %v3715_v54  ;;  %v3343_v54 = vld [vmem:[#allocation2 + $0x24] sm:$0xf] }
 0x1e4   : > { %v9429_v15 = vpop.f32.mrb[81].mxu1  ;;  %3338 = vst [vmem:[#allocation2 + $0x18] sm:$0xf] %v3337_v42  ;;  %v3034_v32 = vor.u32 %v3032_v14, %v3031_v60  ;;  %v3036_v5 = vrot.slane %v3031_v60, 4  ;;  %v6508_v44 = vpack.c.bf16 %v2876_v41, %v2876_v41  ;;  %v2877_v6 = vmax.f32 %v2845_v19, 0.0 }
 0x1e5   : > { %v9432_v52 = vpop.f32.mrb[82].mxu1  ;;  %v2807_v37 = vmul.f32 %v7712_v28, %v9350_v51  ;;  %v7720_v13 = vadd.f32 %v7719_v1, %v9345_v30  ;;  %v6901_v46 = vpop.f32.mrb[112].mxu0  ;;  %v3444_v23 = vld [vmem:[#allocation2 + $0x10] sm:$0xf]  ;;  %v3443_v41 = vld [vmem:[#allocation2 + $0xc] sm:$0xf] }
 0x1e6   : > { %v9438_v25 = vpop.f32.mrb[83].mxu1  ;;  %v3035_v8 = vsel %vm9399_vm8, %v3027_v38, %v3034_v32  ;;  %v3341_v56 = vsel %vm9407_vm9, %v3036_v5, %v3340_v45  ;;  %v3038_v49 = vshrl.u32 %v6508_v44, 16  ;;  %v6902_v7 = vpop.f32.mrb[113].mxu0  ;;  %v9450_v11 = vld [vmem:[#allocation2 + $0x14] ss:$0 sps:$4 sm:$0x11]   ;;  %v6509_v26 = vpack.c.bf16 %v2877_v6, %v2877_v6 }
 0x1e7   : > { %3339 = vst [vmem:[#allocation2 + $0x1c] sm:$0xf] %v3035_v8  ;;  %3342 = vst [vmem:[#allocation2 + $0x20] sm:$0x1] %v3341_v56  ;;  %v2846_v30 = vadd.f32 %v9358_v39, %v2807_v37  ;;  %v2808_v29 = vmul.f32 %v7720_v13, %v9350_v51  ;;  %v6903_v21 = vadd.f32 %v6902_v7, %v6901_v46  ;;  %v6904_v60 = vpop.f32.mrb[114].mxu0  ;;  %v3041_v38 = vshll.u32 %v6508_v44, 16 }
 0x1e8   : > { %v3040_v19 = vrot.slane %v3038_v49, 7  ;;  %v6905_v42 = vpop.f32.mrb[115].mxu0  ;;  %v9461_v28 = vcombine.low %v3443_v41, %v3444_v23  ;;  %v3725_v53 = vshll.u32 %v9450_v11, 16  ;;  %v3046_v1 = vshrl.u32 %v6509_v26, 16 }
 0x1e9   : > { %v3049_v32 = vshll.u32 %v6509_v26, 16  ;;  %v2878_v5 = vmax.f32 %v2846_v30, 0.0  ;;  %v2847_v6 = vadd.f32 %v9358_v39, %v2808_v29  ;;  %v7731_v8 = vadd.f32 %v6903_v21, %v9251_v61  ;;  %v3347_v30 = vld [vmem:[#allocation2 + $0x2c] sm:$0x1] }
 0x1ea   : > { %10683 = vst [vmem:[#allocation13_spill] sm:$0xff] %v9461_v28  ;;  %v3043_v13 = vor.u32 %v3041_v38, %v3040_v19  ;;  %v3044_v46 = vrot.slane %v3040_v19, 4  ;;  %v6906_v44 = vadd.f32 %v6905_v42, %v6904_v60  ;;  %v3048_v49 = vrot.slane %v3046_v1, 7 }
 0x1eb   : > { %v9457_v14 = vpop.f32.mrb[84].mxu1  ;;  %v6510_v23 = vpack.c.bf16 %v2878_v5, %v2878_v5  ;;  %v2879_v7 = vmax.f32 %v2847_v6, 0.0  ;;  %v3718_v11 = vshrl.u32 %v9461_v28, 16  ;;  %v7732_v29 = vadd.f32 %v7731_v8, %v9371_v63  ;;  %v3350_v8 = vld [vmem:[#allocation2 + $0x30] sm:$0xf] }
 0x1ec   : > { %v9459_v45 = vpop.f32.mrb[85].mxu1  ;;  %v3344_v26 = vsel %vm9388_vm7, %v3043_v13, %v3343_v54  ;;  %v7739_v41 = vadd.f32 %v6906_v44, %v9258_v12  ;;  %v3720_v19 = vshll.u32 %v9461_v28, 16  ;;  %v3051_v61 = vor.u32 %v3049_v32, %v3048_v49  ;;  %v3354_v28 = vld [vmem:[#allocation2 + $0x38] sm:$0x1] }
 0x1ed   : > { %v9465_v37 = vpop.f32.mrb[86].mxu1  ;;  %3345 = vst [vmem:[#allocation2 + $0x24] sm:$0xf] %v3344_v26  ;;  %v3053_v21 = vrot.slane %v3048_v49, 4  ;;  %v3055_v60 = vshrl.u32 %v6510_v23, 16  ;;  %v3058_v38 = vshll.u32 %v6510_v23, 16  ;;  %v6511_v1 = vpack.c.bf16 %v2879_v7, %v2879_v7 }
 0x1ee   : > { %v9468_v56 = vpop.f32.mrb[87].mxu1  ;;  %v6907_v42 = vpop.f32.mrb[116].mxu0  ;;  %v2809_v5 = vmul.f32 %v7732_v29, %v9350_v51  ;;  %v7740_v6 = vadd.f32 %v7739_v41, %v9377_v48  ;;  %v3722_v54 = vrot.slane %v3720_v19, 1  ;;  %v3052_v63 = vsel %vm9399_vm8, %v3044_v46, %v3051_v61  ;;  %v3446_v46 = vld [vmem:[#allocation2 + $0x1c] sm:$0xf] }
 0x1ef   : > { %v6908_v4 = vpop.f32.mrb[117].mxu0  ;;  %v3348_v12 = vsel %vm9407_vm9, %v3053_v21, %v3347_v30  ;;  %v3057_v13 = vrot.slane %v3055_v60, 7  ;;  %3346 = vst [vmem:[#allocation2 + $0x28] sm:$0xf] %v3052_v63  ;;  %v3063_v23 = vshrl.u32 %v6511_v1, 16  ;;  %v3066_v7 = vshll.u32 %v6511_v1, 16 }
 0x1f0   : > { %v6909_v32 = vadd.f32 %v6908_v4, %v6907_v42  ;;  %v6910_v44 = vpop.f32.mrb[118].mxu0  ;;  %3349 = vst [vmem:[#allocation2 + $0x2c] sm:$0x1] %v3348_v12  ;;  %v2848_v48 = vadd.f32 %v9358_v39, %v2809_v5  ;;  %v2810_v26 = vmul.f32 %v7740_v6, %v9350_v51  ;;  %v3723_v4 = vor.u32 %v3722_v54, %v3718_v11  ;;  %v3445_v12 = vld [vmem:[#allocation2 + $0x18] sm:$0xf] }
 0x1f1   : > { %v6911_v29 = vpop.f32.mrb[119].mxu0  ;;  %v3060_v19 = vor.u32 %v3058_v38, %v3057_v13  ;;  %v3061_v30 = vrot.slane %v3057_v13, 4  ;;  %v3065_v60 = vrot.slane %v3063_v23, 7  ;;  %v3727_v1 = vrot.slane %v3725_v53, 1  ;;  %v8205_v53 = vld [vmem:[%s10633_s2] sm:$0xff]  }
 0x1f2   : > { %v7727_v61 = vadd.f32 %v6909_v32, %v9247_v2  ;;  %v2880_v42 = vmax.f32 %v2848_v48, 0.0  ;;  %v2849_v63 = vadd.f32 %v9358_v39, %v2810_v26  ;;  %v6912_v13 = vadd.f32 %v6911_v29, %v6910_v44  ;;  %v8174_v23 = vld [vmem:[#allocation2 + $0x20] ss:$0 sps:$4 sm:$0x11]  }
 0x1f3   : > { %v9482_v49 = vpop.f32.mrb[88].mxu1  ;;  %v3351_v6 = vsel %vm9388_vm7, %v3060_v19, %v3350_v8  ;;  %v3068_v2 = vor.u32 %v3066_v7, %v3065_v60  ;;  %v3070_v11 = vrot.slane %v3065_v60, 4  ;;  %v9504_v8 = vsel %vm886_vm0, %v3723_v4, %v3727_v1  ;;  %v8206_v7 = vld [vmem:[%s10633_s2 + $0x48] sm:$0xff]  }
 0x1f4   : > { %10684 = vst [vmem:[#allocation14_spill] sm:$0xff] %v9482_v49  ;;  %v9486_v41 = vpop.f32.mrb[89].mxu1  ;;  %v7728_v38 = vadd.f32 %v7727_v61, %v9368_v16  ;;  %v9497_v49 = vcombine.low %v3445_v12, %v3446_v46  ;;  %3352 = vst [vmem:[#allocation2 + $0x30] sm:$0xf] %v3351_v6  ;;  %v6512_v54 = vpack.c.bf16 %v2880_v42, %v2880_v42  ;;  %v2881_v32 = vmax.f32 %v2849_v63, 0.0 }
 0x1f5   : > { %v9489_v21 = vpop.f32.mrb[90].mxu1  ;;  %v7735_v16 = vadd.f32 %v6912_v13, %v9255_v33  ;;  %v6913_v44 = vpop.f32.mrb[120].mxu0  ;;  %v3069_v29 = vsel %vm9399_vm8, %v3061_v30, %v3068_v2  ;;  %v3355_v46 = vsel %vm9407_vm9, %v3070_v11, %v3354_v28  ;;  %4164 = vmatprep.mubr.bf16.mxu0 %v9504_v8  ;;  %v3447_v60 = vld [vmem:[#allocation2 + $0x24] sm:$0xf]  ;;  %v3357_v33 = vld [vmem:[#allocation2 + $0x3c] sm:$0xf] }
 0x1f6   : > { %v9492_v5 = vpop.f32.mrb[91].mxu1  ;;  %10685 = vst [vmem:[#allocation12_spill] sm:$0xff] %v9497_v49  ;;  %v2811_v48 = vmul.f32 %v7728_v38, %v9350_v51  ;;  %v3730_v26 = vshrl.u32 %v9497_v49, 16  ;;  %v3072_v19 = vshrl.u32 %v6512_v54, 16  ;;  %v3075_v61 = vshll.u32 %v6512_v54, 16  ;;  %v6914_v4 = vpop.f32.mrb[121].mxu0  ;;  %4165 = vmatmul.mubr.bf16.vlgmr.msra.gmra.mrb[160].mxu0 %v9453_v10 }
 0x1f7   : > { %3353 = vst [vmem:[#allocation2 + $0x34] sm:$0xf] %v3069_v29  ;;  %3356 = vst [vmem:[#allocation2 + $0x38] sm:$0x1] %v3355_v46  ;;  %v6513_v42 = vpack.c.bf16 %v2881_v32, %v2881_v32  ;;  %v7736_v1 = vadd.f32 %v7735_v16, %v9375_v34  ;;  %v6915_v30 = vadd.f32 %v6914_v4, %v6913_v44  ;;  %v6916_v12 = vpop.f32.mrb[122].mxu0  ;;  %v3732_v13 = vshll.u32 %v9497_v49, 16 }
 0x1f8   : > { %v2850_v63 = vadd.f32 %v9358_v39, %v2811_v48  ;;  %v3448_v28 = vld [vmem:[#allocation2 + $0x28] sm:$0xf]  ;;  %v3074_v38 = vrot.slane %v3072_v19, 7  ;;  %v3737_v2 = vshll.u32 %v8174_v23, 16  ;;  %v6917_v11 = vpop.f32.mrb[123].mxu0  ;;  %7134 = vmatpush3.bf16.msra.mxu0 %v8205_v53  ;;  %v8210_v23 = vld [vmem:[%s10633_s2 + $0x50] sm:$0xff]  }
 0x1f9   : > { %v9524_v29 = vcombine.low %v3447_v60, %v3448_v28  ;;  %v8207_v34 = vld [vmem:[%s10633_s2 + $0x8] sm:$0xff]   ;;  %v3080_v10 = vshrl.u32 %v6513_v42, 16  ;;  %v3083_v32 = vshll.u32 %v6513_v42, 16  ;;  %v2812_v16 = vmul.f32 %v7736_v1, %v9350_v51  ;;  %7135 = vmatprep.subr.bf16.mxu0 %v8206_v7  ;;  %v3361_v7 = vld [vmem:[#allocation2 + $0x44] sm:$0x1] }
 0x1fa   : > { %v2882_v48 = vmax.f32 %v2850_v63, 0.0  ;;  %v3077_v46 = vor.u32 %v3075_v61, %v3074_v38  ;;  %v3078_v19 = vrot.slane %v3074_v38, 4  ;;  %v7747_v53 = vadd.f32 %v6915_v30, %v9267_v43 }
 0x1fb   : > { %v9519_v6 = vpop.f32.mrb[92].mxu1  ;;  %v3734_v4 = vrot.slane %v3732_v13, 1  ;;  %v3082_v28 = vrot.slane %v3080_v10, 7  ;;  %v2851_v42 = vadd.f32 %v9358_v39, %v2812_v16  ;;  %v3739_v63 = vrot.slane %v3737_v2, 1  ;;  %v8212_v2 = vld [vmem:[%s10633_s2 + $0x10] sm:$0xff]  }
 0x1fc   : > { %10686 = vst [vmem:[#allocation15_spill] sm:$0xff] %v9519_v6  ;;  %v9522_v54 = vpop.f32.mrb[93].mxu1  ;;  %v6514_v49 = vpack.c.bf16 %v2882_v48, %v2882_v48  ;;  %v3358_v1 = vsel %vm9388_vm7, %v3077_v46, %v3357_v33  ;;  %7136 = vmatpush3.bf16.msra.mxu0 %v8207_v34  ;;  %v8178_v16 = vld [vmem:[#allocation2 + $0x2c] ss:$0 sps:$4 sm:$0x11]   ;;  %v3742_v46 = vshrl.u32 %v9524_v29, 16 }
 0x1fd   : > { %10687 = vst [vmem:[#allocation16_spill] sm:$0xff] %v9522_v54  ;;  %v9530_v44 = vpop.f32.mrb[94].mxu1  ;;  %v3735_v6 = vor.u32 %v3734_v4, %v3730_v26  ;;  %v6918_v54 = vadd.f32 %v6917_v11, %v6916_v12  ;;  %3359 = vst [vmem:[#allocation2 + $0x3c] sm:$0xf] %v3358_v1  ;;  %v3085_v61 = vor.u32 %v3083_v32, %v3082_v28  ;;  %v3087_v43 = vrot.slane %v3082_v28, 4  ;;  %v6919_v13 = vpop.f32.mrb[124].mxu0 }
 0x1fe   : > { %10688 = vst [vmem:[#allocation17_spill] sm:$0xff] %v9530_v44  ;;  %v9536_v60 = vpop.f32.mrb[95].mxu1  ;;  %v7748_v44 = vadd.f32 %v7747_v53, %v9393_v22  ;;  %v3089_v30 = vshrl.u32 %v6514_v49, 16  ;;  %v3092_v38 = vshll.u32 %v6514_v49, 16  ;;  %7137 = vmatprep.subr.bf16.mxu0 %v8210_v23  ;;  %v2883_v10 = vmax.f32 %v2851_v42, 0.0  ;;  %v6920_v26 = vpop.f32.mrb[125].mxu0 }
 0x1ff   : > { %v9547_v48 = vsel %vm886_vm0, %v3735_v6, %v3739_v63  ;;  %v7755_v22 = vadd.f32 %v6918_v54, %v9274_v3  ;;  %v8213_v12 = vld [vmem:[%s10633_s2 + $0x58] sm:$0xff]   ;;  %v3086_v49 = vsel %vm9399_vm8, %v3078_v19, %v3085_v61  ;;  %v3362_v11 = vsel %vm9407_vm9, %v3087_v43, %v3361_v7  ;;  %v6922_v32 = vpop.f32.mrb[126].mxu0  ;;  %v3364_v3 = vld [vmem:[#allocation2 + $0x48] sm:$0xf]  ;;  %v8217_v43 = vld [vmem:[%s10633_s2 + $0x60] sm:$0xff]  }
 0x200   : > { %v2813_v33 = vmul.f32 %v7748_v44, %v9350_v51  ;;  %v3091_v34 = vrot.slane %v3089_v30, 7  ;;  %4172 = vmatprep.mubr.bf16.mxu0 %v9547_v48  ;;  %7565 = vmatprep.mubr.bf16.mxu1 %v9547_v48  ;;  %v6921_v6 = vadd.f32 %v6920_v26, %v6919_v13  ;;  %3360 = vst [vmem:[#allocation2 + $0x40] sm:$0xf] %v3086_v49  ;;  %3363 = vst [vmem:[#allocation2 + $0x44] sm:$0x1] %v3362_v11  ;;  %v6923_v19 = vpop.f32.mrb[127].mxu0 }
 0x201   : > { %v6515_v54 = vpack.c.bf16 %v2883_v10, %v2883_v10  ;;  %v7756_v23 = vadd.f32 %v7755_v22, %v9413_v0  ;;  %4173 = vmatmul.mubr.bf16.gmra.mrb[164].mxu0 %v9504_v8  ;;  %v3744_v42 = vshll.u32 %v9524_v29, 16  ;;  %v8214_v63 = vld [vmem:[%s10633_s2 + $0x18] sm:$0xff]   ;;  %v3450_v8 = vld [vmem:[#allocation2 + $0x34] sm:$0xf]  ;;  %v3749_v13 = vshll.u32 %v8178_v16, 16 }
 0x202   : > { %v2852_v44 = vadd.f32 %v9358_v39, %v2813_v33  ;;  %v3094_v53 = vor.u32 %v3092_v38, %v3091_v34  ;;  %v3095_v4 = vrot.slane %v3091_v34, 4  ;;  %v7743_v28 = vadd.f32 %v6921_v6, %v9263_v31  ;;  %7138 = vmatpush3.bf16.msra.mxu0 %v8212_v2  ;;  %v3449_v26 = vld [vmem:[#allocation2 + $0x30] sm:$0xf] }
 0x203   : > { %v3097_v1 = vshrl.u32 %v6515_v54, 16  ;;  %v3100_v7 = vshll.u32 %v6515_v54, 16  ;;  %v2814_v0 = vmul.f32 %v7756_v23, %v9350_v51  ;;  %7139 = vmatprep.subr.bf16.mxu0 %v8213_v12  ;;  %v3746_v38 = vrot.slane %v3744_v42, 1  ;;  %v3368_v49 = vld [vmem:[#allocation2 + $0x50] sm:$0x1] }
 0x204   : > { %v2884_v61 = vmax.f32 %v2852_v44, 0.0  ;;  %v3365_v31 = vsel %vm9388_vm7, %v3094_v53, %v3364_v3  ;;  %v7744_v30 = vadd.f32 %v7743_v28, %v9384_v58  ;;  %v6924_v22 = vadd.f32 %v6923_v19, %v6922_v32  ;;  %v8194_v53 = vld [vmem:[%s10633_s2 + $0x88] sm:$0xff]   ;;  %v8219_v32 = vld [vmem:[%s10633_s2 + $0x20] sm:$0xff]  }
 0x205   : > { %3366 = vst [vmem:[#allocation2 + $0x48] sm:$0xf] %v3365_v31  ;;  %v3099_v2 = vrot.slane %v3097_v1, 7  ;;  %v2853_v33 = vadd.f32 %v9358_v39, %v2814_v0  ;;  %v3747_v11 = vor.u32 %v3746_v38, %v3742_v46  ;;  %v3751_v34 = vrot.slane %v3749_v13, 1  ;;  %v6925_v6 = vpop.f32.mrb[128].mxu0  ;;  %v8220_v1 = vld [vmem:[%s10633_s2 + $0x68] sm:$0xff]  }
 0x206   : > { %v6516_v10 = vpack.c.bf16 %v2884_v61, %v2884_v61  ;;  %v2815_v12 = vmul.f32 %v7744_v30, %v9350_v51  ;;  %v9577_v54 = vcombine.low %v3449_v26, %v3450_v8  ;;  %7140 = vmatpush3.bf16.msra.mxu0 %v8214_v63  ;;  %v6926_v23 = vpop.f32.mrb[129].mxu0  ;;  %v7751_v42 = vadd.f32 %v6924_v22, %v9271_v36  ;;  %v3371_v31 = vld [vmem:[#allocation2 + $0x54] sm:$0xf] }
 0x207   : > { %v3102_v3 = vor.u32 %v3100_v7, %v3099_v2  ;;  %v3104_v58 = vrot.slane %v3099_v2, 4  ;;  %7141 = vmatprep.subr.bf16.mxu0 %v8217_v43  ;;  %v2885_v46 = vmax.f32 %v2853_v33, 0.0  ;;  %v9587_v28 = vsel %vm886_vm0, %v3747_v11, %v3751_v34  ;;  %v6928_v63 = vpop.f32.mrb[130].mxu0  ;;  %v8180_v43 = vld [vmem:[#allocation2 + $0x38] ss:$0 sps:$4 sm:$0x11]  }
 0x208   : > { %v3106_v44 = vshrl.u32 %v6516_v10, 16  ;;  %v3109_v16 = vshll.u32 %v6516_v10, 16  ;;  %v2854_v19 = vadd.f32 %v9358_v39, %v2815_v12  ;;  %4180 = vmatprep.mubr.bf16.mxu0 %v9587_v28  ;;  %7566 = vmatmul.mubr.bf16.vlgmr.msra.gmra.mrb[96].mxu1 %v9587_v28  ;;  %v6927_v8 = vadd.f32 %v6926_v23, %v6925_v6  ;;  %v6929_v36 = vpop.f32.mrb[131].mxu0  ;;  %v8197_v26 = vld [vmem:[%s10633_s2 + $0x90] sm:$0xff]  }
 0x209   : > { %v3103_v7 = vsel %vm9399_vm8, %v3095_v4, %v3102_v3  ;;  %v3369_v61 = vsel %vm9407_vm9, %v3104_v58, %v3368_v49  ;;  %v6517_v30 = vpack.c.bf16 %v2885_v46, %v2885_v46  ;;  %v7752_v13 = vadd.f32 %v7751_v42, %v9403_v35  ;;  %4181 = vmatmul.mubr.bf16.gmra.mrb[168].mxu0 %v9547_v48  ;;  %v8221_v35 = vld [vmem:[%s10633_s2 + $0x28] sm:$0xff]  }
 0x20a   : > { %v9597_v0 = vrot.slane %v3106_v44, 7  ;;  %3367 = vst [vmem:[#allocation2 + $0x4c] sm:$0xf] %v3103_v7  ;;  %3370 = vst [vmem:[#allocation2 + $0x50] sm:$0x1] %v3369_v61  ;;  %v2886_v38 = vmax.f32 %v2854_v19, 0.0  ;;  %7598 = vmatpush3.bf16.msra.mxu1 %v9364_v20  ;;  %v7763_v33 = vadd.f32 %v6927_v8, %v9283_v62  ;;  %7142 = vmatpush3.bf16.msra.mxu0 %v8219_v32 }
 0x20b   : > { %v3754_v4 = vshrl.u32 %v9577_v54, 16  ;;  %v3756_v22 = vshll.u32 %v9577_v54, 16  ;;  %7599 = vmatprep.subr.bf16.mxu1 %v8194_v53  ;;  %v3114_v48 = vshrl.u32 %v6517_v30, 16  ;;  %v3117_v20 = vshll.u32 %v6517_v30, 16  ;;  %7143 = vmatprep.subr.bf16.mxu0 %v8220_v1  ;;  %v8226_v62 = vld [vmem:[%s10633_s2 + $0x70] sm:$0xff]  }
 0x20c   : > { %v3111_v2 = vor.u32 %v3109_v16, %v9597_v0  ;;  %v3112_v10 = vrot.slane %v9597_v0, 4  ;;  %v6518_v49 = vpack.c.bf16 %v2886_v38, %v2886_v38  ;;  %v2816_v12 = vmul.f32 %v7752_v13, %v9350_v51  ;;  %v3375_v44 = vld [vmem:[#allocation2 + $0x5c] sm:$0x1]  ;;  %v3378_v19 = vld [vmem:[#allocation2 + $0x60] sm:$0xf]  ;;  %v8228_v13 = vld [vmem:[%s10633_s2 + $0x30] sm:$0xff]  }
 0x20d   : > { %v7764_v34 = vadd.f32 %v7763_v33, %v9429_v15  ;;  %v3758_v6 = vrot.slane %v3756_v22, 1  ;;  %v3761_v3 = vshll.u32 %v8180_v43, 16  ;;  %v3116_v58 = vrot.slane %v3114_v48, 7  ;;  %v6931_v46 = vpop.f32.mrb[132].mxu0  ;;  %v3452_v33 = vld [vmem:[#allocation2 + $0x40] sm:$0xf] }
 0x20e   : > { %v3372_v11 = vsel %vm9388_vm7, %v3111_v2, %v3371_v31  ;;  %v3123_v16 = vshrl.u32 %v6518_v49, 16  ;;  %v3126_v23 = vshll.u32 %v6518_v49, 16  ;;  %v2855_v32 = vadd.f32 %v9358_v39, %v2816_v12  ;;  %7600 = vmatpush3.bf16.msra.mxu1 %v8194_v53  ;;  %v6932_v0 = vpop.f32.mrb[133].mxu0  ;;  %v8182_v8 = vld [vmem:[#allocation2 + $0x44] ss:$0 sps:$4 sm:$0x11]   ;;  %7144 = vmatpush3.bf16.msra.mxu0 %v8221_v35 }
 0x20f   : > { %3373 = vst [vmem:[#allocation2 + $0x54] sm:$0xf] %v3372_v11  ;;  %v2817_v42 = vmul.f32 %v7764_v34, %v9350_v51  ;;  %v3759_v1 = vor.u32 %v3758_v6, %v3754_v4  ;;  %v3763_v7 = vrot.slane %v3761_v3, 1  ;;  %v6930_v61 = vadd.f32 %v6929_v36, %v6928_v63  ;;  %7601 = vmatprep.subr.bf16.mxu1 %v8197_v26  ;;  %v6934_v38 = vpop.f32.mrb[134].mxu0  ;;  %v8200_v53 = vld [vmem:[%s10633_s2 + $0x98] sm:$0xff]  }
 0x210   : > { %v3119_v15 = vor.u32 %v3117_v20, %v3116_v58  ;;  %v3121_v43 = vrot.slane %v3116_v58, 4  ;;  %v9624_v31 = vrot.slane %v3123_v16, 7  ;;  %v2887_v30 = vmax.f32 %v2855_v32, 0.0  ;;  %7145 = vmatprep.subr.bf16.mxu0 %v8226_v62  ;;  %v6935_v22 = vpop.f32.mrb[135].mxu0  ;;  %v8229_v35 = vld [vmem:[%s10633_s2 + $0x78] sm:$0xff]   ;;  %v8204_v16 = vld [vmem:[%s10633_s2 + $0xa0] sm:$0xff]  }
 0x211   : > { %v2856_v63 = vadd.f32 %v9358_v39, %v2817_v42  ;;  %v9634_v36 = vsel %vm886_vm0, %v3759_v1, %v3763_v7  ;;  %v7771_v4 = vadd.f32 %v6930_v61, %v9290_v18  ;;  %v6933_v2 = vadd.f32 %v6932_v0, %v6931_v46  ;;  %v3451_v34 = vld [vmem:[#allocation2 + $0x3c] sm:$0xf]  ;;  %v3382_v61 = vld [vmem:[#allocation2 + $0x68] sm:$0x1] }
 0x212   : > { %v3120_v48 = vsel %vm9399_vm8, %v3112_v10, %v3119_v15  ;;  %v3376_v20 = vsel %vm9407_vm9, %v3121_v43, %v3375_v44  ;;  %v3128_v49 = vor.u32 %v3126_v23, %v9624_v31  ;;  %v3129_v12 = vrot.slane %v9624_v31, 4  ;;  %4188 = vmatprep.mubr.bf16.mxu0 %v9634_v36  ;;  %7569 = vmatprep.mubr.bf16.mxu1 %v9634_v36 }
 0x213   : > { %3374 = vst [vmem:[#allocation2 + $0x58] sm:$0xf] %v3120_v48  ;;  %3377 = vst [vmem:[#allocation2 + $0x5c] sm:$0x1] %v3376_v20  ;;  %v6519_v18 = vpack.c.bf16 %v2887_v30, %v2887_v30  ;;  %v2888_v62 = vmax.f32 %v2856_v63, 0.0  ;;  %v7772_v11 = vadd.f32 %v7771_v4, %v9438_v25  ;;  %4189 = vmatmul.mubr.bf16.gmra.mrb[172].mxu0 %v9587_v28  ;;  %7602 = vmatpush3.bf16.msra.mxu1 %v8197_v26  ;;  %v8230_v25 = vld [vmem:[%s10633_s2 + $0x38] sm:$0xff]  }
 0x214   : > { %v7759_v10 = vadd.f32 %v6933_v2, %v9279_v27  ;;  %v3379_v6 = vsel %vm9388_vm7, %v3128_v49, %v3378_v19  ;;  %v9653_v3 = vcombine.low %v3451_v34, %v3452_v33  ;;  %v3773_v58 = vshll.u32 %v8182_v8, 16  ;;  %7603 = vmatprep.subr.bf16.mxu1 %v8200_v53  ;;  %7146 = vmatpush3.bf16.msra.mxu0 %v8228_v13  ;;  %v8184_v63 = vld [vmem:[#allocation2 + $0x50] ss:$0 sps:$4 sm:$0x11]   ;;  %v8211_v4 = vld [vmem:[%s10633_s2 + $0xa8] sm:$0xff]  }
 0x215   : > { %v6936_v44 = vadd.f32 %v6935_v22, %v6934_v38  ;;  %3380 = vst [vmem:[#allocation2 + $0x60] sm:$0xf] %v3379_v6  ;;  %v3131_v27 = vshrl.u32 %v6519_v18, 16  ;;  %v3134_v28 = vshll.u32 %v6519_v18, 16  ;;  %v6520_v26 = vpack.c.bf16 %v2888_v62, %v2888_v62  ;;  %7147 = vmatprep.subr.bf16.mxu0 %v8229_v35  ;;  %v6937_v1 = vpop.f32.mrb[136].mxu0 }
 0x216   : > { %v2818_v23 = vmul.f32 %v7772_v11, %v9350_v51  ;;  %v7760_v32 = vadd.f32 %v7759_v10, %v9425_v47  ;;  %v3766_v46 = vshrl.u32 %v9653_v3, 16  ;;  %v3768_v19 = vshll.u32 %v9653_v3, 16  ;;  %v6938_v43 = vpop.f32.mrb[137].mxu0  ;;  %v3385_v48 = vld [vmem:[#allocation2 + $0x6c] sm:$0xf] }
 0x217   : > { %v3775_v42 = vrot.slane %v3773_v58, 1  ;;  %v3133_v7 = vrot.slane %v3131_v27, 7  ;;  %v3140_v0 = vshrl.u32 %v6520_v26, 16  ;;  %v3143_v8 = vshll.u32 %v6520_v26, 16  ;;  %7604 = vmatpush3.bf16.msra.mxu1 %v8200_v53  ;;  %v6940_v13 = vpop.f32.mrb[138].mxu0 }
 0x218   : > { %v2857_v15 = vadd.f32 %v9358_v39, %v2818_v23  ;;  %v2819_v31 = vmul.f32 %v7760_v32, %v9350_v51  ;;  %v3770_v30 = vrot.slane %v3768_v19, 1  ;;  %v7767_v38 = vadd.f32 %v6936_v44, %v9287_v40  ;;  %7605 = vmatprep.subr.bf16.mxu1 %v8204_v16  ;;  %7148 = vmatpush3.bf16.msra.mxu0 %v8230_v25  ;;  %v6941_v53 = vpop.f32.mrb[139].mxu0  ;;  %v3454_v62 = vld [vmem:[#allocation2 + $0x4c] sm:$0xf]  ;;  %v3453_v25 = vld [vmem:[#allocation2 + $0x48] sm:$0xf] }
 0x219   : > { %v6939_v47 = vadd.f32 %v6938_v43, %v6937_v1  ;;  %v3136_v2 = vor.u32 %v3134_v28, %v3133_v7  ;;  %v3138_v33 = vrot.slane %v3133_v7, 4  ;;  %v9671_v22 = vrot.slane %v3140_v0, 7 }
 0x21a   : > { %v2889_v35 = vmax.f32 %v2857_v15, 0.0  ;;  %v2858_v20 = vadd.f32 %v9358_v39, %v2819_v31  ;;  %v3771_v49 = vor.u32 %v3770_v30, %v3766_v46  ;;  %v7768_v40 = vadd.f32 %v7767_v38, %v9432_v52 }
 0x21b   : > { %v7779_v18 = vadd.f32 %v6939_v47, %v9299_v59  ;;  %v3137_v11 = vsel %vm9399_vm8, %v3129_v12, %v3136_v2  ;;  %v3383_v10 = vsel %vm9407_vm9, %v3138_v33, %v3382_v61  ;;  %v3145_v34 = vor.u32 %v3143_v8, %v9671_v22  ;;  %7606 = vmatpush3.bf16.msra.mxu1 %v8204_v16  ;;  %v8218_v12 = vld [vmem:[%s10633_s2 + $0xb0] sm:$0xff]  }
 0x21c   : > { %v3146_v6 = vrot.slane %v9671_v22, 4  ;;  %3381 = vst [vmem:[#allocation2 + $0x64] sm:$0xf] %v3137_v11  ;;  %3384 = vst [vmem:[#allocation2 + $0x68] sm:$0x1] %v3383_v10  ;;  %v6521_v58 = vpack.c.bf16 %v2889_v35, %v2889_v35  ;;  %v2890_v44 = vmax.f32 %v2858_v20, 0.0  ;;  %v9683_v52 = vsel %vm886_vm0, %v3771_v49, %v3775_v42  ;;  %7607 = vmatprep.subr.bf16.mxu1 %v8211_v4 }
 0x21d   : > { %v2820_v59 = vmul.f32 %v7768_v40, %v9350_v51  ;;  %v3386_v27 = vsel %vm9388_vm7, %v3145_v34, %v3385_v48  ;;  %4196 = vmatprep.mubr.bf16.mxu0 %v9683_v52  ;;  %7570 = vmatmul.mubr.bf16.gmra.mrb[100].mxu1 %v9683_v52  ;;  %v7780_v16 = vadd.f32 %v7779_v18, %v9459_v45  ;;  %v3785_v26 = vshll.u32 %v8184_v63, 16  ;;  %v6943_v42 = vpop.f32.mrb[140].mxu0  ;;  %v8186_v20 = vld [vmem:[#allocation2 + $0x5c] ss:$0 sps:$4 sm:$0x11]  }
 0x21e   : > { %v9694_v28 = vcombine.low %v3453_v25, %v3454_v62  ;;  %3387 = vst [vmem:[#allocation2 + $0x6c] sm:$0xf] %v3386_v27  ;;  %v3148_v23 = vshrl.u32 %v6521_v58, 16  ;;  %v3151_v32 = vshll.u32 %v6521_v58, 16  ;;  %v6522_v46 = vpack.c.bf16 %v2890_v44, %v2890_v44  ;;  %4197 = vmatmul.mubr.bf16.gmra.mrb[176].mxu0 %v9634_v36  ;;  %v6944_v45 = vpop.f32.mrb[141].mxu0  ;;  %v8231_v44 = vld [vmem:[%s10633_s2 + $0x1c0] sm:$0xff]  }
 0x21f   : > { %v2859_v19 = vadd.f32 %v9358_v39, %v2820_v59  ;;  %v2821_v1 = vmul.f32 %v7780_v16, %v9350_v51  ;;  %v3787_v0 = vrot.slane %v3785_v26, 1  ;;  %7608 = vmatpush3.bf16.msra.mxu1 %v8211_v4  ;;  %v6946_v30 = vpop.f32.mrb[142].mxu0  ;;  %v8227_v39 = vld [vmem:[%s10633_s2 + $0xb8] sm:$0xff]   ;;  %v3389_v36 = vld [vmem:[#allocation2 + $0x74] sm:$0x1]  ;;  %v6942_v63 = vadd.f32 %v6941_v53, %v6940_v13 }
 0x220   : > { %v3778_v7 = vshrl.u32 %v9694_v28, 16  ;;  %v3780_v61 = vshll.u32 %v9694_v28, 16  ;;  %v3150_v8 = vrot.slane %v3148_v23, 7  ;;  %v3157_v15 = vshrl.u32 %v6522_v46, 16  ;;  %7609 = vmatprep.subr.bf16.mxu1 %v8218_v12  ;;  %v9707_v51 = vld [vmem:[%s10635_s4] ss:$0 sm:$0xff] }
 0x221   : > { %v3160_v43 = vshll.u32 %v6522_v46, 16  ;;  %v2891_v31 = vmax.f32 %v2859_v19, 0.0  ;;  %v2860_v38 = vadd.f32 %v9707_v51, %v2821_v1  ;;  %v6945_v4 = vadd.f32 %v6944_v45, %v6943_v42  ;;  %v6947_v2 = vpop.f32.mrb[143].mxu0  ;;  %v3392_v49 = vld [vmem:[#allocation2 + $0x78] sm:$0xf] }
 0x222   : > { %v3782_v47 = vrot.slane %v3780_v61, 1  ;;  %v3153_v33 = vor.u32 %v3151_v32, %v3150_v8  ;;  %v3155_v22 = vrot.slane %v3150_v8, 4  ;;  %v3159_v35 = vrot.slane %v3157_v15, 7  ;;  %v3456_v58 = vld [vmem:[#allocation2 + $0x58] sm:$0xf] }
 0x223   : > { %v6523_v48 = vpack.c.bf16 %v2891_v31, %v2891_v31  ;;  %v2892_v40 = vmax.f32 %v2860_v38, 0.0  ;;  %v7787_v62 = vadd.f32 %v6942_v63, %v9306_v55  ;;  %v7775_v11 = vadd.f32 %v6945_v4, %v9295_v9  ;;  %7610 = vmatpush3.bf16.msra.mxu1 %v8218_v12  ;;  %v3455_v16 = vld [vmem:[#allocation2 + $0x54] sm:$0xf]  ;;  %v3396_v46 = vld [vmem:[#allocation2 + $0x80] sm:$0x1] }
 0x224   : > { %v3783_v18 = vor.u32 %v3782_v47, %v3778_v7  ;;  %v3154_v10 = vsel %vm9399_vm8, %v3146_v6, %v3153_v33  ;;  %v3390_v13 = vsel %vm9407_vm9, %v3155_v22, %v3389_v36  ;;  %v3162_v53 = vor.u32 %v3160_v43, %v3159_v35  ;;  %7611 = vmatprep.subr.bf16.mxu1 %v8227_v39  ;;  %v9738_v15 = vld [vmem:[#allocation2 + $0x68] ss:$0 sps:$4 sm:$0x11]   ;;  %v3399_v38 = vld [vmem:[#allocation2 + $0x84] sm:$0xf] }
 0x225   : > { %v3163_v34 = vrot.slane %v3159_v35, 4  ;;  %3388 = vst [vmem:[#allocation2 + $0x70] sm:$0xf] %v3154_v10  ;;  %3391 = vst [vmem:[#allocation2 + $0x74] sm:$0x1] %v3390_v13  ;;  %v3165_v55 = vshrl.u32 %v6523_v48, 16  ;;  %v6524_v9 = vpack.c.bf16 %v2892_v40, %v2892_v40  ;;  %v7788_v12 = vadd.f32 %v7787_v62, %v9468_v56 }
 0x226   : > { %v3168_v59 = vshll.u32 %v6523_v48, 16  ;;  %v9720_v25 = vsel %vm886_vm0, %v3783_v18, %v3787_v0  ;;  %v3393_v6 = vsel %vm9388_vm7, %v3162_v53, %v3392_v49  ;;  %v7776_v27 = vadd.f32 %v7775_v11, %v9457_v14  ;;  %v6949_v23 = vpop.f32.mrb[144].mxu0  ;;  %v9734_v56 = vld [vmem:[%s10634_s3] ss:$0 sm:$0xff] }
 0x227   : > { %4204 = vmatprep.mubr.bf16.mxu0 %v9720_v25  ;;  %7573 = vmatprep.mubr.bf16.mxu1 %v9720_v25  ;;  %v3797_v26 = vshll.u32 %v8186_v20, 16  ;;  %3394 = vst [vmem:[#allocation2 + $0x78] sm:$0xf] %v3393_v6  ;;  %v3167_v32 = vrot.slane %v3165_v55, 7  ;;  %v3174_v19 = vshrl.u32 %v6524_v9, 16  ;;  %v3177_v42 = vshll.u32 %v6524_v9, 16 }
 0x228   : > { %4205 = vmatmul.mubr.bf16.gmra.mrb[180].mxu0 %v9683_v52  ;;  %v9729_v1 = vcombine.low %v3455_v16, %v3456_v58  ;;  %v6950_v7 = vpop.f32.mrb[145].mxu0  ;;  %7612 = vmatpush3.bf16.msra.mxu1 %v8227_v39  ;;  %v2822_v14 = vmul.f32 %v9734_v56, %v7788_v12  ;;  %v2823_v61 = vmul.f32 %v9734_v56, %v7776_v27  ;;  %v3809_v13 = vshll.u32 %v9738_v15, 16 }
 0x229   : > { %v3799_v0 = vrot.slane %v3797_v26, 1  ;;  %v6948_v45 = vadd.f32 %v6947_v2, %v6946_v30  ;;  %v6952_v8 = vpop.f32.mrb[146].mxu0  ;;  %7269 = vmatprep.subr.bf16.mxu1 %v8231_v44  ;;  %v3170_v52 = vor.u32 %v3168_v59, %v3167_v32  ;;  %v3172_v43 = vrot.slane %v3167_v32, 4  ;;  %v9747_v2 = vld [vmem:[#allocation2 + $0x64] sm:$0xf]  ;;  %v10689_v59 = vld [vmem:[#allocation3_spill] sm:$0xff] }
 0x22a   : > { %v9740_v31 = vrot.slane %v3174_v19, 7  ;;  %v3790_v39 = vshrl.u32 %v9729_v1, 16  ;;  %v6953_v36 = vpop.f32.mrb[147].mxu0  ;;  %v2861_v47 = vadd.f32 %v9707_v51, %v2822_v14  ;;  %v2862_v63 = vadd.f32 %v9707_v51, %v2823_v61 }
 0x22b   : > { %v3792_v4 = vshll.u32 %v9729_v1, 16  ;;  %v7783_v30 = vadd.f32 %v6948_v45, %v9303_v50  ;;  %v3171_v33 = vsel %vm9399_vm8, %v3163_v34, %v3170_v52  ;;  %v3397_v22 = vsel %vm9407_vm9, %v3172_v43, %v3396_v46  ;;  %v3457_v50 = vld [vmem:[#allocation2 + $0x60] sm:$0xf]  ;;  %v3403_v43 = vld [vmem:[#allocation2 + $0x8c] sm:$0x1] }
 0x22c   : > { %v3179_v35 = vor.u32 %v3177_v42, %v9740_v31  ;;  %v3180_v48 = vrot.slane %v9740_v31, 4  ;;  %3395 = vst [vmem:[#allocation2 + $0x7c] sm:$0xf] %v3171_v33  ;;  %3398 = vst [vmem:[#allocation2 + $0x80] sm:$0x1] %v3397_v22  ;;  %v2893_v20 = vmax.f32 %v2861_v47, 0.0  ;;  %v6951_v11 = vadd.f32 %v6950_v7, %v6949_v23 }
 0x22d   : > { %v2894_v49 = vmax.f32 %v2862_v63, 0.0  ;;  %v3794_v40 = vrot.slane %v3792_v4, 1  ;;  %v7784_v18 = vadd.f32 %v7783_v30, %v9465_v37  ;;  %v9759_v10 = vcombine.low %v3457_v50, %v9747_v2  ;;  %v6955_v55 = vpop.f32.mrb[148].mxu0  ;;  %v9766_v16 = vld [vmem:[#allocation2 + $0x70] sm:$0xf] }
 0x22e   : > { %v3400_v62 = vsel %vm9388_vm7, %v3179_v35, %v3399_v38  ;;  %v6525_v53 = vpack.c.bf16 %v2893_v20, %v2893_v20  ;;  %v7795_v9 = vadd.f32 %v6951_v11, %v10689_v59  ;;  %v3811_v12 = vrot.slane %v3809_v13, 1  ;;  %v6956_v27 = vpop.f32.mrb[149].mxu0  ;;  %v3459_v47 = vld [vmem:[#allocation2 + $0x6c] sm:$0xf]  ;;  %v3406_v63 = vld [vmem:[#allocation2 + $0x90] sm:$0xf] }
 0x22f   : > { %3401 = vst [vmem:[#allocation2 + $0x84] sm:$0xf] %v3400_v62  ;;  %v6526_v34 = vpack.c.bf16 %v2894_v49, %v2894_v49  ;;  %v3795_v58 = vor.u32 %v3794_v40, %v3790_v39  ;;  %v2824_v44 = vmul.f32 %v9734_v56, %v7784_v18  ;;  %v3802_v37 = vshrl.u32 %v9759_v10, 16  ;;  %v6958_v19 = vpop.f32.mrb[150].mxu0  ;;  %v10691_v59 = vld [vmem:[#allocation4_spill] sm:$0xff] }
 0x230   : > { %v3804_v6 = vshll.u32 %v9759_v10, 16  ;;  %v3182_v26 = vshrl.u32 %v6525_v53, 16  ;;  %v3185_v23 = vshll.u32 %v6525_v53, 16  ;;  %v7796_v14 = vadd.f32 %v7795_v9, %v9486_v41  ;;  %v6959_v45 = vpop.f32.mrb[151].mxu0 }
 0x231   : > { %v3191_v32 = vshrl.u32 %v6526_v34, 16  ;;  %v3194_v46 = vshll.u32 %v6526_v34, 16  ;;  %v3800_v42 = vsel %vm886_vm0, %v3795_v58, %v3799_v0  ;;  %v2863_v7 = vadd.f32 %v9707_v51, %v2824_v44  ;;  %v9780_v49 = vld [vmem:[#allocation2 + $0x74] ss:$0 sps:$4 sm:$0x11]  }
 0x232   : > { %v3806_v61 = vrot.slane %v3804_v6, 1  ;;  %v3184_v52 = vrot.slane %v3182_v26, 7  ;;  %4212 = vmatprep.mubr.bf16.mxu0 %v3800_v42  ;;  %7574 = vmatmul.mubr.bf16.gmra.mrb[104].mxu1 %v3800_v42  ;;  %v6954_v39 = vadd.f32 %v6953_v36, %v6952_v8  ;;  %v6957_v38 = vadd.f32 %v6956_v27, %v6955_v55 }
 0x233   : > { %v9771_v31 = vrot.slane %v3191_v32, 7  ;;  %v2895_v4 = vmax.f32 %v2863_v7, 0.0  ;;  %4213 = vmatmul.mubr.bf16.gmra.mrb[184].mxu0 %v9720_v25  ;;  %v2825_v0 = vmul.f32 %v9734_v56, %v7796_v14  ;;  %v9776_v41 = vcombine.low %v3459_v47, %v9766_v16  ;;  %v10690_v25 = vld [vmem:[#allocation8_spill] sm:$0xff]  ;;  %v3410_v14 = vld [vmem:[#allocation2 + $0x98] sm:$0x1] }
 0x234   : > { %v3807_v30 = vor.u32 %v3806_v61, %v3802_v37  ;;  %v3187_v33 = vor.u32 %v3185_v23, %v3184_v52  ;;  %v3189_v22 = vrot.slane %v3184_v52, 4  ;;  %v7803_v18 = vadd.f32 %v6954_v39, %v10690_v25  ;;  %v10692_v61 = vld [vmem:[#allocation14_spill] sm:$0xff]  ;;  %v3413_v25 = vld [vmem:[#allocation2 + $0x9c] sm:$0xf] }
 0x235   : > { %v3196_v35 = vor.u32 %v3194_v46, %v9771_v31  ;;  %v3197_v20 = vrot.slane %v9771_v31, 4  ;;  %v6527_v8 = vpack.c.bf16 %v2895_v4, %v2895_v4  ;;  %v2864_v36 = vadd.f32 %v9707_v51, %v2825_v0  ;;  %v6961_v53 = vpop.f32.mrb[152].mxu0  ;;  %v10693_v31 = vld [vmem:[#allocation7_spill] sm:$0xff] }
 0x236   : > { %v9784_v40 = vsel %vm886_vm0, %v3807_v30, %v3811_v12  ;;  %v3188_v50 = vsel %vm9399_vm8, %v3180_v48, %v3187_v33  ;;  %v3404_v62 = vsel %vm9407_vm9, %v3189_v22, %v3403_v43  ;;  %v3814_v13 = vshrl.u32 %v9776_v41, 16  ;;  %v6962_v55 = vpop.f32.mrb[153].mxu0  ;;  %v9806_v33 = vld [vmem:[#allocation2 + $0x7c] sm:$0xf] }
 0x237   : > { %v3407_v11 = vsel %vm9388_vm7, %v3196_v35, %v3406_v63  ;;  %4220 = vmatprep.mubr.bf16.mxu0 %v9784_v40  ;;  %7577 = vmatprep.mubr.bf16.mxu1 %v9784_v40  ;;  %3402 = vst [vmem:[#allocation2 + $0x88] sm:$0xf] %v3188_v50  ;;  %3405 = vst [vmem:[#allocation2 + $0x8c] sm:$0x1] %v3404_v62  ;;  %v3199_v34 = vshrl.u32 %v6527_v8, 16  ;;  %v3202_v58 = vshll.u32 %v6527_v8, 16 }
 0x238   : > { %3408 = vst [vmem:[#allocation2 + $0x90] sm:$0xf] %v3407_v11  ;;  %v2896_v44 = vmax.f32 %v2864_v36, 0.0  ;;  %v7804_v48 = vadd.f32 %v7803_v18, %v9492_v5  ;;  %v7791_v9 = vadd.f32 %v6957_v38, %v10691_v59  ;;  %v3816_v37 = vshll.u32 %v9776_v41, 16  ;;  %v6964_v27 = vpop.f32.mrb[154].mxu0 }
 0x239   : > { %v3821_v6 = vshll.u32 %v9780_v49, 16  ;;  %v6960_v12 = vadd.f32 %v6959_v45, %v6958_v19  ;;  %v3201_v26 = vrot.slane %v3199_v34, 7  ;;  %v6963_v46 = vadd.f32 %v6962_v55, %v6961_v53  ;;  %v6965_v7 = vpop.f32.mrb[155].mxu0  ;;  %v9808_v22 = vld [vmem:[#allocation2 + $0x80] ss:$0 sps:$4 sm:$0x11]  }
 0x23a   : > { %v6528_v23 = vpack.c.bf16 %v2896_v44, %v2896_v44  ;;  %v2826_v32 = vmul.f32 %v9734_v56, %v7804_v48  ;;  %v7792_v52 = vadd.f32 %v7791_v9, %v10692_v61  ;;  %v3818_v43 = vrot.slane %v3816_v37, 1 }
 0x23b   : > { %v3823_v5 = vrot.slane %v3821_v6, 1  ;;  %v7799_v39 = vadd.f32 %v6960_v12, %v10693_v31  ;;  %v3204_v38 = vor.u32 %v3202_v58, %v3201_v26  ;;  %v3206_v47 = vrot.slane %v3201_v26, 4  ;;  %4221 = vmatmul.mubr.bf16.gmra.mrb[188].mxu0 %v3800_v42  ;;  %v10694_v42 = vld [vmem:[#allocation9_spill] sm:$0xff]  ;;  %v10695_v58 = vld [vmem:[#allocation16_spill] sm:$0xff] }
 0x23c   : > { %v3208_v63 = vshrl.u32 %v6528_v23, 16  ;;  %v3211_v4 = vshll.u32 %v6528_v23, 16  ;;  %v2865_v19 = vadd.f32 %v9707_v51, %v2826_v32  ;;  %v2827_v45 = vmul.f32 %v9734_v56, %v7792_v52 }
 0x23d   : > { %v3819_v0 = vor.u32 %v3818_v43, %v3814_v13  ;;  %v7800_v30 = vadd.f32 %v7799_v39, %v9489_v21  ;;  %v3205_v35 = vsel %vm9399_vm8, %v3197_v20, %v3204_v38  ;;  %v3411_v8 = vsel %vm9407_vm9, %v3206_v47, %v3410_v14  ;;  %v3461_v13 = vld [vmem:[#allocation2 + $0x78] sm:$0xf]  ;;  %v6967_v53 = vpop.f32.mrb[156].mxu0 }
 0x23e   : > { %v3210_v36 = vrot.slane %v3208_v63, 7  ;;  %v7811_v18 = vadd.f32 %v6963_v46, %v10694_v42  ;;  %3409 = vst [vmem:[#allocation2 + $0x94] sm:$0xf] %v3205_v35  ;;  %3412 = vst [vmem:[#allocation2 + $0x98] sm:$0x1] %v3411_v8  ;;  %v2897_v50 = vmax.f32 %v2865_v19, 0.0  ;;  %v2866_v62 = vadd.f32 %v9707_v51, %v2827_v45 }
 0x23f   : > { %v9817_v21 = vsel %vm886_vm0, %v3819_v0, %v3823_v5  ;;  %v2828_v11 = vmul.f32 %v9734_v56, %v7800_v30  ;;  %v9824_v48 = vcombine.low %v3461_v13, %v9806_v33  ;;  %v6968_v55 = vpop.f32.mrb[157].mxu0  ;;  %v3833_v6 = vshll.u32 %v9808_v22, 16  ;;  %v3417_v0 = vld [vmem:[#allocation2 + $0xa4] sm:$0x1]  ;;  %v10696_v8 = vld [vmem:[#allocation6_spill] sm:$0xff] }
 0x240   : > { %v3213_v20 = vor.u32 %v3211_v4, %v3210_v36  ;;  %v3214_v34 = vrot.slane %v3210_v36, 4  ;;  %4228 = vmatprep.mubr.bf16.mxu0 %v9817_v21  ;;  %7578 = vmatmul.mubr.bf16.gmra.mrb[108].mxu1 %v9817_v21  ;;  %v7812_v44 = vadd.f32 %v7811_v18, %v10695_v58  ;;  %v6529_v59 = vpack.c.bf16 %v2897_v50, %v2897_v50  ;;  %v9828_v12 = vpop.f32.mrb[158].mxu0  ;;  %v9846_v58 = vld [vmem:[#allocation2 + $0x88] sm:$0xf] }
 0x241   : > { %v2898_v9 = vmax.f32 %v2866_v62, 0.0  ;;  %v2867_v37 = vadd.f32 %v9707_v51, %v2828_v11  ;;  %v3826_v32 = vshrl.u32 %v9824_v48, 16  ;;  %v3828_v46 = vshll.u32 %v9824_v48, 16  ;;  %v9835_v14 = vpop.f32.mrb[159].mxu0  ;;  %v3420_v11 = vld [vmem:[#allocation2 + $0xa8] sm:$0xf] }
 0x242   : > { %v3414_v26 = vsel %vm9388_vm7, %v3213_v20, %v3413_v25  ;;  %v2829_v23 = vmul.f32 %v9734_v56, %v7812_v44  ;;  %v3216_v61 = vshrl.u32 %v6529_v59, 16  ;;  %v3219_v52 = vshll.u32 %v6529_v59, 16 }
 0x243   : > { %3415 = vst [vmem:[#allocation2 + $0x9c] sm:$0xf] %v3414_v26  ;;  %v6530_v43 = vpack.c.bf16 %v2898_v9, %v2898_v9  ;;  %v2899_v5 = vmax.f32 %v2867_v37, 0.0  ;;  %4229 = vmatmul.mubr.bf16.gmra.mrb[192].mxu0 %v9784_v40  ;;  %v3830_v39 = vrot.slane %v3828_v46, 1  ;;  %v3835_v38 = vrot.slane %v3833_v6, 1 }
 0x244   : > { %v2868_v31 = vadd.f32 %v9707_v51, %v2829_v23  ;;  %v6966_v47 = vadd.f32 %v6965_v7, %v6964_v27  ;;  %v3218_v63 = vrot.slane %v3216_v61, 7  ;;  %v6969_v25 = vadd.f32 %v6968_v55, %v6967_v53  ;;  %v9840_v40 = vld [vmem:[#allocation2 + $0x8c] ss:$0 sps:$4 sm:$0x11]   ;;  %v3463_v26 = vld [vmem:[#allocation2 + $0x84] sm:$0xf] }
 0x245   : > { %v3225_v4 = vshrl.u32 %v6530_v43, 16  ;;  %v3228_v19 = vshll.u32 %v6530_v43, 16  ;;  %v6531_v45 = vpack.c.bf16 %v2899_v5, %v2899_v5  ;;  %v3831_v35 = vor.u32 %v3830_v39, %v3826_v32  ;;  %v3424_v23 = vld [vmem:[#allocation2 + $0xb0] sm:$0x1]  ;;  %v10697_v32 = vld [vmem:[#allocation5_spill] sm:$0xff] }
 0x246   : > { %v2900_v30 = vmax.f32 %v2868_v31, 0.0  ;;  %v7819_v36 = vadd.f32 %v6966_v47, %v10696_v8  ;;  %v3221_v42 = vor.u32 %v3219_v52, %v3218_v63  ;;  %v3223_v18 = vrot.slane %v3218_v63, 4  ;;  %v3427_v47 = vld [vmem:[#allocation2 + $0xb4] sm:$0xf]  ;;  %v10698_v63 = vld [vmem:[#allocation15_spill] sm:$0xff] }
 0x247   : > { %v3227_v50 = vrot.slane %v3225_v4, 7  ;;  %v3233_v62 = vshrl.u32 %v6531_v45, 16  ;;  %v3236_v13 = vshll.u32 %v6531_v45, 16  ;;  %v9843_v27 = vsel %vm886_vm0, %v3831_v35, %v3835_v38  ;;  %v9866_v38 = vld [vmem:[#allocation2 + $0x98] ss:$0 sps:$4 sm:$0x11]  }
 0x248   : > { %v6532_v20 = vpack.c.bf16 %v2900_v30, %v2900_v30  ;;  %v7820_v7 = vadd.f32 %v7819_v36, %v9536_v60  ;;  %v3222_v44 = vsel %vm9399_vm8, %v3214_v34, %v3221_v42  ;;  %v3418_v53 = vsel %vm9407_vm9, %v3223_v18, %v3417_v0  ;;  %4236 = vmatprep.mubr.bf16.mxu0 %v9843_v27  ;;  %v9870_v45 = vld [vmem:[#allocation2 + $0x94] sm:$0xf]  ;;  %v3465_v18 = vld [vmem:[#allocation2 + $0x90] sm:$0xf] }
 0x249   : > { %v3230_v55 = vor.u32 %v3228_v19, %v3227_v50  ;;  %v3231_v59 = vrot.slane %v3227_v50, 4  ;;  %7581 = vmatprep.mubr.bf16.mxu1 %v9843_v27  ;;  %3416 = vst [vmem:[#allocation2 + $0xa0] sm:$0xf] %v3222_v44  ;;  %3419 = vst [vmem:[#allocation2 + $0xa4] sm:$0x1] %v3418_v53  ;;  %v3235_v9 = vrot.slane %v3233_v62, 7  ;;  %v7807_v46 = vadd.f32 %v6969_v25, %v10697_v32 }
 0x24a   : > { %v3242_v37 = vshrl.u32 %v6532_v20, 16  ;;  %v3245_v6 = vshll.u32 %v6532_v20, 16  ;;  %v2830_v60 = vmul.f32 %v9734_v56, %v7820_v7  ;;  %v9859_v61 = vcombine.low %v3463_v26, %v9846_v58  ;;  %v10699_v53 = vld [vmem:[#allocation10_spill] sm:$0xff]  ;;  %v10700_v32 = vld [vmem:[#allocation17_spill] sm:$0xff] }
 0x24b   : > { %v3421_v34 = vsel %vm9388_vm7, %v3230_v55, %v3420_v11  ;;  %v3845_v52 = vshll.u32 %v9840_v40, 16  ;;  %v3238_v43 = vor.u32 %v3236_v13, %v3235_v9  ;;  %v3240_v5 = vrot.slane %v3235_v9, 4  ;;  %4237 = vmatmul.mubr.bf16.gmra.mrb[196].mxu0 %v9817_v21 }
 0x24c   : > { %3422 = vst [vmem:[#allocation2 + $0xa8] sm:$0xf] %v3421_v34  ;;  %v9862_v31 = vrot.slane %v3242_v37, 7  ;;  %v2869_v39 = vadd.f32 %v9707_v51, %v2830_v60  ;;  %v7808_v4 = vadd.f32 %v7807_v46, %v10698_v63  ;;  %v3840_v19 = vshll.u32 %v9859_v61, 16 }
 0x24d   : > { %v3239_v0 = vsel %vm9399_vm8, %v3231_v59, %v3238_v43  ;;  %v3425_v30 = vsel %vm9407_vm9, %v3240_v5, %v3424_v23  ;;  %v3838_v8 = vshrl.u32 %v9859_v61, 16  ;;  %v6972_v42 = vadd.f32 %v9835_v14, %v9828_v12  ;;  %v3467_v59 = vld [vmem:[#allocation2 + $0x9c] sm:$0xf] }
 0x24e   : > { %v3247_v35 = vor.u32 %v3245_v6, %v9862_v31  ;;  %3423 = vst [vmem:[#allocation2 + $0xac] sm:$0xf] %v3239_v0  ;;  %3426 = vst [vmem:[#allocation2 + $0xb0] sm:$0x1] %v3425_v30  ;;  %v2901_v21 = vmax.f32 %v2869_v39, 0.0  ;;  %v2831_v36 = vmul.f32 %v9734_v56, %v7808_v4  ;;  %v3842_v25 = vrot.slane %v3840_v19, 1 }
 0x24f   : > { %v3847_v62 = vrot.slane %v3845_v52, 1  ;;  %v9884_v11 = vcombine.low %v3465_v18, %v9870_v45  ;;  %v3857_v13 = vshll.u32 %v9866_v38, 16  ;;  %v7815_v55 = vadd.f32 %v6972_v42, %v10699_v53 }
 0x250   : > { %v3428_v50 = vsel %vm9388_vm7, %v3247_v35, %v3427_v47  ;;  %v6533_v20 = vpack.c.bf16 %v2901_v21, %v2901_v21  ;;  %v2870_v7 = vadd.f32 %v9707_v51, %v2831_v36  ;;  %v3843_v44 = vor.u32 %v3842_v25, %v3838_v8  ;;  %v9889_v9 = vld [vmem:[#allocation2 + $0xa0] sm:$0xf]  ;;  %v9896_v6 = vld [vmem:[#allocation2 + $0xa4] ss:$0 sps:$4 sm:$0x11]  }
 0x251   : > { %3429 = vst [vmem:[#allocation2 + $0xb4] sm:$0xf] %v3428_v50  ;;  %v3248_v12 = vrot.slane %v9862_v31, 4  ;;  %v3852_v14 = vshll.u32 %v9884_v11, 16  ;;  %v9894_v37 = vcombine.low %v3467_v59, %v9889_v9  ;;  %v3850_v23 = vshrl.u32 %v9884_v11, 16 }
 0x252   : > { %v3250_v60 = vshrl.u32 %v6533_v20, 16  ;;  %v2902_v26 = vmax.f32 %v2870_v7, 0.0  ;;  %v3848_v34 = vsel %vm886_vm0, %v3843_v44, %v3847_v62  ;;  %v7816_v46 = vadd.f32 %v7815_v55, %v10700_v32  ;;  %v3431_v47 = vld [vmem:[#allocation2 + $0xbc] sm:$0x1]  ;;  %v3475_v55 = vld [vmem:[#allocation2 + $0xcc] sm:$0xf] }
 0x253   : > { %4244 = vmatprep.mubr.bf16.mxu0 %v3848_v34  ;;  %7582 = vmatmul.mubr.bf16.gmra.mrb[112].mxu1 %v3848_v34  ;;  %v3854_v52 = vrot.slane %v3852_v14, 1  ;;  %v3859_v43 = vrot.slane %v3857_v13, 1  ;;  %v3864_v5 = vshll.u32 %v9894_v37, 16  ;;  %v3253_v39 = vshll.u32 %v6533_v20, 16  ;;  %v3469_v20 = vld [vmem:[#allocation2 + $0xa8] sm:$0xf] }
 0x254   : > { %v3252_v31 = vrot.slane %v3250_v60, 7  ;;  %v6534_v63 = vpack.c.bf16 %v2902_v26, %v2902_v26  ;;  %4245 = vmatmul.mubr.bf16.gmra.mrb[200].mxu0 %v9843_v27  ;;  %v3869_v4 = vshll.u32 %v9896_v6, 16  ;;  %v2832_v19 = vmul.f32 %v9734_v56, %v7816_v46  ;;  %v9919_v59 = vld [vmem:[#allocation2 + $0xd0] sm:$0xf] }
 0x255   : > { %v3855_v0 = vor.u32 %v3854_v52, %v3850_v23  ;;  %v3862_v30 = vshrl.u32 %v9894_v37, 16  ;;  %v3866_v35 = vrot.slane %v3864_v5, 1  ;;  %v9906_v8 = vld [vmem:[#allocation2 + $0xac] sm:$0xf]  ;;  %v9928_v46 = vcombine.low %v3475_v55, %v9919_v59 }
 0x256   : > { %v3255_v21 = vor.u32 %v3253_v39, %v3252_v31  ;;  %v3257_v36 = vrot.slane %v3252_v31, 4  ;;  %v3259_v25 = vshrl.u32 %v6534_v63, 16  ;;  %v3262_v42 = vshll.u32 %v6534_v63, 16  ;;  %v9908_v18 = vld [vmem:[#allocation2 + $0xb0] ss:$0 sps:$4 sm:$0x11]  }
 0x257   : > { %v2871_v50 = vadd.f32 %v9707_v51, %v2832_v19  ;;  %v3860_v27 = vsel %vm886_vm0, %v3855_v0, %v3859_v43  ;;  %v3867_v62 = vor.u32 %v3866_v35, %v3862_v30  ;;  %v3871_v13 = vrot.slane %v3869_v4, 1  ;;  %v3434_v51 = vld [vmem:[#allocation2 + $0xc0] sm:$0xf]  ;;  %v3438_v19 = vld [vmem:[#allocation2 + $0xc8] sm:$0x1] }
 0x258   : > { %v3256_v56 = vsel %vm9399_vm8, %v3248_v12, %v3255_v21  ;;  %v3432_v7 = vsel %vm9407_vm9, %v3257_v36, %v3431_v47  ;;  %v3261_v44 = vrot.slane %v3259_v25, 7  ;;  %4252 = vmatprep.mubr.bf16.mxu0 %v3860_v27  ;;  %7585 = vmatprep.mubr.bf16.mxu1 %v3860_v27  ;;  %v9917_v53 = vcombine.low %v3469_v20, %v9906_v8  ;;  %v3471_v17 = vld [vmem:[#allocation2 + $0xb4] sm:$0xf] }
 0x259   : > { %3430 = vst [vmem:[#allocation2 + $0xb8] sm:$0xf] %v3256_v56  ;;  %3433 = vst [vmem:[#allocation2 + $0xbc] sm:$0x1] %v3432_v7  ;;  %v2903_v14 = vmax.f32 %v2871_v50, 0.0  ;;  %v9922_v60 = vsel %vm886_vm0, %v3867_v62, %v3871_v13  ;;  %v3881_v23 = vshll.u32 %v9908_v18, 16 }
 0x25a   : > { %v3264_v12 = vor.u32 %v3262_v42, %v3261_v44  ;;  %v3876_v26 = vshll.u32 %v9917_v53, 16  ;;  %v3874_v43 = vshrl.u32 %v9917_v53, 16  ;;  %v3912_v0 = vshll.u32 %v9928_v46, 16 }
 0x25b   : > { %v6535_v32 = vpack.c.bf16 %v2903_v14, %v2903_v14  ;;  %7586 = vmatmul.mubr.bf16.gmra.mrb[116].mxu1 %v9922_v60  ;;  %v3883_v47 = vrot.slane %v3881_v23, 1 }
 0x25c   : > { %v3435_v52 = vsel %vm9388_vm7, %v3264_v12, %v3434_v51  ;;  %4253 = vmatmul.mubr.bf16.gmra.mrb[204].mxu0 %v3848_v34  ;;  %v3878_v5 = vrot.slane %v3876_v26, 1  ;;  %v3265_v34 = vrot.slane %v3261_v44, 4  ;;  %v3910_v44 = vshrl.u32 %v9928_v46, 16  ;;  %v4928_v51 = vld [vmem:[#allocation2 + $0x60] sm:$0xe] }
 0x25d   : > { %3436 = vst [vmem:[#allocation2 + $0xc0] sm:$0xf] %v3435_v52  ;;  %v3267_v31 = vshrl.u32 %v6535_v32, 16  ;;  %4260 = vmatprep.mubr.bf16.mxu0 %v9922_v60  ;;  %v3270_v4 = vshll.u32 %v6535_v32, 16  ;;  %v3914_v55 = vrot.slane %v3912_v0, 1  ;;  %v6331_v12 = vcombine.low %v4928_v51, %v9747_v2 }
 0x25e   : > { %v3879_v39 = vor.u32 %v3878_v5, %v3874_v43  ;;  %v4929_v26 = vld [vmem:[#allocation2 + $0x6c] sm:$0xe]  ;;  %v4930_v32 = vld [vmem:[#allocation2 + $0x78] sm:$0xe]  ;;  %v3917_v2 = vshll.u32 %v9955_v24, 16 }
 0x25f   : > { %v3269_v63 = vrot.slane %v3267_v31, 7  ;;  %v6332_v23 = vcombine.low %v4929_v26, %v9766_v16  ;;  %v3915_v43 = vor.u32 %v3914_v55, %v3910_v44  ;;  %v5016_v5 = vrot.slane %v6331_v12, 1  ;;  %v4934_v44 = vld [vmem:[#allocation2 + $0xa8] sm:$0xe] }
 0x260   : > { %v9936_v30 = vsel %vm886_vm0, %v3879_v39, %v3883_v47  ;;  %v9938_v35 = vld [vmem:[#allocation2 + $0xb8] sm:$0xf]  ;;  %v9944_v42 = vld [vmem:[#allocation2 + $0xbc] ss:$0 sps:$4 sm:$0x11]   ;;  %v5020_v31 = vrot.slane %v9780_v49, 1 }
 0x261   : > { %v3272_v21 = vor.u32 %v3270_v4, %v3269_v63  ;;  %v3274_v36 = vrot.slane %v3269_v63, 4  ;;  %7589 = vmatprep.mubr.bf16.mxu1 %v9936_v30  ;;  %v9942_v25 = vcombine.low %v3471_v17, %v9938_v35  ;;  %v3893_v20 = vshll.u32 %v9944_v42, 16  ;;  %v4931_v39 = vld [vmem:[#allocation2 + $0x84] sm:$0xe]  ;;  %v4932_v47 = vld [vmem:[#allocation2 + $0x90] sm:$0xe] }
 0x262   : > { %v5019_v4 = vrot.slane %v6332_v23, 1  ;;  %v5023_v16 = vrot.slane %v9808_v22, 1  ;;  %v5026_v49 = vrot.slane %v9840_v40, 1  ;;  %v5032_v40 = vrot.slane %v9896_v6, 1 }
 0x263   : > { %v3273_v50 = vsel %vm9399_vm8, %v3265_v34, %v3272_v21  ;;  %v3439_v62 = vsel %vm9407_vm9, %v3274_v36, %v3438_v19  ;;  %v3888_v13 = vshll.u32 %v9942_v25, 16  ;;  %v3886_v56 = vshrl.u32 %v9942_v25, 16  ;;  %v4933_v19 = vld [vmem:[#allocation2 + $0x9c] sm:$0xe] }
 0x264   : > { %3437 = vst [vmem:[#allocation2 + $0xc4] sm:$0xf] %v3273_v50  ;;  %3440 = vst [vmem:[#allocation2 + $0xc8] sm:$0x1] %v3439_v62  ;;  %4261 = vmatmul.mubr.bf16.gmra.mrb[208].mxu0 %v3860_v27  ;;  %v3895_v14 = vrot.slane %v3893_v20, 1  ;;  %v5017_v27 = vrot.slane %v9738_v15, 1  ;;  %v6333_v15 = vcombine.low %v4930_v32, %v9806_v33  ;;  %v6334_v34 = vcombine.low %v4931_v39, %v9846_v58 }
 0x265   : > { %4268 = vmatprep.mubr.bf16.mxu0 %v9936_v30  ;;  %v3890_v7 = vrot.slane %v3888_v13, 1  ;;  %v3473_v63 = vld [vmem:[#allocation2 + $0xc0] sm:$0xf]  ;;  %v6335_v21 = vcombine.low %v4932_v47, %v9870_v45  ;;  %v9978_v33 = vsel %vm2174_vm1, %v5019_v4, %v5020_v31  ;;  %v5029_v62 = vrot.slane %v9866_v38, 1 }
 0x266   : > { %v9969_v17 = vsel %vm2174_vm1, %v5016_v5, %v5017_v27  ;;  %v5022_v22 = vrot.slane %v6333_v15, 1  ;;  %v5025_v13 = vrot.slane %v6334_v34, 1  ;;  %v6336_v58 = vcombine.low %v4933_v19, %v9889_v9  ;;  %v4935_v9 = vld [vmem:[#allocation2 + $0xb4] sm:$0xe]  ;;  %v4936_v27 = vld [vmem:[#allocation2 + $0xc0] sm:$0xe] }
 0x267   : > { %v3891_v57 = vor.u32 %v3890_v7, %v3886_v56  ;;  %v5028_v20 = vrot.slane %v6335_v21, 1  ;;  %v3919_v56 = vrot.slane %v3917_v2, 1  ;;  %v5035_v12 = vrot.slane %v9908_v18, 1  ;;  %v10702_v19 = vld [vmem:[#allocation13_spill] sm:$0xff]  ;;  %v8236_v34 = vld [vmem:[%s10633_s2 + $0x190] sm:$0xff]   ;;  %v8237_v21 = vld [vmem:[%s10633_s2 + $0x1d8] sm:$0xff]  }
 0x268   : > { %v9986_v7 = vsel %vm2174_vm1, %v5022_v22, %v5023_v16  ;;  %v9989_v55 = vsel %vm2174_vm1, %v5025_v13, %v5026_v49  ;;  %v5031_v51 = vrot.slane %v6336_v58, 1  ;;  %v6338_v26 = vcombine.low %v4935_v9, %v9938_v35  ;;  %v10701_v16 = vld [vmem:[#allocation12_spill] sm:$0xff]  ;;  %v10703_v49 = vld [vmem:[#allocation11_spill] sm:$0xff]  ;;  %v8241_v13 = vld [vmem:[%s10633_s2 + $0x1e8] sm:$0xff]  }
 0x269   : > { %v9961_v52 = vsel %vm886_vm0, %v3891_v57, %v3895_v14  ;;  %v9992_v38 = vsel %vm2174_vm1, %v5028_v20, %v5029_v62  ;;  %v6337_v57 = vcombine.low %v4934_v44, %v9906_v8  ;;  %v5038_v5 = vrot.slane %v9944_v42, 1  ;;  %v8239_v22 = vld [vmem:[%s10633_s2 + $0x1e0] sm:$0xff]   ;;  %v8242_v20 = vld [vmem:[%s10633_s2 + $0x1a8] sm:$0xff]   ;;  %v8243_v58 = vld [vmem:[%s10633_s2 + $0x1f0] sm:$0xff]  }
 0x26a   : > { %7590 = vmatmul.mubr.bf16.gmra.mrb[120].mxu1 %v9961_v52  ;;  %v9999_v23 = vsel %vm2174_vm1, %v5031_v51, %v5032_v40  ;;  %v3920_v2 = vsel %vm886_vm0, %v3915_v43, %v3919_v56  ;;  %v8232_v43 = vld [vmem:[%s10633_s2 + $0x180] sm:$0xff]   ;;  %v8244_v40 = vld [vmem:[%s10633_s2 + $0x1b0] sm:$0xff]  }
 0x26b   : > { %v3474_v0 = vld [vmem:[#allocation2 + $0xc4] sm:$0xf]  ;;  %v8223_v50 = vld [vmem:[#allocation2 + $0xc8] ss:$0 sps:$4 sm:$0x11]   ;;  %v5034_v32 = vrot.slane %v6337_v57, 1 }
 0x26c   : > { %4269 = vmatmul.mubr.bf16.gmra.mrb[212].mxu0 %v9922_v60  ;;  %v9975_v36 = vcombine.low %v3473_v63, %v3474_v0  ;;  %v3905_v60 = vshll.u32 %v8223_v50, 16  ;;  %v6339_v31 = vcombine.low %v4936_v27, %v3474_v0  ;;  %v5037_v63 = vrot.slane %v6338_v26, 1  ;;  %v8234_v0 = vld [vmem:[%s10633_s2 + $0x188] sm:$0xff]   ;;  %v8240_v62 = vld [vmem:[%s10633_s2 + $0x1a0] sm:$0xff]   ;;  %v8294_v44 = vld [vmem:[#allocation2 + $0x10] sm:$0xf] }
 0x26d   : > { %4276 = vmatprep.mubr.bf16.mxu0 %v9961_v52  ;;  %v5041_v8 = vrot.slane %v8223_v50, 1  ;;  %v10004_v4 = vsel %vm2174_vm1, %v5034_v32, %v5035_v12  ;;  %v8238_v50 = vld [vmem:[%s10633_s2 + $0x198] sm:$0xff]   ;;  %v8249_v56 = vld [vmem:[%s10633_s2 + $0x200] sm:$0xff]  }
 0x26e   : > { %v3900_v45 = vshll.u32 %v9975_v36, 16  ;;  %v3898_v6 = vshrl.u32 %v9975_v36, 16  ;;  %v3907_v47 = vrot.slane %v3905_v60, 1  ;;  %v5040_v18 = vrot.slane %v6339_v31, 1  ;;  %v8246_v60 = vld [vmem:[%s10633_s2 + $0x1b8] sm:$0xff]  }
 0x26f   : > { %v10009_v15 = vsel %vm2174_vm1, %v5037_v63, %v5038_v5  ;;  %v4920_v57 = vld [vmem:[#allocation2] sm:$0xe]  ;;  %v8297_v27 = vld [vmem:[#allocation2 + $0x1c] sm:$0xf] }
 0x270   : > { %v3902_v14 = vrot.slane %v3900_v45, 1  ;;  %v10012_v42 = vsel %vm2174_vm1, %v5040_v18, %v5041_v8  ;;  %v8245_v45 = vld [vmem:[%s10633_s2 + $0x1f8] sm:$0xff]   ;;  %v8298_v31 = vld [vmem:[#allocation2 + $0x8] ss:$0 sps:$4 sm:$0x11]  }
 0x271   : > { %v8299_v63 = vld [vmem:[#allocation2 + $0x20] ss:$0 sps:$4 sm:$0x11]  }
 0x272   : > { %v3903_v39 = vor.u32 %v3902_v14, %v3898_v6  ;;  %v8296_v14 = vld [vmem:[#allocation2 + $0x4] sm:$0xf]  ;;  %v4999_v8 = vrot.slane %v8299_v63, 1 }
 0x273   : > { %v6323_v12 = vcombine.low %v4920_v57, %v8296_v14  ;;  %v8267_v57 = vld [vmem:[%s10633_s2 + $0x230] sm:$0xff]  }
 0x274   : > { %4277 = vmatmul.mubr.bf16.gmra.mrb[216].mxu0 %v9936_v30  ;;  %v3908_v35 = vsel %vm886_vm0, %v3903_v39, %v3907_v47  ;;  %v8233_v30 = vld [vmem:[%s10633_s2 + $0x1c8] sm:$0xff]   ;;  %v4993_v39 = vrot.slane %v8298_v31, 1 }
 0x275   : > { %4284 = vmatprep.mubr.bf16.mxu0 %v3908_v35  ;;  %7593 = vmatprep.mubr.bf16.mxu1 %v3908_v35  ;;  %v4992_v5 = vrot.slane %v6323_v12, 1  ;;  %v8300_v35 = vld [vmem:[#allocation2 + $0x28] sm:$0xf]  ;;  %v8270_v12 = vld [vmem:[%s10633_s2 + $0x238] sm:$0xff]   ;;  %v8306_v31 = vld [vmem:[#allocation2 + $0x4c] sm:$0xf] }
 0x276   : > { %7594 = vmatmul.mubr.bf16.gmra.mrb[124].mxu1 %v3920_v2 }
 0x277   : > { %7613 = vmatprep.mubr.bf16.mxu1 %v10701_v16  ;;  %v4994_v2 = vsel %vm2174_vm1, %v4992_v5, %v4993_v39 }
 0x27c   : > { %4285 = vmatmul.mubr.bf16.gmra.mrb[220].mxu0 %v9961_v52  ;;  %v8235_v52 = vld [vmem:[%s10633_s2 + $0x1d0] sm:$0xff]  }
 0x27d   : > { %4630 = vmatprep.mubr.bf16.mxu0 %v10702_v19 }
 0x27e   : > { %7614 = vmatmul.mubr.bf16.vlgmr.msra.gmra.mrb[96].mxu1 %v9524_v29 }
 0x27f   : > { %7617 = vmatprep.mubr.bf16.mxu1 %v9577_v54  ;;  %7270 = vmatpush3.bf16.msra.mxu1 %v8232_v43 }
 0x280   : > { %7271 = vmatprep.subr.bf16.mxu1 %v8233_v30  ;;  %v8301_v30 = vld [vmem:[#allocation2 + $0x2c] ss:$0 sps:$4 sm:$0x11]  }
 0x283   : > { %7272 = vmatpush3.bf16.msra.mxu1 %v8234_v0  ;;  %v8258_v0 = vld [vmem:[%s10633_s2 + $0x218] sm:$0xff]  }
 0x284   : > { %4631 = vmatmul.mubr.bf16.vlgmr.msra.gmra.mrb[224].mxu0 %v10703_v49  ;;  %7273 = vmatprep.subr.bf16.mxu1 %v8235_v52  ;;  %v4924_v52 = vld [vmem:[#allocation2 + $0x30] sm:$0xe]  ;;  %v8302_v49 = vld [vmem:[#allocation2 + $0x34] sm:$0xf] }
 0x285   : > { %4638 = vmatprep.mubr.bf16.mxu0 %v10701_v16 }
 0x286   : > { %7618 = vmatmul.mubr.bf16.gmra.mrb[100].mxu1 %v9653_v3 }
 0x287   : > { %7621 = vmatprep.mubr.bf16.mxu1 %v9694_v28  ;;  %7274 = vmatpush3.bf16.msra.mxu1 %v8236_v34 }
 0x288   : > { %7275 = vmatprep.subr.bf16.mxu1 %v8237_v21  ;;  %v6327_v21 = vcombine.low %v4924_v52, %v8302_v49  ;;  %v8309_v49 = vld [vmem:[#allocation2 + $0x5c] ss:$0 sps:$4 sm:$0x11]  }
 0x28b   : > { %7276 = vmatpush3.bf16.msra.mxu1 %v8238_v50  ;;  %v5004_v50 = vrot.slane %v6327_v21, 1  ;;  %v5014_v21 = vrot.slane %v8309_v49, 1 }
 0x28c   : > { %4639 = vmatmul.mubr.bf16.gmra.mrb[228].mxu0 %v10702_v19  ;;  %7277 = vmatprep.subr.bf16.mxu1 %v8239_v22  ;;  %v5002_v19 = vrot.slane %v8301_v30, 1  ;;  %v8303_v22 = vld [vmem:[#allocation2 + $0x38] ss:$0 sps:$4 sm:$0x11]  }
 0x28d   : > { %4646 = vmatprep.mubr.bf16.mxu0 %v9524_v29 }
 0x28e   : > { %7622 = vmatmul.mubr.bf16.gmra.mrb[104].mxu1 %v9729_v1 }
 0x28f   : > { %7625 = vmatprep.mubr.bf16.mxu1 %v9759_v10  ;;  %7278 = vmatpush3.bf16.msra.mxu1 %v8240_v62  ;;  %v5005_v62 = vrot.slane %v8303_v22, 1 }
 0x290   : > { %7279 = vmatprep.subr.bf16.mxu1 %v8241_v13 }
 0x293   : > { %7280 = vmatpush3.bf16.msra.mxu1 %v8242_v20 }
 0x294   : > { %4647 = vmatmul.mubr.bf16.gmra.mrb[232].mxu0 %v10701_v16  ;;  %7281 = vmatprep.subr.bf16.mxu1 %v8243_v58  ;;  %v8264_v58 = vld [vmem:[%s10633_s2 + $0x228] sm:$0xff]  }
 0x295   : > { %4654 = vmatprep.mubr.bf16.mxu0 %v9577_v54 }
 0x296   : > { %7626 = vmatmul.mubr.bf16.gmra.mrb[108].mxu1 %v9776_v41 }
 0x297   : > { %7629 = vmatprep.mubr.bf16.mxu1 %v9824_v48  ;;  %7282 = vmatpush3.bf16.msra.mxu1 %v8244_v40 }
 0x298   : > { %7283 = vmatprep.subr.bf16.mxu1 %v8245_v45 }
 0x29b   : > { %7284 = vmatpush3.bf16.msra.mxu1 %v8246_v60  ;;  %v4925_v60 = vld [vmem:[#allocation2 + $0x3c] sm:$0xe] }
 0x29c   : > { %4655 = vmatmul.mubr.bf16.gmra.mrb[236].mxu0 %v9524_v29  ;;  %7645 = vmatprep.subr.bf16.mxu1 %v8249_v56  ;;  %v4921_v29 = vld [vmem:[#allocation2 + $0xc] sm:$0xe] }
 0x29d   : > { %4662 = vmatprep.mubr.bf16.mxu0 %v9653_v3  ;;  %v6324_v51 = vcombine.low %v4921_v29, %v8294_v44  ;;  %v8304_v29 = vld [vmem:[#allocation2 + $0x40] sm:$0xf] }
 0x29e   : > { %7630 = vmatmul.mubr.bf16.gmra.mrb[112].mxu1 %v9859_v61  ;;  %v6328_v44 = vcombine.low %v4925_v60, %v8304_v29 }
 0x29f   : > { %7633 = vmatprep.mubr.bf16.mxu1 %v9884_v11  ;;  %v4995_v9 = vrot.slane %v6324_v51, 1 }
 0x2a4   : > { %4663 = vmatmul.mubr.bf16.gmra.mrb[240].mxu0 %v9577_v54  ;;  %v8295_v54 = vld [vmem:[#allocation2 + $0x14] ss:$0 sps:$4 sm:$0x11]  }
 0x2a5   : > { %4670 = vmatprep.mubr.bf16.mxu0 %v9694_v28  ;;  %v4996_v6 = vrot.slane %v8295_v54, 1  ;;  %v8305_v54 = vld [vmem:[#allocation2 + $0x44] ss:$0 sps:$4 sm:$0x11]  }
 0x2a6   : > { %7634 = vmatmul.mubr.bf16.gmra.mrb[116].mxu1 %v9894_v37 }
 0x2a7   : > { %7637 = vmatprep.mubr.bf16.mxu1 %v9917_v53  ;;  %v4997_v26 = vsel %vm2174_vm1, %v4995_v9, %v4996_v6  ;;  %v5007_v9 = vrot.slane %v6328_v44, 1  ;;  %v5008_v6 = vrot.slane %v8305_v54, 1 }
 0x2ac   : > { %4671 = vmatmul.mubr.bf16.gmra.mrb[244].mxu0 %v9653_v3  ;;  %v4922_v3 = vld [vmem:[#allocation2 + $0x18] sm:$0xe] }
 0x2ad   : > { %4678 = vmatprep.mubr.bf16.mxu0 %v9729_v1  ;;  %v6325_v32 = vcombine.low %v4922_v3, %v8297_v27  ;;  %v10144_v27 = vsel %vm2174_vm1, %v5007_v9, %v5008_v6 }
 0x2ae   : > { %7638 = vmatmul.mubr.bf16.gmra.mrb[120].mxu1 %v9942_v25 }
 0x2af   : > { %7641 = vmatprep.mubr.bf16.mxu1 %v9975_v36  ;;  %v4998_v47 = vrot.slane %v6325_v32, 1 }
 0x2b1   : > { %v10102_v18 = vsel %vm2174_vm1, %v4998_v47, %v4999_v8  ;;  %v8307_v8 = vld [vmem:[#allocation2 + $0x50] ss:$0 sps:$4 sm:$0x11]  }
 0x2b4   : > { %4679 = vmatmul.mubr.bf16.gmra.mrb[248].mxu0 %v9694_v28  ;;  %v8252_v28 = vld [vmem:[%s10633_s2 + $0x208] sm:$0xff]  }
 0x2b5   : > { %4686 = vmatprep.mubr.bf16.mxu0 %v9759_v10 }
 0x2b6   : > { %7642 = vmatmul.mubr.bf16.gmra.mrb[124].mxu1 %v9928_v46  ;;  %v4923_v46 = vld [vmem:[#allocation2 + $0x24] sm:$0xe] }
 0x2b7   : > { %5289 = vmatprep.mubr.bf16.mxu1 %v4997_v26  ;;  %v6326_v16 = vcombine.low %v4923_v46, %v8300_v35  ;;  %v4927_v46 = vld [vmem:[#allocation2 + $0x54] sm:$0xe] }
 0x2b9   : > { %v5001_v43 = vrot.slane %v6326_v16, 1 }
 0x2bb   : > { %v10114_v34 = vsel %vm2174_vm1, %v5001_v43, %v5002_v19 }
 0x2bc   : > { %4687 = vmatmul.mubr.bf16.gmra.mrb[252].mxu0 %v9729_v1  ;;  %v8255_v1 = vld [vmem:[%s10633_s2 + $0x210] sm:$0xff]  }
 0x2bd   : > { %4694 = vmatprep.mubr.bf16.mxu0 %v9776_v41 }
 0x2be   : > { %5290 = vmatmul.mubr.bf16.vlgmr.msra.gmra.mrb[128].mxu1 %v4994_v2  ;;  %v5011_v2 = vrot.slane %v8307_v8, 1 }
 0x2bf   : > { %5297 = vmatprep.mubr.bf16.mxu1 %v10102_v18  ;;  %7646 = vmatpush3.bf16.msra.mxu1 %v8249_v56  ;;  %v10129_v56 = vsel %vm2174_vm1, %v5004_v50, %v5005_v62 }
 0x2c0   : > { %7647 = vmatprep.subr.bf16.mxu1 %v8252_v28 }
 0x2c3   : > { %7648 = vmatpush3.bf16.msra.mxu1 %v8252_v28 }
 0x2c4   : > { %4695 = vmatmul.mubr.bf16.gmra.mrb[0].mxu0 %v9759_v10  ;;  %7649 = vmatprep.subr.bf16.mxu1 %v8255_v1  ;;  %v8261_v10 = vld [vmem:[%s10633_s2 + $0x220] sm:$0xff]  }
 0x2c5   : > { %4702 = vmatprep.mubr.bf16.mxu0 %v9824_v48 }
 0x2c6   : > { %5298 = vmatmul.mubr.bf16.gmra.mrb[132].mxu1 %v4997_v26  ;;  %v4926_v26 = vld [vmem:[#allocation2 + $0x48] sm:$0xe] }
 0x2c7   : > { %5305 = vmatprep.mubr.bf16.mxu1 %v10114_v34  ;;  %7650 = vmatpush3.bf16.msra.mxu1 %v8255_v1  ;;  %v8308_v1 = vld [vmem:[#allocation2 + $0x58] sm:$0xf] }
 0x2c8   : > { %7651 = vmatprep.subr.bf16.mxu1 %v8258_v0  ;;  %v6330_v43 = vcombine.low %v4927_v46, %v8308_v1 }
 0x2c9   : > { %v7013_v13 = vpop.f32.mrb[160].mxu0 }
 0x2ca   : > { %v7014_v20 = vpop.f32.mrb[161].mxu0 }
 0x2cb   : > { %7652 = vmatpush3.bf16.msra.mxu1 %v8258_v0  ;;  %v10125_v40 = vadd.f32 %v7014_v20, %v7013_v13  ;;  %v7016_v45 = vpop.f32.mrb[162].mxu0 }
 0x2cc   : > { %4703 = vmatmul.mubr.bf16.gmra.mrb[4].mxu0 %v9776_v41  ;;  %7653 = vmatprep.subr.bf16.mxu1 %v8261_v10  ;;  %v7017_v41 = vpop.f32.mrb[163].mxu0 }
 0x2cd   : > { %4710 = vmatprep.mubr.bf16.mxu0 %v9859_v61  ;;  %v10132_v51 = vadd.f32 %v7017_v41, %v7016_v45 }
 0x2ce   : > { %5306 = vmatmul.mubr.bf16.gmra.mrb[136].mxu1 %v10102_v18 }
 0x2cf   : > { %5313 = vmatprep.mubr.bf16.mxu1 %v10129_v56  ;;  %7654 = vmatpush3.bf16.msra.mxu1 %v8261_v10 }
 0x2d0   : > { %7655 = vmatprep.subr.bf16.mxu1 %v8264_v58 }
 0x2d3   : > { %7656 = vmatpush3.bf16.msra.mxu1 %v8264_v58 }
 0x2d4   : > { %4711 = vmatmul.mubr.bf16.gmra.mrb[8].mxu0 %v9824_v48  ;;  %v7019_v14 = vpop.f32.mrb[164].mxu0  ;;  %7657 = vmatprep.subr.bf16.mxu1 %v8267_v57  ;;  %v6329_v48 = vcombine.low %v4926_v26, %v8306_v31 }
 0x2d5   : > { %4718 = vmatprep.mubr.bf16.mxu0 %v9884_v11  ;;  %v7020_v3 = vpop.f32.mrb[165].mxu0 }
 0x2d6   : > { %5314 = vmatmul.mubr.bf16.gmra.mrb[140].mxu1 %v10114_v34  ;;  %v10146_v32 = vadd.f32 %v7020_v3, %v7019_v14  ;;  %v7022_v5 = vpop.f32.mrb[166].mxu0  ;;  %v5010_v63 = vrot.slane %v6329_v48, 1 }
 0x2d7   : > { %5321 = vmatprep.mubr.bf16.mxu1 %v10144_v27  ;;  %v7023_v39 = vpop.f32.mrb[167].mxu0  ;;  %7658 = vmatpush3.bf16.msra.mxu1 %v8267_v57 }
 0x2d8   : > { %v10149_v47 = vadd.f32 %v7023_v39, %v7022_v5  ;;  %7659 = vmatprep.subr.bf16.mxu1 %v8270_v12  ;;  %v10155_v35 = vsel %vm2174_vm1, %v5010_v63, %v5011_v2 }
 0x2db   : > { %7660 = vmatpush3.bf16.msra.mxu1 %v8270_v12 }
 0x2dc   : > { %4719 = vmatmul.mubr.bf16.gmra.mrb[12].mxu0 %v9859_v61  ;;  %v7025_v28 = vpop.f32.mrb[168].mxu0  ;;  %v5013_v61 = vrot.slane %v6330_v43, 1 }
 0x2dd   : > { %4726 = vmatprep.mubr.bf16.mxu0 %v9894_v37  ;;  %v7026_v16 = vpop.f32.mrb[169].mxu0 }
 0x2de   : > { %5322 = vmatmul.mubr.bf16.gmra.mrb[144].mxu1 %v10129_v56  ;;  %v10158_v30 = vadd.f32 %v7026_v16, %v7025_v28  ;;  %v7028_v19 = vpop.f32.mrb[170].mxu0  ;;  %v10166_v10 = vsel %vm2174_vm1, %v5013_v61, %v5014_v21 }
 0x2df   : > { %5329 = vmatprep.mubr.bf16.mxu1 %v10155_v35  ;;  %v7029_v0 = vpop.f32.mrb[171].mxu0 }
 0x2e0   : > { %v10160_v52 = vadd.f32 %v7029_v0, %v7028_v19 }
 0x2e4   : > { %4727 = vmatmul.mubr.bf16.gmra.mrb[16].mxu0 %v9884_v11 }
 0x2e5   : > { %4734 = vmatprep.mubr.bf16.mxu0 %v9917_v53 }
 0x2e6   : > { %5330 = vmatmul.mubr.bf16.gmra.mrb[148].mxu1 %v10144_v27  ;;  %v7031_v50 = vpop.f32.mrb[172].mxu0 }
 0x2e7   : > { %5337 = vmatprep.mubr.bf16.mxu1 %v10166_v10  ;;  %v7032_v22 = vpop.f32.mrb[173].mxu0 }
 0x2e8   : > { %v10169_v62 = vadd.f32 %v7032_v22, %v7031_v50  ;;  %v7034_v13 = vpop.f32.mrb[174].mxu0 }
 0x2e9   : > { %v7035_v20 = vpop.f32.mrb[175].mxu0 }
 0x2ea   : > { %v10171_v58 = vadd.f32 %v7035_v20, %v7034_v13 }
 0x2ec   : > { %4735 = vmatmul.mubr.bf16.gmra.mrb[20].mxu0 %v9894_v37 }
 0x2ed   : > { %4742 = vmatprep.mubr.bf16.mxu0 %v9942_v25 }
 0x2ee   : > { %5338 = vmatmul.mubr.bf16.gmra.mrb[152].mxu1 %v10155_v35 }
 0x2ef   : > { %5345 = vmatprep.mubr.bf16.mxu1 %v9969_v17 }
 0x2f1   : > { %v7037_v11 = vpop.f32.mrb[176].mxu0 }
 0x2f2   : > { %v7038_v45 = vpop.f32.mrb[177].mxu0 }
 0x2f3   : > { %v10177_v60 = vadd.f32 %v7038_v45, %v7037_v11  ;;  %v7040_v29 = vpop.f32.mrb[178].mxu0 }
 0x2f4   : > { %4743 = vmatmul.mubr.bf16.gmra.mrb[24].mxu0 %v9917_v53  ;;  %v7041_v44 = vpop.f32.mrb[179].mxu0 }
 0x2f5   : > { %4750 = vmatprep.mubr.bf16.mxu0 %v9975_v36  ;;  %v10181_v41 = vadd.f32 %v7041_v44, %v7040_v29 }
 0x2f6   : > { %5346 = vmatmul.mubr.bf16.gmra.mrb[156].mxu1 %v10166_v10 }
 0x2f7   : > { %5353 = vmatprep.mubr.bf16.mxu1 %v9978_v33 }
 0x2fb   : > { %v7043_v37 = vpop.f32.mrb[180].mxu0 }
 0x2fc   : > { %v7044_v57 = vpop.f32.mrb[181].mxu0  ;;  %4751 = vmatmul.mubr.bf16.gmra.mrb[28].mxu0 %v9942_v25 }
 0x2fd   : > { %v10186_v9 = vadd.f32 %v7044_v57, %v7043_v37  ;;  %v7046_v54 = vpop.f32.mrb[182].mxu0 }
 0x2fe   : > { %v7047_v6 = vpop.f32.mrb[183].mxu0  ;;  %5354 = vmatmul.mubr.bf16.gmra.mrb[160].mxu1 %v9969_v17 }
 0x2ff   : > { %v10188_v14 = vadd.f32 %v7047_v6, %v7046_v54  ;;  %5361 = vmatprep.mubr.bf16.mxu1 %v9986_v7 }
 0x306   : > { %v7049_v53 = vpop.f32.mrb[184].mxu0  ;;  %5362 = vmatmul.mubr.bf16.gmra.mrb[164].mxu1 %v9978_v33 }
 0x307   : > { %v7050_v36 = vpop.f32.mrb[185].mxu0  ;;  %5369 = vmatprep.mubr.bf16.mxu1 %v9989_v55 }
 0x308   : > { %v10194_v12 = vadd.f32 %v7050_v36, %v7049_v53  ;;  %v7052_v3 = vpop.f32.mrb[186].mxu0 }
 0x309   : > { %v7053_v25 = vpop.f32.mrb[187].mxu0 }
 0x30a   : > { %v10196_v26 = vadd.f32 %v7053_v25, %v7052_v3 }
 0x30e   : > { %v7055_v5 = vpop.f32.mrb[188].mxu0  ;;  %5370 = vmatmul.mubr.bf16.gmra.mrb[168].mxu1 %v9986_v7 }
 0x30f   : > { %v7056_v31 = vpop.f32.mrb[189].mxu0  ;;  %5377 = vmatprep.mubr.bf16.mxu1 %v9992_v38 }
 0x310   : > { %v10200_v48 = vadd.f32 %v7056_v31, %v7055_v5  ;;  %v7058_v39 = vpop.f32.mrb[190].mxu0 }
 0x311   : > { %v7059_v63 = vpop.f32.mrb[191].mxu0 }
 0x312   : > { %v10202_v8 = vadd.f32 %v7059_v63, %v7058_v39 }
 0x316   : > { %v7061_v2 = vpop.f32.mrb[192].mxu0  ;;  %5378 = vmatmul.mubr.bf16.gmra.mrb[172].mxu1 %v9989_v55 }
 0x317   : > { %v7062_v28 = vpop.f32.mrb[193].mxu0  ;;  %5385 = vmatprep.mubr.bf16.mxu1 %v9999_v23 }
 0x318   : > { %v10206_v46 = vadd.f32 %v7062_v28, %v7061_v2  ;;  %v7064_v16 = vpop.f32.mrb[194].mxu0 }
 0x319   : > { %v7065_v1 = vpop.f32.mrb[195].mxu0 }
 0x31a   : > { %v10208_v43 = vadd.f32 %v7065_v1, %v7064_v16 }
 0x31e   : > { %v7067_v19 = vpop.f32.mrb[196].mxu0  ;;  %5386 = vmatmul.mubr.bf16.gmra.mrb[176].mxu1 %v9992_v38 }
 0x31f   : > { %v7068_v0 = vpop.f32.mrb[197].mxu0  ;;  %5393 = vmatprep.mubr.bf16.mxu1 %v10004_v4 }
 0x320   : > { %v10212_v61 = vadd.f32 %v7068_v0, %v7067_v19  ;;  %v7070_v49 = vpop.f32.mrb[198].mxu0 }
 0x321   : > { %v7071_v21 = vpop.f32.mrb[199].mxu0 }
 0x322   : > { %v10214_v50 = vadd.f32 %v7071_v21, %v7070_v49 }
 0x326   : > { %5394 = vmatmul.mubr.bf16.gmra.mrb[180].mxu1 %v9999_v23 }
 0x327   : > { %v7073_v22 = vpop.f32.mrb[200].mxu0  ;;  %5401 = vmatprep.mubr.bf16.mxu1 %v10009_v15 }
 0x328   : > { %v7074_v13 = vpop.f32.mrb[201].mxu0 }
 0x329   : > { %v10218_v20 = vadd.f32 %v7074_v13, %v7073_v22  ;;  %v7076_v11 = vpop.f32.mrb[202].mxu0 }
 0x32a   : > { %v7077_v45 = vpop.f32.mrb[203].mxu0 }
 0x32b   : > { %v10220_v29 = vadd.f32 %v7077_v45, %v7076_v11 }
 0x32e   : > { %5402 = vmatmul.mubr.bf16.gmra.mrb[184].mxu1 %v10004_v4 }
 0x32f   : > { %v7079_v44 = vpop.f32.mrb[204].mxu0  ;;  %5409 = vmatprep.mubr.bf16.mxu1 %v10012_v42 }
 0x330   : > { %v7080_v37 = vpop.f32.mrb[205].mxu0 }
 0x331   : > { %v10224_v57 = vadd.f32 %v7080_v37, %v7079_v44  ;;  %v7082_v54 = vpop.f32.mrb[206].mxu0 }
 0x332   : > { %v7083_v6 = vpop.f32.mrb[207].mxu0 }
 0x333   : > { %v10226_v53 = vadd.f32 %v7083_v6, %v7082_v54 }
 0x336   : > { %5410 = vmatmul.mubr.bf16.gmra.mrb[188].mxu1 %v10009_v15 }
 0x337   : > { %v7085_v36 = vpop.f32.mrb[208].mxu0  ;;  %7661 = vmatprep.mubr.bf16.mxu1 %v10102_v18 }
 0x338   : > { %v7086_v3 = vpop.f32.mrb[209].mxu0 }
 0x339   : > { %v10230_v25 = vadd.f32 %v7086_v3, %v7085_v36  ;;  %v7088_v5 = vpop.f32.mrb[210].mxu0 }
 0x33a   : > { %v7089_v31 = vpop.f32.mrb[211].mxu0 }
 0x33b   : > { %v10232_v39 = vadd.f32 %v7089_v31, %v7088_v5 }
 0x33e   : > { %7662 = vmatmul.mubr.bf16.vlgmr.msra.gmra.mrb[96].mxu1 %v10114_v34 }
 0x33f   : > { %v7091_v63 = vpop.f32.mrb[212].mxu0  ;;  %7665 = vmatprep.mubr.bf16.mxu1 %v10129_v56 }
 0x340   : > { %v7092_v2 = vpop.f32.mrb[213].mxu0 }
 0x341   : > { %v10236_v28 = vadd.f32 %v7092_v2, %v7091_v63  ;;  %v7094_v16 = vpop.f32.mrb[214].mxu0 }
 0x342   : > { %v7095_v1 = vpop.f32.mrb[215].mxu0 }
 0x343   : > { %v10238_v19 = vadd.f32 %v7095_v1, %v7094_v16  ;;  %v4937_v1 = vld [vmem:[#allocation2 + $0xcc] sm:$0xe] }
 0x346   : > { %7666 = vmatmul.mubr.bf16.gmra.mrb[100].mxu1 %v10144_v27 }
 0x347   : > { %v7097_v18 = vpop.f32.mrb[216].mxu0  ;;  %7669 = vmatprep.mubr.bf16.mxu1 %v10155_v35 }
 0x348   : > { %v7098_v0 = vpop.f32.mrb[217].mxu0 }
 0x349   : > { %v10242_v49 = vadd.f32 %v7098_v0, %v7097_v18  ;;  %v7100_v21 = vpop.f32.mrb[218].mxu0 }
 0x34a   : > { %v7101_v34 = vpop.f32.mrb[219].mxu0 }
 0x34b   : > { %v10244_v22 = vadd.f32 %v7101_v34, %v7100_v21 }
 0x34e   : > { %7670 = vmatmul.mubr.bf16.gmra.mrb[104].mxu1 %v10166_v10 }
 0x34f   : > { %v7103_v56 = vpop.f32.mrb[220].mxu0  ;;  %7673 = vmatprep.mubr.bf16.mxu1 %v9969_v17 }
 0x350   : > { %v7104_v13 = vpop.f32.mrb[221].mxu0 }
 0x351   : > { %v10248_v11 = vadd.f32 %v7104_v13, %v7103_v56  ;;  %v7106_v45 = vpop.f32.mrb[222].mxu0 }
 0x352   : > { %v7107_v27 = vpop.f32.mrb[223].mxu0 }
 0x353   : > { %v10250_v44 = vadd.f32 %v7107_v27, %v7106_v45 }
 0x356   : > { %7674 = vmatmul.mubr.bf16.gmra.mrb[108].mxu1 %v9978_v33 }
 0x357   : > { %v7149_v35 = vpop.f32.mrb[224].mxu0  ;;  %7677 = vmatprep.mubr.bf16.mxu1 %v9986_v7 }
 0x358   : > { %v7150_v37 = vpop.f32.mrb[225].mxu0 }
 0x359   : > { %v7151_v54 = vadd.f32 %v7150_v37, %v7149_v35  ;;  %v7152_v6 = vpop.f32.mrb[226].mxu0 }
 0x35a   : > { %v7153_v36 = vpop.f32.mrb[227].mxu0 }
 0x35b   : > { %v10255_v10 = vadd.f32 %v7151_v54, %v10125_v40  ;;  %v7154_v17 = vadd.f32 %v7153_v36, %v7152_v6 }
 0x35d   : > { %v10258_v3 = vadd.f32 %v7154_v17, %v10132_v51 }
 0x35e   : > { %7678 = vmatmul.mubr.bf16.gmra.mrb[112].mxu1 %v9989_v55 }
 0x35f   : > { %v7155_v5 = vpop.f32.mrb[228].mxu0  ;;  %7681 = vmatprep.mubr.bf16.mxu1 %v9992_v38 }
 0x360   : > { %v7156_v33 = vpop.f32.mrb[229].mxu0 }
 0x361   : > { %v7157_v31 = vadd.f32 %v7156_v33, %v7155_v5  ;;  %v7158_v63 = vpop.f32.mrb[230].mxu0 }
 0x362   : > { %v7159_v7 = vpop.f32.mrb[231].mxu0 }
 0x363   : > { %v10263_v2 = vadd.f32 %v7157_v31, %v10146_v32  ;;  %v7160_v16 = vadd.f32 %v7159_v7, %v7158_v63  ;;  %v6340_v32 = vcombine.low %v4937_v1, %v9919_v59 }
 0x365   : > { %v10266_v40 = vadd.f32 %v7160_v16, %v10149_v47  ;;  %v5044_v47 = vrot.slane %v9955_v24, 1 }
 0x366   : > { %7682 = vmatmul.mubr.bf16.gmra.mrb[116].mxu1 %v9999_v23 }
 0x367   : > { %v7161_v51 = vpop.f32.mrb[232].mxu0  ;;  %7685 = vmatprep.mubr.bf16.mxu1 %v10004_v4  ;;  %v5043_v4 = vrot.slane %v6340_v32, 1 }
 0x368   : > { %v7162_v55 = vpop.f32.mrb[233].mxu0 }
 0x369   : > { %v7163_v18 = vadd.f32 %v7162_v55, %v7161_v51  ;;  %v7164_v38 = vpop.f32.mrb[234].mxu0  ;;  %v5045_v59 = vsel %vm2174_vm1, %v5043_v4, %v5044_v47 }
 0x36a   : > { %v7165_v0 = vpop.f32.mrb[235].mxu0 }
 0x36b   : > { %v10271_v21 = vadd.f32 %v7163_v18, %v10158_v30  ;;  %v7166_v34 = vadd.f32 %v7165_v0, %v7164_v38 }
 0x36d   : > { %v10275_v56 = vadd.f32 %v7166_v34, %v10160_v52 }
 0x36e   : > { %7686 = vmatmul.mubr.bf16.gmra.mrb[120].mxu1 %v10009_v15 }
 0x36f   : > { %v7167_v23 = vpop.f32.mrb[236].mxu0  ;;  %7689 = vmatprep.mubr.bf16.mxu1 %v10012_v42 }
 0x370   : > { %v7168_v13 = vpop.f32.mrb[237].mxu0 }
 0x371   : > { %v7169_v45 = vadd.f32 %v7168_v13, %v7167_v23  ;;  %v7170_v27 = vpop.f32.mrb[238].mxu0 }
 0x372   : > { %v7171_v35 = vpop.f32.mrb[239].mxu0 }
 0x373   : > { %v10281_v30 = vadd.f32 %v7169_v45, %v10169_v62  ;;  %v7172_v37 = vadd.f32 %v7171_v35, %v7170_v27 }
 0x375   : > { %v10285_v52 = vadd.f32 %v7172_v37, %v10171_v58 }
 0x376   : > { %7690 = vmatmul.mubr.bf16.gmra.mrb[124].mxu1 %v5045_v59 }
 0x377   : > { %v7173_v15 = vpop.f32.mrb[240].mxu0 }
 0x378   : > { %v7174_v54 = vpop.f32.mrb[241].mxu0 }
 0x379   : > { %v7175_v42 = vadd.f32 %v7174_v54, %v7173_v15  ;;  %v7176_v6 = vpop.f32.mrb[242].mxu0 }
 0x37a   : > { %v7177_v36 = vpop.f32.mrb[243].mxu0 }
 0x37b   : > { %v10288_v24 = vadd.f32 %v7175_v42, %v10177_v60  ;;  %v7178_v17 = vadd.f32 %v7177_v36, %v7176_v6 }
 0x37d   : > { %v10291_v5 = vadd.f32 %v7178_v17, %v10181_v41 }
 0x37f   : > { %v7179_v62 = vpop.f32.mrb[244].mxu0 }
 0x380   : > { %v7180_v33 = vpop.f32.mrb[245].mxu0 }
 0x381   : > { %v7181_v31 = vadd.f32 %v7180_v33, %v7179_v62  ;;  %v7182_v63 = vpop.f32.mrb[246].mxu0 }
 0x382   : > { %v7183_v7 = vpop.f32.mrb[247].mxu0 }
 0x383   : > { %v10294_v58 = vadd.f32 %v7181_v31, %v10186_v9  ;;  %v7184_v16 = vadd.f32 %v7183_v7, %v7182_v63 }
 0x385   : > { %v10297_v51 = vadd.f32 %v7184_v16, %v10188_v14 }
 0x387   : > { %v7185_v55 = vpop.f32.mrb[248].mxu0 }
 0x388   : > { %v7186_v1 = vpop.f32.mrb[249].mxu0 }
 0x389   : > { %v7187_v60 = vadd.f32 %v7186_v1, %v7185_v55  ;;  %v7188_v18 = vpop.f32.mrb[250].mxu0 }
 0x38a   : > { %v7189_v38 = vpop.f32.mrb[251].mxu0 }
 0x38b   : > { %v10300_v41 = vadd.f32 %v7187_v60, %v10194_v12  ;;  %v7190_v0 = vadd.f32 %v7189_v38, %v7188_v18 }
 0x38d   : > { %v10303_v34 = vadd.f32 %v7190_v0, %v10196_v26 }
 0x38f   : > { %v7191_v32 = vpop.f32.mrb[252].mxu0 }
 0x390   : > { %v7192_v23 = vpop.f32.mrb[253].mxu0 }
 0x391   : > { %v7193_v9 = vadd.f32 %v7192_v23, %v7191_v32  ;;  %v7194_v4 = vpop.f32.mrb[254].mxu0  ;;  %v7285_v47 = vpop.f32.mrb[128].mxu1 }
 0x392   : > { %v7195_v13 = vpop.f32.mrb[255].mxu0  ;;  %v7286_v14 = vpop.f32.mrb[129].mxu1 }
 0x393   : > { %v10306_v45 = vadd.f32 %v7193_v9, %v10200_v48  ;;  %v7196_v27 = vadd.f32 %v7195_v13, %v7194_v4  ;;  %v7287_v35 = vadd.f32 %v7286_v14, %v7285_v47  ;;  %v7288_v37 = vpop.f32.mrb[130].mxu1 }
 0x394   : > { %v7289_v59 = vpop.f32.mrb[131].mxu1 }
 0x395   : > { %v10309_v12 = vadd.f32 %v7196_v27, %v10202_v8  ;;  %v7290_v15 = vadd.f32 %v7289_v59, %v7288_v37  ;;  %v10312_v26 = vadd.f32 %v10255_v10, %v7287_v35 }
 0x397   : > { %v7197_v54 = vpop.f32.mrb[0].mxu0  ;;  %v10315_v42 = vadd.f32 %v10258_v3, %v7290_v15 }
 0x398   : > { %v7198_v6 = vpop.f32.mrb[1].mxu0 }
 0x399   : > { %v7199_v36 = vadd.f32 %v7198_v6, %v7197_v54  ;;  %v7200_v17 = vpop.f32.mrb[2].mxu0  ;;  %v7291_v48 = vpop.f32.mrb[132].mxu1 }
 0x39a   : > { %v7201_v62 = vpop.f32.mrb[3].mxu0  ;;  %v7292_v33 = vpop.f32.mrb[133].mxu1 }
 0x39b   : > { %v10318_v31 = vadd.f32 %v7199_v36, %v10206_v46  ;;  %v7202_v63 = vadd.f32 %v7201_v62, %v7200_v17  ;;  %v7293_v8 = vadd.f32 %v7292_v33, %v7291_v48  ;;  %v7294_v7 = vpop.f32.mrb[134].mxu1 }
 0x39c   : > { %v7295_v16 = vpop.f32.mrb[135].mxu1 }
 0x39d   : > { %v10321_v10 = vadd.f32 %v7202_v63, %v10208_v43  ;;  %v7296_v55 = vadd.f32 %v7295_v16, %v7294_v7  ;;  %v10324_v3 = vadd.f32 %v10263_v2, %v7293_v8 }
 0x39f   : > { %v7203_v1 = vpop.f32.mrb[4].mxu0  ;;  %v10327_v60 = vadd.f32 %v10266_v40, %v7296_v55 }
 0x3a0   : > { %v7204_v18 = vpop.f32.mrb[5].mxu0 }
 0x3a1   : > { %v7205_v38 = vadd.f32 %v7204_v18, %v7203_v1  ;;  %v7206_v0 = vpop.f32.mrb[6].mxu0  ;;  %v7297_v46 = vpop.f32.mrb[136].mxu1 }
 0x3a2   : > { %v7207_v32 = vpop.f32.mrb[7].mxu0  ;;  %v7298_v23 = vpop.f32.mrb[137].mxu1 }
 0x3a3   : > { %v10330_v9 = vadd.f32 %v7205_v38, %v10212_v61  ;;  %v7208_v4 = vadd.f32 %v7207_v32, %v7206_v0  ;;  %v7299_v43 = vadd.f32 %v7298_v23, %v7297_v46  ;;  %v7300_v47 = vpop.f32.mrb[138].mxu1 }
 0x3a4   : > { %v7301_v13 = vpop.f32.mrb[139].mxu1 }
 0x3a5   : > { %v10333_v2 = vadd.f32 %v7208_v4, %v10214_v50  ;;  %v7302_v14 = vadd.f32 %v7301_v13, %v7300_v47  ;;  %v10336_v40 = vadd.f32 %v10271_v21, %v7299_v43 }
 0x3a7   : > { %v7209_v27 = vpop.f32.mrb[8].mxu0  ;;  %v10339_v35 = vadd.f32 %v10275_v56, %v7302_v14 }
 0x3a8   : > { %v7210_v37 = vpop.f32.mrb[9].mxu0 }
 0x3a9   : > { %v7211_v59 = vadd.f32 %v7210_v37, %v7209_v27  ;;  %v7212_v15 = vpop.f32.mrb[10].mxu0  ;;  %v7303_v61 = vpop.f32.mrb[140].mxu1 }
 0x3aa   : > { %v7213_v54 = vpop.f32.mrb[11].mxu0  ;;  %v7304_v6 = vpop.f32.mrb[141].mxu1 }
 0x3ab   : > { %v10342_v36 = vadd.f32 %v7211_v59, %v10218_v20  ;;  %v7214_v17 = vadd.f32 %v7213_v54, %v7212_v15  ;;  %v7305_v50 = vadd.f32 %v7304_v6, %v7303_v61  ;;  %v7306_v48 = vpop.f32.mrb[142].mxu1 }
 0x3ac   : > { %v7307_v62 = vpop.f32.mrb[143].mxu1 }
 0x3ad   : > { %v10345_v21 = vadd.f32 %v7214_v17, %v10220_v29  ;;  %v7308_v33 = vadd.f32 %v7307_v62, %v7306_v48  ;;  %v10348_v56 = vadd.f32 %v10281_v30, %v7305_v50 }
 0x3af   : > { %v7215_v63 = vpop.f32.mrb[12].mxu0  ;;  %v10351_v8 = vadd.f32 %v10285_v52, %v7308_v33 }
 0x3b0   : > { %v7216_v7 = vpop.f32.mrb[13].mxu0 }
 0x3b1   : > { %v7217_v16 = vadd.f32 %v7216_v7, %v7215_v63  ;;  %v7218_v55 = vpop.f32.mrb[14].mxu0  ;;  %v7309_v20 = vpop.f32.mrb[144].mxu1 }
 0x3b2   : > { %v7219_v1 = vpop.f32.mrb[15].mxu0  ;;  %v7310_v18 = vpop.f32.mrb[145].mxu1 }
 0x3b3   : > { %v10354_v38 = vadd.f32 %v7217_v16, %v10224_v57  ;;  %v7220_v0 = vadd.f32 %v7219_v1, %v7218_v55  ;;  %v7311_v29 = vadd.f32 %v7310_v18, %v7309_v20  ;;  %v7312_v46 = vpop.f32.mrb[146].mxu1 }
 0x3b4   : > { %v7313_v32 = vpop.f32.mrb[147].mxu1 }
 0x3b5   : > { %v10357_v30 = vadd.f32 %v7220_v0, %v10226_v53  ;;  %v7314_v23 = vadd.f32 %v7313_v32, %v7312_v46  ;;  %v10360_v52 = vadd.f32 %v10288_v24, %v7311_v29 }
 0x3b7   : > { %v7221_v4 = vpop.f32.mrb[16].mxu0  ;;  %v10363_v43 = vadd.f32 %v10291_v5, %v7314_v23 }
 0x3b8   : > { %v7222_v47 = vpop.f32.mrb[17].mxu0 }
 0x3b9   : > { %v7223_v13 = vadd.f32 %v7222_v47, %v7221_v4  ;;  %v7224_v14 = vpop.f32.mrb[18].mxu0  ;;  %v7315_v57 = vpop.f32.mrb[148].mxu1 }
 0x3ba   : > { %v7225_v27 = vpop.f32.mrb[19].mxu0  ;;  %v7316_v37 = vpop.f32.mrb[149].mxu1 }
 0x3bb   : > { %v10366_v59 = vadd.f32 %v7223_v13, %v10230_v25  ;;  %v7226_v15 = vadd.f32 %v7225_v27, %v7224_v14  ;;  %v7317_v53 = vadd.f32 %v7316_v37, %v7315_v57  ;;  %v7318_v61 = vpop.f32.mrb[150].mxu1 }
 0x3bc   : > { %v7319_v54 = vpop.f32.mrb[151].mxu1 }
 0x3bd   : > { %v10369_v24 = vadd.f32 %v7226_v15, %v10232_v39  ;;  %v7320_v6 = vadd.f32 %v7319_v54, %v7318_v61  ;;  %v10372_v5 = vadd.f32 %v10294_v58, %v7317_v53 }
 0x3bf   : > { %v7227_v17 = vpop.f32.mrb[20].mxu0  ;;  %v10375_v50 = vadd.f32 %v10297_v51, %v7320_v6 }
 0x3c0   : > { %v7228_v48 = vpop.f32.mrb[21].mxu0 }
 0x3c1   : > { %v7229_v62 = vadd.f32 %v7228_v48, %v7227_v17  ;;  %v7230_v33 = vpop.f32.mrb[22].mxu0  ;;  %v7321_v25 = vpop.f32.mrb[152].mxu1 }
 0x3c2   : > { %v7231_v63 = vpop.f32.mrb[23].mxu0  ;;  %v7322_v7 = vpop.f32.mrb[153].mxu1 }
 0x3c3   : > { %v10378_v16 = vadd.f32 %v7229_v62, %v10236_v28  ;;  %v7232_v55 = vadd.f32 %v7231_v63, %v7230_v33  ;;  %v7323_v39 = vadd.f32 %v7322_v7, %v7321_v25  ;;  %v7324_v20 = vpop.f32.mrb[154].mxu1 }
 0x3c4   : > { %v7325_v1 = vpop.f32.mrb[155].mxu1 }
 0x3c5   : > { %v10381_v58 = vadd.f32 %v7232_v55, %v10238_v19  ;;  %v7326_v18 = vadd.f32 %v7325_v1, %v7324_v20  ;;  %v10384_v51 = vadd.f32 %v10300_v41, %v7323_v39 }
 0x3c7   : > { %v7233_v0 = vpop.f32.mrb[24].mxu0  ;;  %v10387_v29 = vadd.f32 %v10303_v34, %v7326_v18 }
 0x3c8   : > { %v7234_v46 = vpop.f32.mrb[25].mxu0 }
 0x3c9   : > { %v7235_v32 = vadd.f32 %v7234_v46, %v7233_v0  ;;  %v7236_v23 = vpop.f32.mrb[26].mxu0  ;;  %v7327_v28 = vpop.f32.mrb[156].mxu1 }
 0x3ca   : > { %v7237_v4 = vpop.f32.mrb[27].mxu0  ;;  %v7328_v47 = vpop.f32.mrb[157].mxu1 }
 0x3cb   : > { %v10390_v13 = vadd.f32 %v7235_v32, %v10242_v49  ;;  %v7238_v14 = vadd.f32 %v7237_v4, %v7236_v23  ;;  %v7329_v19 = vadd.f32 %v7328_v47, %v7327_v28  ;;  %v7330_v57 = vpop.f32.mrb[158].mxu1 }
 0x3cc   : > { %v7331_v27 = vpop.f32.mrb[159].mxu1 }
 0x3cd   : > { %v10393_v41 = vadd.f32 %v7238_v14, %v10244_v22  ;;  %v7332_v37 = vadd.f32 %v7331_v27, %v7330_v57  ;;  %v10396_v34 = vadd.f32 %v10306_v45, %v7329_v19 }
 0x3cf   : > { %v7239_v15 = vpop.f32.mrb[28].mxu0  ;;  %v10399_v53 = vadd.f32 %v10309_v12, %v7332_v37 }
 0x3d0   : > { %v7240_v61 = vpop.f32.mrb[29].mxu0 }
 0x3d1   : > { %v7241_v54 = vadd.f32 %v7240_v61, %v7239_v15  ;;  %v7242_v6 = vpop.f32.mrb[30].mxu0  ;;  %v7333_v49 = vpop.f32.mrb[160].mxu1 }
 0x3d2   : > { %v7243_v17 = vpop.f32.mrb[31].mxu0  ;;  %v7334_v48 = vpop.f32.mrb[161].mxu1 }
 0x3d3   : > { %v10402_v62 = vadd.f32 %v7241_v54, %v10248_v11  ;;  %v7244_v33 = vadd.f32 %v7243_v17, %v7242_v6  ;;  %v7335_v22 = vadd.f32 %v7334_v48, %v7333_v49  ;;  %v7336_v25 = vpop.f32.mrb[162].mxu1 }
 0x3d4   : > { %v7337_v63 = vpop.f32.mrb[163].mxu1 }
 0x3d5   : > { %v7911_v45 = vadd.f32 %v7244_v33, %v10250_v44  ;;  %v7338_v7 = vadd.f32 %v7337_v63, %v7336_v25  ;;  %v10406_v55 = vadd.f32 %v10318_v31, %v7335_v22 }
 0x3d7   : > { %v10409_v12 = vadd.f32 %v10321_v10, %v7338_v7 }
 0x3d9   : > { %v7339_v39 = vpop.f32.mrb[164].mxu1 }
 0x3da   : > { %v7340_v20 = vpop.f32.mrb[165].mxu1 }
 0x3db   : > { %v7341_v1 = vadd.f32 %v7340_v20, %v7339_v39  ;;  %v7342_v18 = vpop.f32.mrb[166].mxu1 }
 0x3dc   : > { %v7343_v0 = vpop.f32.mrb[167].mxu1 }
 0x3dd   : > { %v7344_v11 = vadd.f32 %v7343_v0, %v7342_v18  ;;  %v10412_v46 = vadd.f32 %v10330_v9, %v7341_v1 }
 0x3df   : > { %v10415_v32 = vadd.f32 %v10333_v2, %v7344_v11 }
 0x3e1   : > { %v7345_v44 = vpop.f32.mrb[168].mxu1 }
 0x3e2   : > { %v7346_v23 = vpop.f32.mrb[169].mxu1 }
 0x3e3   : > { %v7347_v28 = vadd.f32 %v7346_v23, %v7345_v44  ;;  %v7348_v31 = vpop.f32.mrb[170].mxu1 }
 0x3e4   : > { %v7349_v4 = vpop.f32.mrb[171].mxu1 }
 0x3e5   : > { %v7350_v47 = vadd.f32 %v7349_v4, %v7348_v31  ;;  %v10418_v10 = vadd.f32 %v10342_v36, %v7347_v28 }
 0x3e7   : > { %v10421_v14 = vadd.f32 %v10345_v21, %v7350_v47 }
 0x3e9   : > { %v7351_v19 = vpop.f32.mrb[172].mxu1 }
 0x3ea   : > { %v7352_v57 = vpop.f32.mrb[173].mxu1 }
 0x3eb   : > { %v7353_v27 = vadd.f32 %v7352_v57, %v7351_v19  ;;  %v7354_v9 = vpop.f32.mrb[174].mxu1 }
 0x3ec   : > { %v7355_v37 = vpop.f32.mrb[175].mxu1 }
 0x3ed   : > { %v7356_v15 = vadd.f32 %v7355_v37, %v7354_v9  ;;  %v10424_v2 = vadd.f32 %v10354_v38, %v7353_v27  ;;  %v10461_v37 = vld [vmem:[%s10637_s6] ss:$0 sm:$0xff] }
 0x3ef   : > { %v10427_v61 = vadd.f32 %v10357_v30, %v7356_v15 }
 0x3f1   : > { %v7357_v54 = vpop.f32.mrb[176].mxu1 }
 0x3f2   : > { %v7358_v6 = vpop.f32.mrb[177].mxu1 }
 0x3f3   : > { %v7359_v49 = vadd.f32 %v7358_v6, %v7357_v54  ;;  %v7360_v36 = vpop.f32.mrb[178].mxu1 }
 0x3f4   : > { %v7361_v17 = vpop.f32.mrb[179].mxu1 }
 0x3f5   : > { %v7362_v48 = vadd.f32 %v7361_v17, %v7360_v36  ;;  %v10430_v21 = vadd.f32 %v10366_v59, %v7359_v49  ;;  %v6417_v49 = vld [vmem:[%s8466_s26 + $0x31] sm:$0xff] }
 0x3f7   : > { %v10433_v33 = vadd.f32 %v10369_v24, %v7362_v48  ;;  %v6415_v48 = vld [vmem:[%s8466_s26 + $0x19] sm:$0xff] }
 0x3f9   : > { %v7363_v22 = vpop.f32.mrb[180].mxu1 }
 0x3fa   : > { %v7364_v25 = vpop.f32.mrb[181].mxu1 }
 0x3fb   : > { %v7365_v63 = vadd.f32 %v7364_v25, %v7363_v22  ;;  %v7366_v38 = vpop.f32.mrb[182].mxu1  ;;  %v6418_v25 = vld [vmem:[%s8466_s26 + $0x39] sm:$0xff] }
 0x3fc   : > { %v7367_v7 = vpop.f32.mrb[183].mxu1 }
 0x3fd   : > { %v7368_v39 = vadd.f32 %v7367_v7, %v7366_v38  ;;  %v10436_v30 = vadd.f32 %v10378_v16, %v7365_v63  ;;  %v6416_v7 = vld [vmem:[%s8466_s26 + $0x21] sm:$0xff] }
 0x3ff   : > { %v10439_v20 = vadd.f32 %v10381_v58, %v7368_v39 }
 0x401   : > { %v7369_v1 = vpop.f32.mrb[184].mxu1 }
 0x402   : > { %v7370_v18 = vpop.f32.mrb[185].mxu1 }
 0x403   : > { %v7371_v0 = vadd.f32 %v7370_v18, %v7369_v1  ;;  %v7372_v59 = vpop.f32.mrb[186].mxu1 }
 0x404   : > { %v7373_v11 = vpop.f32.mrb[187].mxu1 }
 0x405   : > { %v7374_v44 = vadd.f32 %v7373_v11, %v7372_v59  ;;  %v10442_v24 = vadd.f32 %v10390_v13, %v7371_v0  ;;  %v10455_v13 = vld [vmem:[%s10636_s5] ss:$0 sm:$0xff] }
 0x407   : > { %v10445_v23 = vadd.f32 %v10393_v41, %v7374_v44 }
 0x409   : > { %v7375_v28 = vpop.f32.mrb[188].mxu1 }
 0x40a   : > { %v7376_v31 = vpop.f32.mrb[189].mxu1 }
 0x40b   : > { %v7377_v4 = vadd.f32 %v7376_v31, %v7375_v28  ;;  %v7378_v16 = vpop.f32.mrb[190].mxu1 }
 0x40c   : > { %v7379_v47 = vpop.f32.mrb[191].mxu1 }
 0x40d   : > { %v7380_v58 = vadd.f32 %v7379_v47, %v7378_v16  ;;  %v10448_v19 = vadd.f32 %v10402_v62, %v7377_v4 }
 0x40f   : > { %v10450_v57 = vadd.f32 %v7911_v45, %v7380_v58 }
 0x411   : > { %v7663_v27 = vpop.f32.mrb[96].mxu1 }
 0x412   : > { %v7823_v41 = vadd.f32 %v10324_v3, %v7663_v27  ;;  %v5452_v9 = vpop.f32.mrb[97].mxu1 }
 0x413   : > { %v7826_v62 = vadd.f32 %v10312_v26, %v5452_v9  ;;  %v7664_v45 = vpop.f32.mrb[98].mxu1 }
 0x414   : > { %v5620_v15 = vmul.f32 %v7823_v41, %v10455_v13  ;;  %v7829_v54 = vadd.f32 %v10327_v60, %v7664_v45  ;;  %v5455_v6 = vpop.f32.mrb[99].mxu1  ;;  %v6421_v41 = vld [vmem:[%s8466_s26 + $0x61] sm:$0xff]  ;;  %v6419_v45 = vld [vmem:[%s8466_s26 + $0x49] sm:$0xff] }
 0x415   : > { %v5618_v36 = vmul.f32 %v7826_v62, %v10455_v13  ;;  %v7832_v3 = vadd.f32 %v10315_v42, %v5455_v6  ;;  %v6422_v6 = vld [vmem:[%s8466_s26 + $0x69] sm:$0xff] }
 0x416   : > { %v5659_v17 = vadd.f32 %v10461_v37, %v5620_v15  ;;  %v5621_v22 = vmul.f32 %v7829_v54, %v10455_v13 }
 0x417   : > { %v5657_v26 = vadd.f32 %v10461_v37, %v5618_v36  ;;  %v5619_v63 = vmul.f32 %v7832_v3, %v10455_v13  ;;  %v6420_v3 = vld [vmem:[%s8466_s26 + $0x51] sm:$0xff] }
 0x418   : > { %v5724_v38 = vadd.f32 %v6417_v49, %v5659_v17  ;;  %v5660_v60 = vadd.f32 %v10461_v37, %v5621_v22 }
 0x419   : > { %v5722_v42 = vadd.f32 %v6415_v48, %v5657_v26  ;;  %v5658_v39 = vadd.f32 %v10461_v37, %v5619_v63  ;;  %v7667_v1 = vpop.f32.mrb[100].mxu1 }
 0x41a   : > { %v5756_v18 = vmax.f32 %v5724_v38, 0.0  ;;  %v5725_v0 = vadd.f32 %v6418_v25, %v5660_v60  ;;  %v7835_v59 = vadd.f32 %v10348_v56, %v7667_v1  ;;  %v5468_v11 = vpop.f32.mrb[101].mxu1 }
 0x41b   : > { %v5754_v44 = vmax.f32 %v5722_v42, 0.0  ;;  %v5723_v28 = vadd.f32 %v6416_v7, %v5658_v39  ;;  %v7838_v31 = vadd.f32 %v10336_v40, %v5468_v11  ;;  %v7668_v4 = vpop.f32.mrb[102].mxu1 }
 0x41c   : > { %5788 = vst [vmem:[%s10481_s30 + $0x10] sm:$0xff] %v5756_v18  ;;  %v5757_v16 = vmax.f32 %v5725_v0, 0.0  ;;  %v5624_v47 = vmul.f32 %v7835_v59, %v10455_v13  ;;  %v7841_v58 = vadd.f32 %v10351_v8, %v7668_v4  ;;  %v5471_v27 = vpop.f32.mrb[103].mxu1  ;;  %v6425_v59 = vld [vmem:[%s8466_s26 + $0x91] sm:$0xff] }
 0x41d   : > { %5786 = vst [vmem:[%s10481_s30] sm:$0xff] %v5754_v44  ;;  %v5755_v56 = vmax.f32 %v5723_v28, 0.0  ;;  %v5622_v9 = vmul.f32 %v7838_v31, %v10455_v13  ;;  %v7844_v62 = vadd.f32 %v10339_v35, %v5471_v27  ;;  %v6423_v28 = vld [vmem:[%s8466_s26 + $0x79] sm:$0xff]  ;;  %v6424_v27 = vld [vmem:[%s8466_s26 + $0x81] sm:$0xff] }
 0x41e   : > { %5789 = vst [vmem:[%s10481_s30 + $0x18] sm:$0xff] %v5757_v16  ;;  %v5663_v40 = vadd.f32 %v10461_v37, %v5624_v47  ;;  %v5625_v15 = vmul.f32 %v7841_v58, %v10455_v13  ;;  %v6426_v16 = vld [vmem:[%s8466_s26 + $0x99] sm:$0xff] }
 0x41f   : > { %5787 = vst [vmem:[%s10481_s30 + $0x8] sm:$0xff] %v5755_v56  ;;  %v5661_v54 = vadd.f32 %v10461_v37, %v5622_v9  ;;  %v5623_v8 = vmul.f32 %v7844_v62, %v10455_v13 }
 0x420   : > { %v5728_v49 = vadd.f32 %v6421_v41, %v5663_v40  ;;  %v5664_v36 = vadd.f32 %v10461_v37, %v5625_v15 }
 0x421   : > { %v5726_v17 = vadd.f32 %v6419_v45, %v5661_v54  ;;  %v5662_v35 = vadd.f32 %v10461_v37, %v5623_v8  ;;  %v7671_v48 = vpop.f32.mrb[104].mxu1 }
 0x422   : > { %v5760_v22 = vmax.f32 %v5728_v49, 0.0  ;;  %v5729_v26 = vadd.f32 %v6422_v6, %v5664_v36  ;;  %v7847_v25 = vadd.f32 %v10372_v5, %v7671_v48  ;;  %v5484_v63 = vpop.f32.mrb[105].mxu1 }
 0x423   : > { %v5758_v38 = vmax.f32 %v5726_v17, 0.0  ;;  %v5727_v60 = vadd.f32 %v6420_v3, %v5662_v35  ;;  %v7850_v7 = vadd.f32 %v10360_v52, %v5484_v63  ;;  %v7672_v42 = vpop.f32.mrb[106].mxu1  ;;  %v6429_v35 = vld [vmem:[%s8466_s26 + $0xc1] sm:$0xff] }
 0x424   : > { %5792 = vst [vmem:[%s10481_s30 + $0x30] sm:$0xff] %v5760_v22  ;;  %v5761_v39 = vmax.f32 %v5729_v26, 0.0  ;;  %v5628_v1 = vmul.f32 %v7847_v25, %v10455_v13  ;;  %v7853_v18 = vadd.f32 %v10375_v50, %v7672_v42  ;;  %v5487_v0 = vpop.f32.mrb[107].mxu1  ;;  %v6427_v26 = vld [vmem:[%s8466_s26 + $0xa9] sm:$0xff]  ;;  %v6428_v42 = vld [vmem:[%s8466_s26 + $0xb1] sm:$0xff] }
 0x425   : > { %5790 = vst [vmem:[%s10481_s30 + $0x20] sm:$0xff] %v5758_v38  ;;  %v5759_v5 = vmax.f32 %v5727_v60, 0.0  ;;  %v5626_v11 = vmul.f32 %v7850_v7, %v10455_v13  ;;  %v7856_v44 = vadd.f32 %v10363_v43, %v5487_v0  ;;  %v6430_v38 = vld [vmem:[%s8466_s26 + $0xc9] sm:$0xff] }
 0x426   : > { %5793 = vst [vmem:[%s10481_s30 + $0x38] sm:$0xff] %v5761_v39  ;;  %v5667_v52 = vadd.f32 %v10461_v37, %v5628_v1  ;;  %v5629_v31 = vmul.f32 %v7853_v18, %v10455_v13 }
 0x427   : > { %5791 = vst [vmem:[%s10481_s30 + $0x28] sm:$0xff] %v5759_v5  ;;  %v5665_v4 = vadd.f32 %v10461_v37, %v5626_v11  ;;  %v5627_v50 = vmul.f32 %v7856_v44, %v10455_v13 }
 0x428   : > { %v5732_v47 = vadd.f32 %v6425_v59, %v5667_v52  ;;  %v5668_v58 = vadd.f32 %v10461_v37, %v5629_v31 }
 0x429   : > { %v5730_v56 = vadd.f32 %v6423_v28, %v5665_v4  ;;  %v5666_v43 = vadd.f32 %v10461_v37, %v5627_v50  ;;  %v7675_v41 = vpop.f32.mrb[108].mxu1 }
 0x42a   : > { %v5764_v9 = vmax.f32 %v5732_v47, 0.0  ;;  %v5733_v62 = vadd.f32 %v6426_v16, %v5668_v58  ;;  %v7859_v40 = vadd.f32 %v10396_v34, %v7675_v41  ;;  %v5500_v45 = vpop.f32.mrb[109].mxu1  ;;  %v6433_v47 = vld [vmem:[%s8466_s26 + $0xf1] sm:$0xff] }
 0x42b   : > { %v5762_v15 = vmax.f32 %v5730_v56, 0.0  ;;  %v5731_v54 = vadd.f32 %v6424_v27, %v5666_v43  ;;  %v7862_v6 = vadd.f32 %v10384_v51, %v5500_v45  ;;  %v7676_v8 = vpop.f32.mrb[110].mxu1  ;;  %v6431_v56 = vld [vmem:[%s8466_s26 + $0xd9] sm:$0xff]  ;;  %v6432_v45 = vld [vmem:[%s8466_s26 + $0xe1] sm:$0xff] }
 0x42c   : > { %5796 = vst [vmem:[%s10481_s30 + $0x50] sm:$0xff] %v5764_v9  ;;  %v5765_v49 = vmax.f32 %v5733_v62, 0.0  ;;  %v5632_v36 = vmul.f32 %v7859_v40, %v10455_v13  ;;  %v7865_v3 = vadd.f32 %v10399_v53, %v7676_v8  ;;  %v5503_v17 = vpop.f32.mrb[111].mxu1  ;;  %v6434_v9 = vld [vmem:[%s8466_s26 + $0xf9] sm:$0xff] }
 0x42d   : > { %5794 = vst [vmem:[%s10481_s30 + $0x40] sm:$0xff] %v5762_v15  ;;  %v5763_v34 = vmax.f32 %v5731_v54, 0.0  ;;  %v5630_v48 = vmul.f32 %v7862_v6, %v10455_v13  ;;  %v7868_v22 = vadd.f32 %v10387_v29, %v5503_v17 }
 0x42e   : > { %5797 = vst [vmem:[%s10481_s30 + $0x58] sm:$0xff] %v5765_v49  ;;  %v5671_v51 = vadd.f32 %v10461_v37, %v5632_v36  ;;  %v5633_v25 = vmul.f32 %v7865_v3, %v10455_v13 }
 0x42f   : > { %5795 = vst [vmem:[%s10481_s30 + $0x48] sm:$0xff] %v5763_v34  ;;  %v5669_v63 = vadd.f32 %v10461_v37, %v5630_v48  ;;  %v5631_v53 = vmul.f32 %v7868_v22, %v10455_v13 }
 0x430   : > { %v5736_v60 = vadd.f32 %v6429_v35, %v5671_v51  ;;  %v5672_v7 = vadd.f32 %v10461_v37, %v5633_v25  ;;  %v6437_v25 = vld [vmem:[%s8466_s26 + $0x121] sm:$0xff] }
 0x431   : > { %v5734_v39 = vadd.f32 %v6427_v26, %v5669_v63  ;;  %v5670_v29 = vadd.f32 %v10461_v37, %v5631_v53  ;;  %v7679_v1 = vpop.f32.mrb[112].mxu1  ;;  %v6435_v53 = vld [vmem:[%s8466_s26 + $0x109] sm:$0xff] }
 0x432   : > { %v5768_v18 = vmax.f32 %v5736_v60, 0.0  ;;  %v5737_v0 = vadd.f32 %v6430_v38, %v5672_v7  ;;  %v7871_v5 = vadd.f32 %v10412_v46, %v7679_v1  ;;  %v5516_v59 = vpop.f32.mrb[113].mxu1  ;;  %v6436_v1 = vld [vmem:[%s8466_s26 + $0x111] sm:$0xff] }
 0x433   : > { %v5766_v11 = vmax.f32 %v5734_v39, 0.0  ;;  %v5735_v44 = vadd.f32 %v6428_v42, %v5670_v29  ;;  %v7874_v52 = vadd.f32 %v10406_v55, %v5516_v59  ;;  %v7680_v28 = vpop.f32.mrb[114].mxu1  ;;  %v6438_v42 = vld [vmem:[%s8466_s26 + $0x129] sm:$0xff] }
 0x434   : > { %5800 = vst [vmem:[%s10481_s30 + $0x70] sm:$0xff] %v5768_v18  ;;  %v5769_v31 = vmax.f32 %v5737_v0, 0.0  ;;  %v5636_v4 = vmul.f32 %v7871_v5, %v10455_v13  ;;  %v7877_v16 = vadd.f32 %v10415_v32, %v7680_v28  ;;  %v5519_v50 = vpop.f32.mrb[115].mxu1 }
 0x435   : > { %5798 = vst [vmem:[%s10481_s30 + $0x60] sm:$0xff] %v5766_v11  ;;  %v5767_v46 = vmax.f32 %v5735_v44, 0.0  ;;  %v5634_v58 = vmul.f32 %v7874_v52, %v10455_v13  ;;  %v7880_v27 = vadd.f32 %v10409_v12, %v5519_v50 }
 0x436   : > { %5801 = vst [vmem:[%s10481_s30 + $0x78] sm:$0xff] %v5769_v31  ;;  %v5675_v55 = vadd.f32 %v10461_v37, %v5636_v4  ;;  %v5637_v43 = vmul.f32 %v7877_v16, %v10455_v13 }
 0x437   : > { %5799 = vst [vmem:[%s10481_s30 + $0x68] sm:$0xff] %v5767_v46  ;;  %v5673_v41 = vadd.f32 %v10461_v37, %v5634_v58  ;;  %v5635_v32 = vmul.f32 %v7880_v27, %v10455_v13  ;;  %v6441_v58 = vld [vmem:[%s8466_s26 + $0x151] sm:$0xff] }
 0x438   : > { %v5740_v62 = vadd.f32 %v6433_v47, %v5675_v55  ;;  %v5676_v40 = vadd.f32 %v10461_v37, %v5637_v43 }
 0x439   : > { %v5738_v15 = vadd.f32 %v6431_v56, %v5673_v41  ;;  %v5674_v12 = vadd.f32 %v10461_v37, %v5635_v32  ;;  %v7683_v54 = vpop.f32.mrb[116].mxu1  ;;  %v6439_v56 = vld [vmem:[%s8466_s26 + $0x139] sm:$0xff] }
 0x43a   : > { %v5772_v6 = vmax.f32 %v5740_v62, 0.0  ;;  %v5741_v8 = vadd.f32 %v6434_v9, %v5676_v40  ;;  %v7883_v49 = vadd.f32 %v10424_v2, %v7683_v54  ;;  %v5532_v36 = vpop.f32.mrb[117].mxu1  ;;  %v6442_v9 = vld [vmem:[%s8466_s26 + $0x159] sm:$0xff]  ;;  %v6440_v40 = vld [vmem:[%s8466_s26 + $0x141] sm:$0xff] }
 0x43b   : > { %v5770_v3 = vmax.f32 %v5738_v15, 0.0  ;;  %v5739_v17 = vadd.f32 %v6432_v45, %v5674_v12  ;;  %v7886_v34 = vadd.f32 %v10418_v10, %v5532_v36  ;;  %v7684_v35 = vpop.f32.mrb[118].mxu1 }
 0x43c   : > { %5804 = vst [vmem:[%s10481_s30 + $0x90] sm:$0xff] %v5772_v6  ;;  %v5773_v48 = vmax.f32 %v5741_v8, 0.0  ;;  %v5640_v22 = vmul.f32 %v7883_v49, %v10455_v13  ;;  %v7889_v51 = vadd.f32 %v10427_v61, %v7684_v35  ;;  %v5535_v26 = vpop.f32.mrb[119].mxu1 }
 0x43d   : > { %5802 = vst [vmem:[%s10481_s30 + $0x80] sm:$0xff] %v5770_v3  ;;  %v5771_v2 = vmax.f32 %v5739_v17, 0.0  ;;  %v5638_v63 = vmul.f32 %v7886_v34, %v10455_v13  ;;  %v7892_v38 = vadd.f32 %v10421_v14, %v5535_v26 }
 0x43e   : > { %5805 = vst [vmem:[%s10481_s30 + $0x98] sm:$0xff] %v5773_v48  ;;  %v5679_v10 = vadd.f32 %v10461_v37, %v5640_v22  ;;  %v5641_v60 = vmul.f32 %v7889_v51, %v10455_v13  ;;  %v6445_v51 = vld [vmem:[%s8466_s26 + $0x181] sm:$0xff] }
 0x43f   : > { %5803 = vst [vmem:[%s10481_s30 + $0x88] sm:$0xff] %v5771_v2  ;;  %v5677_v7 = vadd.f32 %v10461_v37, %v5638_v63  ;;  %v5639_v61 = vmul.f32 %v7892_v38, %v10455_v13  ;;  %v6446_v38 = vld [vmem:[%s8466_s26 + $0x189] sm:$0xff] }
 0x440   : > { %v5744_v39 = vadd.f32 %v6437_v25, %v5679_v10  ;;  %v5680_v29 = vadd.f32 %v10461_v37, %v5641_v60  ;;  %v6443_v25 = vld [vmem:[%s8466_s26 + $0x169] sm:$0xff] }
 0x441   : > { %v5742_v18 = vadd.f32 %v6435_v53, %v5677_v7  ;;  %v5678_v14 = vadd.f32 %v10461_v37, %v5639_v61  ;;  %v7687_v0 = vpop.f32.mrb[120].mxu1 }
 0x442   : > { %v5776_v5 = vmax.f32 %v5744_v39, 0.0  ;;  %v5745_v59 = vadd.f32 %v6438_v42, %v5680_v29  ;;  %v7895_v11 = vadd.f32 %v10436_v30, %v7687_v0  ;;  %v5548_v44 = vpop.f32.mrb[121].mxu1 }
 0x443   : > { %v5774_v52 = vmax.f32 %v5742_v18, 0.0  ;;  %v5743_v28 = vadd.f32 %v6436_v1, %v5678_v14  ;;  %v7898_v31 = vadd.f32 %v10430_v21, %v5548_v44  ;;  %v7688_v4 = vpop.f32.mrb[122].mxu1 }
 0x444   : > { %5808 = vst [vmem:[%s10481_s30 + $0xb0] sm:$0xff] %v5776_v5  ;;  %v5777_v16 = vmax.f32 %v5745_v59, 0.0  ;;  %v5644_v50 = vmul.f32 %v7895_v11, %v10455_v13  ;;  %v7901_v46 = vadd.f32 %v10439_v20, %v7688_v4  ;;  %v5551_v47 = vpop.f32.mrb[123].mxu1 }
 0x445   : > { %5806 = vst [vmem:[%s10481_s30 + $0xa0] sm:$0xff] %v5774_v52  ;;  %v5775_v30 = vmax.f32 %v5743_v28, 0.0  ;;  %v5642_v27 = vmul.f32 %v7898_v31, %v10455_v13  ;;  %v7904_v55 = vadd.f32 %v10433_v33, %v5551_v47 }
 0x446   : > { %5809 = vst [vmem:[%s10481_s30 + $0xb8] sm:$0xff] %v5777_v16  ;;  %v5683_v21 = vadd.f32 %v10461_v37, %v5644_v50  ;;  %v5645_v43 = vmul.f32 %v7901_v46, %v10455_v13 }
 0x447   : > { %5807 = vst [vmem:[%s10481_s30 + $0xa8] sm:$0xff] %v5775_v30  ;;  %v5681_v41 = vadd.f32 %v10461_v37, %v5642_v27  ;;  %v5643_v20 = vmul.f32 %v7904_v55, %v10455_v13 }
 0x448   : > { %v5748_v32 = vadd.f32 %v6441_v58, %v5683_v21  ;;  %v5684_v62 = vadd.f32 %v10461_v37, %v5645_v43 }
 0x449   : > { %v5746_v45 = vadd.f32 %v6439_v56, %v5681_v41  ;;  %v5682_v33 = vadd.f32 %v10461_v37, %v5643_v20  ;;  %v7691_v15 = vpop.f32.mrb[124].mxu1 }
 0x44a   : > { %v5780_v12 = vmax.f32 %v5748_v32, 0.0  ;;  %v5749_v54 = vadd.f32 %v6442_v9, %v5684_v62  ;;  %v7907_v6 = vadd.f32 %v10448_v19, %v7691_v15  ;;  %v5564_v8 = vpop.f32.mrb[125].mxu1 }
 0x44b   : > { %v5778_v49 = vmax.f32 %v5746_v45, 0.0  ;;  %v5747_v36 = vadd.f32 %v6440_v40, %v5682_v33  ;;  %v7910_v3 = vadd.f32 %v10442_v24, %v5564_v8  ;;  %v7692_v17 = vpop.f32.mrb[126].mxu1 }
 0x44c   : > { %5812 = vst [vmem:[%s10481_s30 + $0xd0] sm:$0xff] %v5780_v12  ;;  %v5781_v34 = vmax.f32 %v5749_v54, 0.0  ;;  %v5648_v35 = vmul.f32 %v7907_v6, %v10455_v13  ;;  %v7913_v48 = vadd.f32 %v10450_v57, %v7692_v17  ;;  %v5567_v22 = vpop.f32.mrb[127].mxu1 }
 0x44d   : > { %5810 = vst [vmem:[%s10481_s30 + $0xc0] sm:$0xff] %v5778_v49  ;;  %v5779_v19 = vmax.f32 %v5747_v36, 0.0  ;;  %v5646_v26 = vmul.f32 %v7910_v3, %v10455_v13  ;;  %v7916_v2 = vadd.f32 %v10445_v23, %v5567_v22  ;;  %v6444_v23 = vld [vmem:[%s8466_s26 + $0x171] sm:$0xff] }
 0x44e   : > { %5813 = vst [vmem:[%s10481_s30 + $0xd8] sm:$0xff] %v5781_v34  ;;  %v5687_v24 = vadd.f32 %v10461_v37, %v5648_v35  ;;  %v5649_v63 = vmul.f32 %v7913_v48, %v10455_v13 }
 0x44f   : > { %5811 = vst [vmem:[%s10481_s30 + $0xc8] sm:$0xff] %v5779_v19  ;;  %v5685_v57 = vadd.f32 %v10461_v37, %v5646_v26  ;;  %v5647_v10 = vmul.f32 %v7916_v2, %v10455_v13 }
 0x450   : > { %v5752_v53 = vadd.f32 %v6445_v51, %v5687_v24  ;;  %v5688_v60 = vadd.f32 %v10461_v37, %v5649_v63 }
 0x451   : > { %v5750_v7 = vadd.f32 %v6443_v25, %v5685_v57  ;;  %v5686_v42 = vadd.f32 %v10461_v37, %v5647_v10 }
 0x452   : > { %v5784_v61 = vmax.f32 %v5752_v53, 0.0  ;;  %v5753_v39 = vadd.f32 %v6446_v38, %v5688_v60 }
 0x453   : > { %v5782_v29 = vmax.f32 %v5750_v7, 0.0  ;;  %v5751_v1 = vadd.f32 %v6444_v23, %v5686_v42 }
 0x454   : > { %5816 = vst [vmem:[%s10481_s30 + $0xf0] sm:$0xff] %v5784_v61  ;;  %v5785_v18 = vmax.f32 %v5753_v39, 0.0 }
 0x455   : > { %5814 = vst [vmem:[%s10481_s30 + $0xe0] sm:$0xff] %v5782_v29  ;;  %v5783_v14 = vmax.f32 %v5751_v1, 0.0 }
 0x456   : > { %5817 = vst [vmem:[%s10481_s30 + $0xf8] sm:$0xff] %v5785_v18 }
 0x457   : > { %5815 = vst [vmem:[%s10481_s30 + $0xe8] sm:$0xff] %v5783_v14 }
 0x458 PF: > { %s17_s24 = sadd.s32 1, %s8316_s24  }
 0x459   : > { %p14_p4 = scmp.ge.s32.totalorder %s17_s24, 4  }
 0x45b   :  { %16 = sbr.rel (!%p14_p4) target bundleno = 1 (0x1), region = 84 }

</bundles_post_ra>
